<compile_context>
chip_gen: v6e
topology: v6e:2x2x1
jax: 0.10.0
libtpu: 0.0.40
codegen_flags: <defaults>
</compile_context>

<pallas_src>
import functools

import jax
import jax.numpy as jnp
from jax.experimental import pallas as pl
from jax.experimental.pallas import tpu as pltpu

_EPS = 1e-5


# ---------------------------------------------------------------------------
# Fused kernel (single grid step):
#   fc1(all rows) -> gated score (both orientations, lane dense)
#   -> both max reductions (sublane) -> folded-BN MLP via block-diag weights
#   -> [q, k] output in one store.
# ---------------------------------------------------------------------------
def _decoder_layer_kernel(x_ref, w1t_ref, b1_ref, gate_ts_ref, gate_st_ref,
                          w2k_ref, b2k_ref, w2q_ref, b2q_ref,
                          w3k_ref, w3q_ref, bf_ref, o_ref, *, q, k, L):
    f32 = jnp.float32
    dn = (((1,), (1,)), ((), ()))   # contract last dim of both operands: A @ B^T
    QL = q * L

    # fc1 for all query rows and all memory rows in one MXU push.
    z = jnp.dot(x_ref[...], w1t_ref[...], preferred_element_type=f32) + b1_ref[...]
    q_all = z[:QL, :]               # [q*L, d]   rows (qi, t)
    k_all = z[QL:, :]               # [k*L, d]   rows (j, s)

    # Gated scores in both orientations (gates already sigmoided host-side).
    s_ts = jax.lax.dot_general(q_all, k_all, dn,
                               preferred_element_type=f32) * gate_ts_ref[...]  # [qL, kL]
    s_st = jax.lax.dot_general(k_all, q_all, dn,
                               preferred_element_type=f32) * gate_st_ref[...]  # [kL, qL]

    # mb[qi, j*L+s] = max_t score[qi, j, s, t]   (sublane reduce per query block)
    mb = jnp.concatenate(
        [jnp.max(s_ts[i * L:(i + 1) * L, :], axis=0, keepdims=True)
         for i in range(q)], axis=0)                                            # [q, kL]
    # ma[j, qi*L+t] = max_s score[qi, j, s, t]   (sublane reduce per key block)
    ma = jnp.concatenate(
        [jnp.max(s_st[j * L:(j + 1) * L, :], axis=0, keepdims=True)
         for j in range(k)], axis=0)                                            # [k, qL]

    # bn1 -> fc2 -> bn2 folded into block-diagonal (w2*, b2*); relu.
    yb = jnp.maximum(
        jnp.dot(mb, w2k_ref[...], preferred_element_type=f32) + b2k_ref[...], 0.0)  # [q, kF]
    ya = jnp.maximum(
        jnp.dot(ma, w2q_ref[...], preferred_element_type=f32) + b2q_ref[...], 0.0)  # [k, qF]

    # bn3*fc3 folded into block rows; both branches land directly on [q, k].
    z_b = jax.lax.dot_general(yb, w3k_ref[...], dn, preferred_element_type=f32)     # [q, k]
    z_a = jax.lax.dot_general(w3q_ref[...], ya, dn, preferred_element_type=f32)     # [q, k]

    o_ref[...] = z_b + z_a + bf_ref[...]


# ---------------------------------------------------------------------------
# Wrapper: host-side layout prep + eval-mode BN folding, one pallas_call.
# ---------------------------------------------------------------------------
def _fold_bn(p):
    gamma, beta, rm, rv = p
    scale = gamma / jnp.sqrt(rv + _EPS)
    shift = beta - rm * scale
    return scale, shift


def transformer_decoder_layer(tgt, memory, params):
    q, h, w, d = tgt.shape
    k = memory.shape[0]
    L = h * w
    F = params["w2"].shape[0]

    # All query rows followed by all memory rows -> one fc1 matmul.
    x_all = jnp.concatenate(
        [tgt.reshape(q * L, d), memory.reshape(k * L, d)], axis=0).astype(jnp.float32)

    # Weight layout prep + eval-mode BN algebra (done once, host side).
    w1t = params["w1"].T                              # [d, d]
    b1r = params["b1"].reshape(1, d)
    sig = jax.nn.sigmoid(params["score_embed"])       # [L(s), L(t)] — sigmoid host-side
    gate_ts = jnp.tile(sig.T, (q, k))                 # [qL, kL]: [qi*L+t, j*L+s] -> sig[s, t]
    gate_st = jnp.tile(sig, (k, q))                   # [kL, qL]: [j*L+s, qi*L+t] -> sig[s, t]

    s1, c1 = _fold_bn(params["bn1"])                  # scalars (shape (1,))
    s2, c2 = _fold_bn(params["bn2"])                  # [F]
    s3, c3 = _fold_bn(params["bn3"])                  # scalars (shape (1,))
    w2 = params["w2"]                                 # [F, L]
    w2f = (w2.T * s1) * s2[None, :]                   # [L, F]  bn1+fc2+bn2 weight
    b2f = ((c1 * w2.sum(axis=1) + params["b2"]) * s2 + c2).reshape(1, F)
    w3f = (s3 * params["w3"][0]).reshape(1, F)        # bn3 scale folded into fc3 row
    bf = (2.0 * params["b3"][0] * s3 + c3).reshape(1, 1)

    # Block-diagonal expansions: keep both MLP branches lane/sublane-natural
    # (no lane-offset slicing / relayouts inside the kernel).
    eye_k = jnp.eye(k, dtype=jnp.float32)
    eye_q = jnp.eye(q, dtype=jnp.float32)
    w2bd_k = jnp.kron(eye_k, w2f)                     # [kL, kF]
    w2bd_q = jnp.kron(eye_q, w2f)                     # [qL, qF]
    b2bd_k = jnp.tile(b2f, (1, k))                    # [1, kF]
    b2bd_q = jnp.tile(b2f, (1, q))                    # [1, qF]
    w3bd_k = jnp.kron(eye_k, w3f)                     # [k, kF]
    w3bd_q = jnp.kron(eye_q, w3f)                     # [q, qF]

    kernel = functools.partial(_decoder_layer_kernel, q=q, k=k, L=L)
    spec2 = lambda shp: pl.BlockSpec(shp, lambda i: (0, 0))

    out = pl.pallas_call(
        kernel,
        out_shape=jax.ShapeDtypeStruct((q, k), jnp.float32),
        grid=(1,),
        in_specs=[
            spec2(((q + k) * L, d)),     # fc1 input rows (queries then keys)
            spec2((d, d)),               # W1^T
            spec2((1, d)),               # b1
            spec2((q * L, k * L)),       # sigmoided gate, (qt, ks) orientation
            spec2((k * L, q * L)),       # sigmoided gate, (ks, qt) orientation
            spec2((k * L, k * F)),       # block-diag folded W2 (xb branch)
            spec2((1, k * F)),           # tiled folded b2 (xb branch)
            spec2((q * L, q * F)),       # block-diag folded W2 (xa branch)
            spec2((1, q * F)),           # tiled folded b2 (xa branch)
            spec2((k, k * F)),           # block-row folded w3 (xb branch)
            spec2((q, q * F)),           # block-row folded w3 (xa branch)
            spec2((1, 1)),               # folded output bias
        ],
        out_specs=spec2((q, k)),
        compiler_params=pltpu.CompilerParams(
            dimension_semantics=("arbitrary",)),
    )(x_all, w1t, b1r, gate_ts, gate_st,
      w2bd_k, b2bd_k, w2bd_q, b2bd_q, w3bd_k, w3bd_q, bf)

    return out


# ---------------------------------------------------------------------------
# Pure-JAX reference mirroring the PyTorch forward (eval-mode BN).
# ---------------------------------------------------------------------------
def reference(tgt, memory, params):
    q, h, w, d = tgt.shape
    k = memory.shape[0]
    seq_len = h * w
    tgt = tgt.reshape(q, seq_len, d)
    mem = memory.reshape(k, seq_len, d)
    query = tgt @ params["w1"].T + params["b1"]
    keym = mem @ params["w1"].T + params["b1"]
    sig = jax.nn.sigmoid(params["score_embed"])
    score = jnp.einsum("qtd,ksd->qkst", query, keym) * sig[None, None]
    score = score.reshape(q * k, seq_len, seq_len)
    score = jnp.concatenate([score.max(axis=1), score.max(axis=2)], axis=-1)
    score = score.reshape(-1, 1, seq_len)
    g, b, rm, rv = params["bn1"]
    score = (score - rm.reshape(1, 1, 1)) / jnp.sqrt(rv.reshape(1, 1, 1) + _EPS)
    score = score * g.reshape(1, 1, 1) + b.reshape(1, 1, 1)
    score = score.reshape(-1, seq_len)
    score = score @ params["w2"].T + params["b2"]
    g, b, rm, rv = params["bn2"]
    score = (score - rm) / jnp.sqrt(rv + _EPS) * g + b
    score = jnp.maximum(score, 0.0)
    score = score @ params["w3"].T + params["b3"]
    score = score.reshape(-1, 2).sum(axis=-1, keepdims=True)
    g, b, rm, rv = params["bn3"]
    score = (score - rm) / jnp.sqrt(rv + _EPS) * g + b
    return score.reshape(q, k)


# ---------------------------------------------------------------------------
# Deterministic parameter init + run.
# ---------------------------------------------------------------------------
def _bn_init(keys, n):
    k1, k2, k3, k4 = keys
    gamma = jax.random.uniform(k1, (n,), minval=0.5, maxval=1.5)
    beta = jax.random.normal(k2, (n,)) * 0.1
    rm = jax.random.normal(k3, (n,)) * 0.1
    rv = jax.random.uniform(k4, (n,), minval=0.5, maxval=1.5)
    return (gamma, beta, rm, rv)


if __name__ == "__main__":
    q_len, k_len = 6, 4
    h, w = 4, 8
    seq_len = h * w              # 32
    d_model = 32
    dim_ff = 64

    ks = jax.random.split(jax.random.PRNGKey(0), 24)

    a = jax.random.normal(ks[0], (seq_len, seq_len), jnp.float32)
    params = {
        "score_embed": a + a.T,   # module init is symmetric
        "w1": jax.random.normal(ks[1], (d_model, d_model)) / jnp.sqrt(d_model),
        "b1": jax.random.normal(ks[2], (d_model,)) * 0.1,
        "w2": jax.random.normal(ks[3], (dim_ff, seq_len)) / jnp.sqrt(seq_len),
        "b2": jax.random.normal(ks[4], (dim_ff,)) * 0.1,
        "w3": jax.random.normal(ks[5], (1, dim_ff)) / jnp.sqrt(dim_ff),
        "b3": jax.random.normal(ks[6], (1,)) * 0.1,
        "bn1": _bn_init(ks[7:11], 1),
        "bn2": _bn_init(ks[11:15], dim_ff),
        "bn3": _bn_init(ks[15:19], 1),
    }

    tgt = jax.random.normal(ks[19], (q_len, h, w, d_model), jnp.float32)
    memory = jax.random.normal(ks[20], (k_len, h, w, d_model), jnp.float32)

    fn = jax.jit(transformer_decoder_layer)

    out = jax.block_until_ready(fn(tgt, memory, params))
    ref = reference(tgt, memory, params)
    assert out.shape == (q_len, k_len)
    if not jnp.allclose(out, ref, rtol=1e-3, atol=1e-3):
        raise SystemExit(
            f"mismatch (symmetric): max abs err = {float(jnp.max(jnp.abs(out - ref)))}"
        )

    # Non-symmetric score_embed check: locks in the gate (s, t) orientation,
    # which a symmetric score_embed could not distinguish.
    params_asym = dict(params)
    params_asym["score_embed"] = jax.random.normal(
        ks[21], (seq_len, seq_len), jnp.float32)
    out2 = jax.block_until_ready(fn(tgt, memory, params_asym))
    ref2 = reference(tgt, memory, params_asym)
    if not jnp.allclose(out2, ref2, rtol=1e-3, atol=1e-3):
        raise SystemExit(
            f"mismatch (asymmetric): max abs err = {float(jnp.max(jnp.abs(out2 - ref2)))}"
        )

    print("KERNEL_OK")
</pallas_src>

<mosaic_0001>
module attributes {stable_mosaic.version = 11 : i64} {
  func.func @_decoder_layer_kernel(%arg0: i32, %arg1: memref<320x32xf32, #tpu.memory_space<vmem>>, %arg2: memref<32x32xf32, #tpu.memory_space<vmem>>, %arg3: memref<1x32xf32, #tpu.memory_space<vmem>>, %arg4: memref<192x128xf32, #tpu.memory_space<vmem>>, %arg5: memref<128x192xf32, #tpu.memory_space<vmem>>, %arg6: memref<128x256xf32, #tpu.memory_space<vmem>>, %arg7: memref<1x256xf32, #tpu.memory_space<vmem>>, %arg8: memref<192x384xf32, #tpu.memory_space<vmem>>, %arg9: memref<1x384xf32, #tpu.memory_space<vmem>>, %arg10: memref<4x256xf32, #tpu.memory_space<vmem>>, %arg11: memref<6x384xf32, #tpu.memory_space<vmem>>, %arg12: memref<1x1xf32, #tpu.memory_space<vmem>>, %arg13: memref<6x4xf32, #tpu.memory_space<vmem>>) attributes {dimension_semantics = [#tpu.dimension_semantics<arbitrary>], iteration_bounds = array<i64: 1>, scalar_prefetch = 0 : i64, scratch_operands = 0 : i64, tpu.core_type = #tpu.core_type<tc>, window_params = [{pipeline_mode = #tpu.pipeline_mode<synchronous>, transform_indices = @transform_0, window_bounds = array<i64: 320, 32>}, {pipeline_mode = #tpu.pipeline_mode<synchronous>, transform_indices = @transform_1, window_bounds = array<i64: 32, 32>}, {pipeline_mode = #tpu.pipeline_mode<synchronous>, transform_indices = @transform_2, window_bounds = array<i64: 1, 32>}, {pipeline_mode = #tpu.pipeline_mode<synchronous>, transform_indices = @transform_3, window_bounds = array<i64: 192, 128>}, {pipeline_mode = #tpu.pipeline_mode<synchronous>, transform_indices = @transform_4, window_bounds = array<i64: 128, 192>}, {pipeline_mode = #tpu.pipeline_mode<synchronous>, transform_indices = @transform_5, window_bounds = array<i64: 128, 256>}, {pipeline_mode = #tpu.pipeline_mode<synchronous>, transform_indices = @transform_6, window_bounds = array<i64: 1, 256>}, {pipeline_mode = #tpu.pipeline_mode<synchronous>, transform_indices = @transform_7, window_bounds = array<i64: 192, 384>}, {pipeline_mode = #tpu.pipeline_mode<synchronous>, transform_indices = @transform_8, window_bounds = array<i64: 1, 384>}, {pipeline_mode = #tpu.pipeline_mode<synchronous>, transform_indices = @transform_9, window_bounds = array<i64: 4, 256>}, {pipeline_mode = #tpu.pipeline_mode<synchronous>, transform_indices = @transform_10, window_bounds = array<i64: 6, 384>}, {pipeline_mode = #tpu.pipeline_mode<synchronous>, transform_indices = @transform_11, window_bounds = array<i64: 1, 1>}, {pipeline_mode = #tpu.pipeline_mode<synchronous>, transform_indices = @transform_12, window_bounds = array<i64: 6, 4>}]} {
    %c0 = arith.constant 0 : index
    %c0_0 = arith.constant 0 : index
    %0 = vector.load %arg1[%c0, %c0_0] : memref<320x32xf32, #tpu.memory_space<vmem>>, vector<320x32xf32>
    %c0_1 = arith.constant 0 : index
    %c0_2 = arith.constant 0 : index
    %1 = vector.load %arg2[%c0_1, %c0_2] : memref<32x32xf32, #tpu.memory_space<vmem>>, vector<32x32xf32>
    %cst = arith.constant dense<0.000000e+00> : vector<320x32xf32>
    %2 = tpu.matmul %0, %1, %cst {dimension_numbers = #tpu.dot_dimension_numbers<[1], [0], [0], [1], [0, 0, 1, 1], [], []>} : vector<320x32xf32>, vector<32x32xf32>, vector<320x32xf32> -> vector<320x32xf32>
    %c0_3 = arith.constant 0 : index
    %c0_4 = arith.constant 0 : index
    %3 = vector.load %arg3[%c0_3, %c0_4] : memref<1x32xf32, #tpu.memory_space<vmem>>, vector<1x32xf32>
    %4 = vector.broadcast %3 : vector<1x32xf32> to vector<320x32xf32>
    %5 = arith.addf %2, %4 : vector<320x32xf32>
    %6 = vector.extract_strided_slice %5 {offsets = [0, 0], sizes = [192, 32], strides = [1, 1]} : vector<320x32xf32> to vector<192x32xf32>
    %7 = vector.extract_strided_slice %5 {offsets = [192, 0], sizes = [128, 32], strides = [1, 1]} : vector<320x32xf32> to vector<128x32xf32>
    %cst_5 = arith.constant dense<0.000000e+00> : vector<192x128xf32>
    %8 = tpu.matmul %6, %7, %cst_5 {dimension_numbers = #tpu.dot_dimension_numbers<[1], [1], [0], [0], [0, 0, 1, 0], [], []>} : vector<192x32xf32>, vector<128x32xf32>, vector<192x128xf32> -> vector<192x128xf32>
    %c0_6 = arith.constant 0 : index
    %c0_7 = arith.constant 0 : index
    %9 = vector.load %arg4[%c0_6, %c0_7] : memref<192x128xf32, #tpu.memory_space<vmem>>, vector<192x128xf32>
    %10 = arith.mulf %8, %9 : vector<192x128xf32>
    %cst_8 = arith.constant dense<0.000000e+00> : vector<128x192xf32>
    %11 = tpu.matmul %7, %6, %cst_8 {dimension_numbers = #tpu.dot_dimension_numbers<[1], [1], [0], [0], [0, 0, 1, 0], [], []>} : vector<128x32xf32>, vector<192x32xf32>, vector<128x192xf32> -> vector<128x192xf32>
    %c0_9 = arith.constant 0 : index
    %c0_10 = arith.constant 0 : index
    %12 = vector.load %arg5[%c0_9, %c0_10] : memref<128x192xf32, #tpu.memory_space<vmem>>, vector<128x192xf32>
    %13 = arith.mulf %11, %12 : vector<128x192xf32>
    %14 = vector.extract_strided_slice %10 {offsets = [0, 0], sizes = [32, 128], strides = [1, 1]} : vector<192x128xf32> to vector<32x128xf32>
    %cst_11 = arith.constant dense<0xFF800000> : vector<128xf32>
    %15 = vector.multi_reduction <maximumf>, %14, %cst_11 [0] : vector<32x128xf32> to vector<128xf32>
    %16 = vector.shape_cast %15 : vector<128xf32> to vector<1x128xf32>
    %17 = vector.extract_strided_slice %10 {offsets = [32, 0], sizes = [32, 128], strides = [1, 1]} : vector<192x128xf32> to vector<32x128xf32>
    %cst_12 = arith.constant dense<0xFF800000> : vector<128xf32>
    %18 = vector.multi_reduction <maximumf>, %17, %cst_12 [0] : vector<32x128xf32> to vector<128xf32>
    %19 = vector.shape_cast %18 : vector<128xf32> to vector<1x128xf32>
    %20 = vector.extract_strided_slice %10 {offsets = [64, 0], sizes = [32, 128], strides = [1, 1]} : vector<192x128xf32> to vector<32x128xf32>
    %cst_13 = arith.constant dense<0xFF800000> : vector<128xf32>
    %21 = vector.multi_reduction <maximumf>, %20, %cst_13 [0] : vector<32x128xf32> to vector<128xf32>
    %22 = vector.shape_cast %21 : vector<128xf32> to vector<1x128xf32>
    %23 = vector.extract_strided_slice %10 {offsets = [96, 0], sizes = [32, 128], strides = [1, 1]} : vector<192x128xf32> to vector<32x128xf32>
    %cst_14 = arith.constant dense<0xFF800000> : vector<128xf32>
    %24 = vector.multi_reduction <maximumf>, %23, %cst_14 [0] : vector<32x128xf32> to vector<128xf32>
    %25 = vector.shape_cast %24 : vector<128xf32> to vector<1x128xf32>
    %26 = vector.extract_strided_slice %10 {offsets = [128, 0], sizes = [32, 128], strides = [1, 1]} : vector<192x128xf32> to vector<32x128xf32>
    %cst_15 = arith.constant dense<0xFF800000> : vector<128xf32>
    %27 = vector.multi_reduction <maximumf>, %26, %cst_15 [0] : vector<32x128xf32> to vector<128xf32>
    %28 = vector.shape_cast %27 : vector<128xf32> to vector<1x128xf32>
    %29 = vector.extract_strided_slice %10 {offsets = [160, 0], sizes = [32, 128], strides = [1, 1]} : vector<192x128xf32> to vector<32x128xf32>
    %cst_16 = arith.constant dense<0xFF800000> : vector<128xf32>
    %30 = vector.multi_reduction <maximumf>, %29, %cst_16 [0] : vector<32x128xf32> to vector<128xf32>
    %31 = vector.shape_cast %30 : vector<128xf32> to vector<1x128xf32>
    %32 = tpu.concatenate %16, %19, %22, %25, %28, %31 in 0 : vector<1x128xf32>, vector<1x128xf32>, vector<1x128xf32>, vector<1x128xf32>, vector<1x128xf32>, vector<1x128xf32> -> vector<6x128xf32>
    %33 = vector.extract_strided_slice %13 {offsets = [0, 0], sizes = [32, 192], strides = [1, 1]} : vector<128x192xf32> to vector<32x192xf32>
    %cst_17 = arith.constant dense<0xFF800000> : vector<192xf32>
    %34 = vector.multi_reduction <maximumf>, %33, %cst_17 [0] : vector<32x192xf32> to vector<192xf32>
    %35 = vector.shape_cast %34 : vector<192xf32> to vector<1x192xf32>
    %36 = vector.extract_strided_slice %13 {offsets = [32, 0], sizes = [32, 192], strides = [1, 1]} : vector<128x192xf32> to vector<32x192xf32>
    %cst_18 = arith.constant dense<0xFF800000> : vector<192xf32>
    %37 = vector.multi_reduction <maximumf>, %36, %cst_18 [0] : vector<32x192xf32> to vector<192xf32>
    %38 = vector.shape_cast %37 : vector<192xf32> to vector<1x192xf32>
    %39 = vector.extract_strided_slice %13 {offsets = [64, 0], sizes = [32, 192], strides = [1, 1]} : vector<128x192xf32> to vector<32x192xf32>
    %cst_19 = arith.constant dense<0xFF800000> : vector<192xf32>
    %40 = vector.multi_reduction <maximumf>, %39, %cst_19 [0] : vector<32x192xf32> to vector<192xf32>
    %41 = vector.shape_cast %40 : vector<192xf32> to vector<1x192xf32>
    %42 = vector.extract_strided_slice %13 {offsets = [96, 0], sizes = [32, 192], strides = [1, 1]} : vector<128x192xf32> to vector<32x192xf32>
    %cst_20 = arith.constant dense<0xFF800000> : vector<192xf32>
    %43 = vector.multi_reduction <maximumf>, %42, %cst_20 [0] : vector<32x192xf32> to vector<192xf32>
    %44 = vector.shape_cast %43 : vector<192xf32> to vector<1x192xf32>
    %45 = tpu.concatenate %35, %38, %41, %44 in 0 : vector<1x192xf32>, vector<1x192xf32>, vector<1x192xf32>, vector<1x192xf32> -> vector<4x192xf32>
    %c0_21 = arith.constant 0 : index
    %c0_22 = arith.constant 0 : index
    %46 = vector.load %arg6[%c0_21, %c0_22] : memref<128x256xf32, #tpu.memory_space<vmem>>, vector<128x256xf32>
    %cst_23 = arith.constant dense<0.000000e+00> : vector<6x256xf32>
    %47 = tpu.matmul %32, %46, %cst_23 {dimension_numbers = #tpu.dot_dimension_numbers<[1], [0], [0], [1], [0, 0, 1, 1], [], []>} : vector<6x128xf32>, vector<128x256xf32>, vector<6x256xf32> -> vector<6x256xf32>
    %c0_24 = arith.constant 0 : index
    %c0_25 = arith.constant 0 : index
    %48 = vector.load %arg7[%c0_24, %c0_25] : memref<1x256xf32, #tpu.memory_space<vmem>>, vector<1x256xf32>
    %49 = vector.broadcast %48 : vector<1x256xf32> to vector<6x256xf32>
    %50 = arith.addf %47, %49 : vector<6x256xf32>
    %cst_26 = arith.constant 0.000000e+00 : f32
    %51 = vector.broadcast %cst_26 : f32 to vector<6x256xf32>
    %52 = arith.maximumf %50, %51 : vector<6x256xf32>
    %c0_27 = arith.constant 0 : index
    %c0_28 = arith.constant 0 : index
    %53 = vector.load %arg8[%c0_27, %c0_28] : memref<192x384xf32, #tpu.memory_space<vmem>>, vector<192x384xf32>
    %cst_29 = arith.constant dense<0.000000e+00> : vector<4x384xf32>
    %54 = tpu.matmul %45, %53, %cst_29 {dimension_numbers = #tpu.dot_dimension_numbers<[1], [0], [0], [1], [0, 0, 1, 1], [], []>} : vector<4x192xf32>, vector<192x384xf32>, vector<4x384xf32> -> vector<4x384xf32>
    %c0_30 = arith.constant 0 : index
    %c0_31 = arith.constant 0 : index
    %55 = vector.load %arg9[%c0_30, %c0_31] : memref<1x384xf32, #tpu.memory_space<vmem>>, vector<1x384xf32>
    %56 = vector.broadcast %55 : vector<1x384xf32> to vector<4x384xf32>
    %57 = arith.addf %54, %56 : vector<4x384xf32>
    %cst_32 = arith.constant 0.000000e+00 : f32
    %58 = vector.broadcast %cst_32 : f32 to vector<4x384xf32>
    %59 = arith.maximumf %57, %58 : vector<4x384xf32>
    %c0_33 = arith.constant 0 : index
    %c0_34 = arith.constant 0 : index
    %60 = vector.load %arg10[%c0_33, %c0_34] : memref<4x256xf32, #tpu.memory_space<vmem>>, vector<4x256xf32>
    %cst_35 = arith.constant dense<0.000000e+00> : vector<6x4xf32>
    %61 = tpu.matmul %52, %60, %cst_35 {dimension_numbers = #tpu.dot_dimension_numbers<[1], [1], [0], [0], [0, 0, 1, 0], [], []>} : vector<6x256xf32>, vector<4x256xf32>, vector<6x4xf32> -> vector<6x4xf32>
    %c0_36 = arith.constant 0 : index
    %c0_37 = arith.constant 0 : index
    %62 = vector.load %arg11[%c0_36, %c0_37] : memref<6x384xf32, #tpu.memory_space<vmem>>, vector<6x384xf32>
    %cst_38 = arith.constant dense<0.000000e+00> : vector<6x4xf32>
    %63 = tpu.matmul %62, %59, %cst_38 {dimension_numbers = #tpu.dot_dimension_numbers<[1], [1], [0], [0], [0, 0, 1, 0], [], []>} : vector<6x384xf32>, vector<4x384xf32>, vector<6x4xf32> -> vector<6x4xf32>
    %64 = arith.addf %61, %63 : vector<6x4xf32>
    %c0_39 = arith.constant 0 : index
    %c0_40 = arith.constant 0 : index
    %65 = vector.load %arg12[%c0_39, %c0_40] : memref<1x1xf32, #tpu.memory_space<vmem>>, vector<1x1xf32>
    %66 = vector.broadcast %65 : vector<1x1xf32> to vector<6x4xf32>
    %67 = arith.addf %64, %66 : vector<6x4xf32>
    %c0_41 = arith.constant 0 : index
    %c0_42 = arith.constant 0 : index
    %68 = vector.load %arg13[%c0_41, %c0_42] : memref<6x4xf32, #tpu.memory_space<vmem>>, vector<6x4xf32>
    tpu.vector_store %arg13[%c0_41, %c0_42], %67 {strides = array<i32>} : memref<6x4xf32, #tpu.memory_space<vmem>>, vector<6x4xf32>,
    return
  }
  func.func @transform_0(%arg0: i32) -> (i32, i32) {
    %c0_i32 = arith.constant 0 : i32
    %c0_i32_0 = arith.constant 0 : i32
    %c0_i32_1 = arith.constant 0 : i32
    return %c0_i32, %c0_i32_0 : i32, i32
  }
  func.func @transform_1(%arg0: i32) -> (i32, i32) {
    %c0_i32 = arith.constant 0 : i32
    %c0_i32_0 = arith.constant 0 : i32
    %c0_i32_1 = arith.constant 0 : i32
    return %c0_i32, %c0_i32_0 : i32, i32
  }
  func.func @transform_2(%arg0: i32) -> (i32, i32) {
    %c0_i32 = arith.constant 0 : i32
    %c0_i32_0 = arith.constant 0 : i32
    %c0_i32_1 = arith.constant 0 : i32
    return %c0_i32, %c0_i32_0 : i32, i32
  }
  func.func @transform_3(%arg0: i32) -> (i32, i32) {
    %c0_i32 = arith.constant 0 : i32
    %c0_i32_0 = arith.constant 0 : i32
    %c0_i32_1 = arith.constant 0 : i32
    return %c0_i32, %c0_i32_0 : i32, i32
  }
  func.func @transform_4(%arg0: i32) -> (i32, i32) {
    %c0_i32 = arith.constant 0 : i32
    %c0_i32_0 = arith.constant 0 : i32
    %c0_i32_1 = arith.constant 0 : i32
    return %c0_i32, %c0_i32_0 : i32, i32
  }
  func.func @transform_5(%arg0: i32) -> (i32, i32) {
    %c0_i32 = arith.constant 0 : i32
    %c0_i32_0 = arith.constant 0 : i32
    %c0_i32_1 = arith.constant 0 : i32
    return %c0_i32, %c0_i32_0 : i32, i32
  }
  func.func @transform_6(%arg0: i32) -> (i32, i32) {
    %c0_i32 = arith.constant 0 : i32
    %c0_i32_0 = arith.constant 0 : i32
    %c0_i32_1 = arith.constant 0 : i32
    return %c0_i32, %c0_i32_0 : i32, i32
  }
  func.func @transform_7(%arg0: i32) -> (i32, i32) {
    %c0_i32 = arith.constant 0 : i32
    %c0_i32_0 = arith.constant 0 : i32
    %c0_i32_1 = arith.constant 0 : i32
    return %c0_i32, %c0_i32_0 : i32, i32
  }
  func.func @transform_8(%arg0: i32) -> (i32, i32) {
    %c0_i32 = arith.constant 0 : i32
    %c0_i32_0 = arith.constant 0 : i32
    %c0_i32_1 = arith.constant 0 : i32
    return %c0_i32, %c0_i32_0 : i32, i32
  }
  func.func @transform_9(%arg0: i32) -> (i32, i32) {
    %c0_i32 = arith.constant 0 : i32
    %c0_i32_0 = arith.constant 0 : i32
    %c0_i32_1 = arith.constant 0 : i32
    return %c0_i32, %c0_i32_0 : i32, i32
  }
  func.func @transform_10(%arg0: i32) -> (i32, i32) {
    %c0_i32 = arith.constant 0 : i32
    %c0_i32_0 = arith.constant 0 : i32
    %c0_i32_1 = arith.constant 0 : i32
    return %c0_i32, %c0_i32_0 : i32, i32
  }
  func.func @transform_11(%arg0: i32) -> (i32, i32) {
    %c0_i32 = arith.constant 0 : i32
    %c0_i32_0 = arith.constant 0 : i32
    %c0_i32_1 = arith.constant 0 : i32
    return %c0_i32, %c0_i32_0 : i32, i32
  }
  func.func @transform_12(%arg0: i32) -> (i32, i32) {
    %c0_i32 = arith.constant 0 : i32
    %c0_i32_0 = arith.constant 0 : i32
    %c0_i32_1 = arith.constant 0 : i32
    return %c0_i32, %c0_i32_0 : i32, i32
  }
}

</mosaic_0001>

<bundles_post_ra>
// kernel: tile.26
= control target key start
LH: loop header
LB: loop body
LE: loop exit
PB: predicated region body
PF: predicated region fallthrough
CT: control target
= control target key end

     0   :  { %s1396_s0 = inlined_call_operand.vmem [shape: f32[32,32], index: 0, kind: input, shape index: {}]   ;;  %s1397_s1 = inlined_call_operand.vmem [shape: f32[4,32,6,32], index: 1, kind: output, shape index: {}]  }
   0x1   :  { %v4_v0 = vld [vmem:[%s1396_s0] ss:$0 sm:$0xff]  ;;  %v497_v1 = vld [vmem:[%s1396_s0 + $0x1] ss:$0 sm:$0xff]  ;;  %v504_v2 = vld [vmem:[%s1396_s0 + $0x2] ss:$0 sm:$0xff] }
   0x2   :  { %5 = vst [vmem:[%s1397_s1] sm:$0xf] %v4_v0  ;;  %492 = vst [vmem:[%s1397_s1 + $0x80] sm:$0xf] %v4_v0  ;;  %v511_v3 = vld [vmem:[%s1396_s0 + $0x3] ss:$0 sm:$0xff] }
   0x3   :  { %493 = vst [vmem:[%s1397_s1 + $0x100] sm:$0xf] %v4_v0  ;;  %494 = vst [vmem:[%s1397_s1 + $0x180] sm:$0xf] %v4_v0  ;;  %v518_v4 = vld [vmem:[%s1396_s0 + $0x4] ss:$0 sm:$0xff] }
   0x4   :  { %495 = vst [vmem:[%s1397_s1 + $0x200] sm:$0xf] %v4_v0  ;;  %496 = vst [vmem:[%s1397_s1 + $0x280] sm:$0xf] %v4_v0  ;;  %v525_v5 = vld [vmem:[%s1396_s0 + $0x5] ss:$0 sm:$0xff] }
   0x5   :  { %498 = vst [vmem:[%s1397_s1 + $0x4] sm:$0xf] %v497_v1  ;;  %499 = vst [vmem:[%s1397_s1 + $0x84] sm:$0xf] %v497_v1  ;;  %v532_v6 = vld [vmem:[%s1396_s0 + $0x6] ss:$0 sm:$0xff] }
   0x6   :  { %500 = vst [vmem:[%s1397_s1 + $0x104] sm:$0xf] %v497_v1  ;;  %501 = vst [vmem:[%s1397_s1 + $0x184] sm:$0xf] %v497_v1  ;;  %v539_v7 = vld [vmem:[%s1396_s0 + $0x7] ss:$0 sm:$0xff] }
   0x7   :  { %502 = vst [vmem:[%s1397_s1 + $0x204] sm:$0xf] %v497_v1  ;;  %503 = vst [vmem:[%s1397_s1 + $0x284] sm:$0xf] %v497_v1  ;;  %v546_v8 = vld [vmem:[%s1396_s0 + $0x8] ss:$0 sm:$0xff] }
   0x8   :  { %505 = vst [vmem:[%s1397_s1 + $0x8] sm:$0xf] %v504_v2  ;;  %506 = vst [vmem:[%s1397_s1 + $0x88] sm:$0xf] %v504_v2  ;;  %v553_v9 = vld [vmem:[%s1396_s0 + $0x9] ss:$0 sm:$0xff] }
   0x9   :  { %507 = vst [vmem:[%s1397_s1 + $0x108] sm:$0xf] %v504_v2  ;;  %508 = vst [vmem:[%s1397_s1 + $0x188] sm:$0xf] %v504_v2  ;;  %v560_v10 = vld [vmem:[%s1396_s0 + $0xa] ss:$0 sm:$0xff] }
   0xa   :  { %509 = vst [vmem:[%s1397_s1 + $0x208] sm:$0xf] %v504_v2  ;;  %510 = vst [vmem:[%s1397_s1 + $0x288] sm:$0xf] %v504_v2  ;;  %v567_v11 = vld [vmem:[%s1396_s0 + $0xb] ss:$0 sm:$0xff] }
   0xb   :  { %512 = vst [vmem:[%s1397_s1 + $0xc] sm:$0xf] %v511_v3  ;;  %513 = vst [vmem:[%s1397_s1 + $0x8c] sm:$0xf] %v511_v3  ;;  %v574_v12 = vld [vmem:[%s1396_s0 + $0xc] ss:$0 sm:$0xff] }
   0xc   :  { %514 = vst [vmem:[%s1397_s1 + $0x10c] sm:$0xf] %v511_v3  ;;  %515 = vst [vmem:[%s1397_s1 + $0x18c] sm:$0xf] %v511_v3  ;;  %v581_v13 = vld [vmem:[%s1396_s0 + $0xd] ss:$0 sm:$0xff] }
   0xd   :  { %516 = vst [vmem:[%s1397_s1 + $0x20c] sm:$0xf] %v511_v3  ;;  %517 = vst [vmem:[%s1397_s1 + $0x28c] sm:$0xf] %v511_v3  ;;  %v588_v14 = vld [vmem:[%s1396_s0 + $0xe] ss:$0 sm:$0xff] }
   0xe   :  { %519 = vst [vmem:[%s1397_s1 + $0x10] sm:$0xf] %v518_v4  ;;  %520 = vst [vmem:[%s1397_s1 + $0x90] sm:$0xf] %v518_v4  ;;  %v595_v15 = vld [vmem:[%s1396_s0 + $0xf] ss:$0 sm:$0xff] }
   0xf   :  { %521 = vst [vmem:[%s1397_s1 + $0x110] sm:$0xf] %v518_v4  ;;  %522 = vst [vmem:[%s1397_s1 + $0x190] sm:$0xf] %v518_v4  ;;  %v602_v16 = vld [vmem:[%s1396_s0 + $0x10] ss:$0 sm:$0xff] }
  0x10   :  { %523 = vst [vmem:[%s1397_s1 + $0x210] sm:$0xf] %v518_v4  ;;  %524 = vst [vmem:[%s1397_s1 + $0x290] sm:$0xf] %v518_v4  ;;  %v609_v17 = vld [vmem:[%s1396_s0 + $0x11] ss:$0 sm:$0xff] }
  0x11   :  { %526 = vst [vmem:[%s1397_s1 + $0x14] sm:$0xf] %v525_v5  ;;  %527 = vst [vmem:[%s1397_s1 + $0x94] sm:$0xf] %v525_v5  ;;  %v616_v18 = vld [vmem:[%s1396_s0 + $0x12] ss:$0 sm:$0xff] }
  0x12   :  { %528 = vst [vmem:[%s1397_s1 + $0x114] sm:$0xf] %v525_v5  ;;  %529 = vst [vmem:[%s1397_s1 + $0x194] sm:$0xf] %v525_v5  ;;  %v623_v19 = vld [vmem:[%s1396_s0 + $0x13] ss:$0 sm:$0xff] }
  0x13   :  { %530 = vst [vmem:[%s1397_s1 + $0x214] sm:$0xf] %v525_v5  ;;  %531 = vst [vmem:[%s1397_s1 + $0x294] sm:$0xf] %v525_v5  ;;  %v630_v20 = vld [vmem:[%s1396_s0 + $0x14] ss:$0 sm:$0xff] }
  0x14   :  { %533 = vst [vmem:[%s1397_s1 + $0x18] sm:$0xf] %v532_v6  ;;  %534 = vst [vmem:[%s1397_s1 + $0x98] sm:$0xf] %v532_v6  ;;  %v637_v21 = vld [vmem:[%s1396_s0 + $0x15] ss:$0 sm:$0xff] }
  0x15   :  { %535 = vst [vmem:[%s1397_s1 + $0x118] sm:$0xf] %v532_v6  ;;  %536 = vst [vmem:[%s1397_s1 + $0x198] sm:$0xf] %v532_v6  ;;  %v644_v22 = vld [vmem:[%s1396_s0 + $0x16] ss:$0 sm:$0xff] }
  0x16   :  { %537 = vst [vmem:[%s1397_s1 + $0x218] sm:$0xf] %v532_v6  ;;  %538 = vst [vmem:[%s1397_s1 + $0x298] sm:$0xf] %v532_v6  ;;  %v651_v23 = vld [vmem:[%s1396_s0 + $0x17] ss:$0 sm:$0xff] }
  0x17   :  { %540 = vst [vmem:[%s1397_s1 + $0x1c] sm:$0xf] %v539_v7  ;;  %541 = vst [vmem:[%s1397_s1 + $0x9c] sm:$0xf] %v539_v7  ;;  %v658_v24 = vld [vmem:[%s1396_s0 + $0x18] ss:$0 sm:$0xff] }
  0x18   :  { %542 = vst [vmem:[%s1397_s1 + $0x11c] sm:$0xf] %v539_v7  ;;  %543 = vst [vmem:[%s1397_s1 + $0x19c] sm:$0xf] %v539_v7  ;;  %v665_v25 = vld [vmem:[%s1396_s0 + $0x19] ss:$0 sm:$0xff] }
  0x19   :  { %544 = vst [vmem:[%s1397_s1 + $0x21c] sm:$0xf] %v539_v7  ;;  %545 = vst [vmem:[%s1397_s1 + $0x29c] sm:$0xf] %v539_v7  ;;  %v672_v26 = vld [vmem:[%s1396_s0 + $0x1a] ss:$0 sm:$0xff] }
  0x1a   :  { %547 = vst [vmem:[%s1397_s1 + $0x20] sm:$0xf] %v546_v8  ;;  %548 = vst [vmem:[%s1397_s1 + $0xa0] sm:$0xf] %v546_v8  ;;  %v679_v27 = vld [vmem:[%s1396_s0 + $0x1b] ss:$0 sm:$0xff] }
  0x1b   :  { %549 = vst [vmem:[%s1397_s1 + $0x120] sm:$0xf] %v546_v8  ;;  %550 = vst [vmem:[%s1397_s1 + $0x1a0] sm:$0xf] %v546_v8  ;;  %v686_v28 = vld [vmem:[%s1396_s0 + $0x1c] ss:$0 sm:$0xff] }
  0x1c   :  { %551 = vst [vmem:[%s1397_s1 + $0x220] sm:$0xf] %v546_v8  ;;  %552 = vst [vmem:[%s1397_s1 + $0x2a0] sm:$0xf] %v546_v8  ;;  %v693_v29 = vld [vmem:[%s1396_s0 + $0x1d] ss:$0 sm:$0xff] }
  0x1d   :  { %554 = vst [vmem:[%s1397_s1 + $0x24] sm:$0xf] %v553_v9  ;;  %555 = vst [vmem:[%s1397_s1 + $0xa4] sm:$0xf] %v553_v9  ;;  %v700_v30 = vld [vmem:[%s1396_s0 + $0x1e] ss:$0 sm:$0xff] }
  0x1e   :  { %556 = vst [vmem:[%s1397_s1 + $0x124] sm:$0xf] %v553_v9  ;;  %557 = vst [vmem:[%s1397_s1 + $0x1a4] sm:$0xf] %v553_v9  ;;  %v707_v31 = vld [vmem:[%s1396_s0 + $0x1f] ss:$0 sm:$0xff] }
  0x1f   :  { %558 = vst [vmem:[%s1397_s1 + $0x224] sm:$0xf] %v553_v9  ;;  %559 = vst [vmem:[%s1397_s1 + $0x2a4] sm:$0xf] %v553_v9 }
  0x20   :  { %561 = vst [vmem:[%s1397_s1 + $0x28] sm:$0xf] %v560_v10  ;;  %562 = vst [vmem:[%s1397_s1 + $0xa8] sm:$0xf] %v560_v10 }
  0x21   :  { %563 = vst [vmem:[%s1397_s1 + $0x128] sm:$0xf] %v560_v10  ;;  %564 = vst [vmem:[%s1397_s1 + $0x1a8] sm:$0xf] %v560_v10 }
  0x22   :  { %565 = vst [vmem:[%s1397_s1 + $0x228] sm:$0xf] %v560_v10  ;;  %566 = vst [vmem:[%s1397_s1 + $0x2a8] sm:$0xf] %v560_v10 }
  0x23   :  { %568 = vst [vmem:[%s1397_s1 + $0x2c] sm:$0xf] %v567_v11  ;;  %569 = vst [vmem:[%s1397_s1 + $0xac] sm:$0xf] %v567_v11 }
  0x24   :  { %570 = vst [vmem:[%s1397_s1 + $0x12c] sm:$0xf] %v567_v11  ;;  %571 = vst [vmem:[%s1397_s1 + $0x1ac] sm:$0xf] %v567_v11 }
  0x25   :  { %572 = vst [vmem:[%s1397_s1 + $0x22c] sm:$0xf] %v567_v11  ;;  %573 = vst [vmem:[%s1397_s1 + $0x2ac] sm:$0xf] %v567_v11 }
  0x26   :  { %575 = vst [vmem:[%s1397_s1 + $0x30] sm:$0xf] %v574_v12  ;;  %576 = vst [vmem:[%s1397_s1 + $0xb0] sm:$0xf] %v574_v12 }
  0x27   :  { %577 = vst [vmem:[%s1397_s1 + $0x130] sm:$0xf] %v574_v12  ;;  %578 = vst [vmem:[%s1397_s1 + $0x1b0] sm:$0xf] %v574_v12 }
  0x28   :  { %579 = vst [vmem:[%s1397_s1 + $0x230] sm:$0xf] %v574_v12  ;;  %580 = vst [vmem:[%s1397_s1 + $0x2b0] sm:$0xf] %v574_v12 }
  0x29   :  { %582 = vst [vmem:[%s1397_s1 + $0x34] sm:$0xf] %v581_v13  ;;  %583 = vst [vmem:[%s1397_s1 + $0xb4] sm:$0xf] %v581_v13 }
  0x2a   :  { %584 = vst [vmem:[%s1397_s1 + $0x134] sm:$0xf] %v581_v13  ;;  %585 = vst [vmem:[%s1397_s1 + $0x1b4] sm:$0xf] %v581_v13 }
  0x2b   :  { %586 = vst [vmem:[%s1397_s1 + $0x234] sm:$0xf] %v581_v13  ;;  %587 = vst [vmem:[%s1397_s1 + $0x2b4] sm:$0xf] %v581_v13 }
  0x2c   :  { %589 = vst [vmem:[%s1397_s1 + $0x38] sm:$0xf] %v588_v14  ;;  %590 = vst [vmem:[%s1397_s1 + $0xb8] sm:$0xf] %v588_v14 }
  0x2d   :  { %591 = vst [vmem:[%s1397_s1 + $0x138] sm:$0xf] %v588_v14  ;;  %592 = vst [vmem:[%s1397_s1 + $0x1b8] sm:$0xf] %v588_v14 }
  0x2e   :  { %593 = vst [vmem:[%s1397_s1 + $0x238] sm:$0xf] %v588_v14  ;;  %594 = vst [vmem:[%s1397_s1 + $0x2b8] sm:$0xf] %v588_v14 }
  0x2f   :  { %596 = vst [vmem:[%s1397_s1 + $0x3c] sm:$0xf] %v595_v15  ;;  %597 = vst [vmem:[%s1397_s1 + $0xbc] sm:$0xf] %v595_v15 }
  0x30   :  { %598 = vst [vmem:[%s1397_s1 + $0x13c] sm:$0xf] %v595_v15  ;;  %599 = vst [vmem:[%s1397_s1 + $0x1bc] sm:$0xf] %v595_v15 }
  0x31   :  { %600 = vst [vmem:[%s1397_s1 + $0x23c] sm:$0xf] %v595_v15  ;;  %601 = vst [vmem:[%s1397_s1 + $0x2bc] sm:$0xf] %v595_v15 }
  0x32   :  { %603 = vst [vmem:[%s1397_s1 + $0x40] sm:$0xf] %v602_v16  ;;  %604 = vst [vmem:[%s1397_s1 + $0xc0] sm:$0xf] %v602_v16 }
  0x33   :  { %605 = vst [vmem:[%s1397_s1 + $0x140] sm:$0xf] %v602_v16  ;;  %606 = vst [vmem:[%s1397_s1 + $0x1c0] sm:$0xf] %v602_v16 }
  0x34   :  { %607 = vst [vmem:[%s1397_s1 + $0x240] sm:$0xf] %v602_v16  ;;  %608 = vst [vmem:[%s1397_s1 + $0x2c0] sm:$0xf] %v602_v16 }
  0x35   :  { %610 = vst [vmem:[%s1397_s1 + $0x44] sm:$0xf] %v609_v17  ;;  %611 = vst [vmem:[%s1397_s1 + $0xc4] sm:$0xf] %v609_v17 }
  0x36   :  { %612 = vst [vmem:[%s1397_s1 + $0x144] sm:$0xf] %v609_v17  ;;  %613 = vst [vmem:[%s1397_s1 + $0x1c4] sm:$0xf] %v609_v17 }
  0x37   :  { %614 = vst [vmem:[%s1397_s1 + $0x244] sm:$0xf] %v609_v17  ;;  %615 = vst [vmem:[%s1397_s1 + $0x2c4] sm:$0xf] %v609_v17 }
  0x38   :  { %617 = vst [vmem:[%s1397_s1 + $0x48] sm:$0xf] %v616_v18  ;;  %618 = vst [vmem:[%s1397_s1 + $0xc8] sm:$0xf] %v616_v18 }
  0x39   :  { %619 = vst [vmem:[%s1397_s1 + $0x148] sm:$0xf] %v616_v18  ;;  %620 = vst [vmem:[%s1397_s1 + $0x1c8] sm:$0xf] %v616_v18 }
  0x3a   :  { %621 = vst [vmem:[%s1397_s1 + $0x248] sm:$0xf] %v616_v18  ;;  %622 = vst [vmem:[%s1397_s1 + $0x2c8] sm:$0xf] %v616_v18 }
  0x3b   :  { %624 = vst [vmem:[%s1397_s1 + $0x4c] sm:$0xf] %v623_v19  ;;  %625 = vst [vmem:[%s1397_s1 + $0xcc] sm:$0xf] %v623_v19 }
  0x3c   :  { %626 = vst [vmem:[%s1397_s1 + $0x14c] sm:$0xf] %v623_v19  ;;  %627 = vst [vmem:[%s1397_s1 + $0x1cc] sm:$0xf] %v623_v19 }
  0x3d   :  { %628 = vst [vmem:[%s1397_s1 + $0x24c] sm:$0xf] %v623_v19  ;;  %629 = vst [vmem:[%s1397_s1 + $0x2cc] sm:$0xf] %v623_v19 }
  0x3e   :  { %631 = vst [vmem:[%s1397_s1 + $0x50] sm:$0xf] %v630_v20  ;;  %632 = vst [vmem:[%s1397_s1 + $0xd0] sm:$0xf] %v630_v20 }
  0x3f   :  { %633 = vst [vmem:[%s1397_s1 + $0x150] sm:$0xf] %v630_v20  ;;  %634 = vst [vmem:[%s1397_s1 + $0x1d0] sm:$0xf] %v630_v20 }
  0x40   :  { %635 = vst [vmem:[%s1397_s1 + $0x250] sm:$0xf] %v630_v20  ;;  %636 = vst [vmem:[%s1397_s1 + $0x2d0] sm:$0xf] %v630_v20 }
  0x41   :  { %638 = vst [vmem:[%s1397_s1 + $0x54] sm:$0xf] %v637_v21  ;;  %639 = vst [vmem:[%s1397_s1 + $0xd4] sm:$0xf] %v637_v21 }
  0x42   :  { %640 = vst [vmem:[%s1397_s1 + $0x154] sm:$0xf] %v637_v21  ;;  %641 = vst [vmem:[%s1397_s1 + $0x1d4] sm:$0xf] %v637_v21 }
  0x43   :  { %642 = vst [vmem:[%s1397_s1 + $0x254] sm:$0xf] %v637_v21  ;;  %643 = vst [vmem:[%s1397_s1 + $0x2d4] sm:$0xf] %v637_v21 }
  0x44   :  { %645 = vst [vmem:[%s1397_s1 + $0x58] sm:$0xf] %v644_v22  ;;  %646 = vst [vmem:[%s1397_s1 + $0xd8] sm:$0xf] %v644_v22 }
  0x45   :  { %647 = vst [vmem:[%s1397_s1 + $0x158] sm:$0xf] %v644_v22  ;;  %648 = vst [vmem:[%s1397_s1 + $0x1d8] sm:$0xf] %v644_v22 }
  0x46   :  { %649 = vst [vmem:[%s1397_s1 + $0x258] sm:$0xf] %v644_v22  ;;  %650 = vst [vmem:[%s1397_s1 + $0x2d8] sm:$0xf] %v644_v22 }
  0x47   :  { %652 = vst [vmem:[%s1397_s1 + $0x5c] sm:$0xf] %v651_v23  ;;  %653 = vst [vmem:[%s1397_s1 + $0xdc] sm:$0xf] %v651_v23 }
  0x48   :  { %654 = vst [vmem:[%s1397_s1 + $0x15c] sm:$0xf] %v651_v23  ;;  %655 = vst [vmem:[%s1397_s1 + $0x1dc] sm:$0xf] %v651_v23 }
  0x49   :  { %656 = vst [vmem:[%s1397_s1 + $0x25c] sm:$0xf] %v651_v23  ;;  %657 = vst [vmem:[%s1397_s1 + $0x2dc] sm:$0xf] %v651_v23 }
  0x4a   :  { %659 = vst [vmem:[%s1397_s1 + $0x60] sm:$0xf] %v658_v24  ;;  %660 = vst [vmem:[%s1397_s1 + $0xe0] sm:$0xf] %v658_v24 }
  0x4b   :  { %661 = vst [vmem:[%s1397_s1 + $0x160] sm:$0xf] %v658_v24  ;;  %662 = vst [vmem:[%s1397_s1 + $0x1e0] sm:$0xf] %v658_v24 }
  0x4c   :  { %663 = vst [vmem:[%s1397_s1 + $0x260] sm:$0xf] %v658_v24  ;;  %664 = vst [vmem:[%s1397_s1 + $0x2e0] sm:$0xf] %v658_v24 }
  0x4d   :  { %666 = vst [vmem:[%s1397_s1 + $0x64] sm:$0xf] %v665_v25  ;;  %667 = vst [vmem:[%s1397_s1 + $0xe4] sm:$0xf] %v665_v25 }
  0x4e   :  { %668 = vst [vmem:[%s1397_s1 + $0x164] sm:$0xf] %v665_v25  ;;  %669 = vst [vmem:[%s1397_s1 + $0x1e4] sm:$0xf] %v665_v25 }
  0x4f   :  { %670 = vst [vmem:[%s1397_s1 + $0x264] sm:$0xf] %v665_v25  ;;  %671 = vst [vmem:[%s1397_s1 + $0x2e4] sm:$0xf] %v665_v25 }
  0x50   :  { %673 = vst [vmem:[%s1397_s1 + $0x68] sm:$0xf] %v672_v26  ;;  %674 = vst [vmem:[%s1397_s1 + $0xe8] sm:$0xf] %v672_v26 }
  0x51   :  { %675 = vst [vmem:[%s1397_s1 + $0x168] sm:$0xf] %v672_v26  ;;  %676 = vst [vmem:[%s1397_s1 + $0x1e8] sm:$0xf] %v672_v26 }
  0x52   :  { %677 = vst [vmem:[%s1397_s1 + $0x268] sm:$0xf] %v672_v26  ;;  %678 = vst [vmem:[%s1397_s1 + $0x2e8] sm:$0xf] %v672_v26 }
  0x53   :  { %680 = vst [vmem:[%s1397_s1 + $0x6c] sm:$0xf] %v679_v27  ;;  %681 = vst [vmem:[%s1397_s1 + $0xec] sm:$0xf] %v679_v27 }
  0x54   :  { %682 = vst [vmem:[%s1397_s1 + $0x16c] sm:$0xf] %v679_v27  ;;  %683 = vst [vmem:[%s1397_s1 + $0x1ec] sm:$0xf] %v679_v27 }
  0x55   :  { %684 = vst [vmem:[%s1397_s1 + $0x26c] sm:$0xf] %v679_v27  ;;  %685 = vst [vmem:[%s1397_s1 + $0x2ec] sm:$0xf] %v679_v27 }
  0x56   :  { %687 = vst [vmem:[%s1397_s1 + $0x70] sm:$0xf] %v686_v28  ;;  %688 = vst [vmem:[%s1397_s1 + $0xf0] sm:$0xf] %v686_v28 }
  0x57   :  { %689 = vst [vmem:[%s1397_s1 + $0x170] sm:$0xf] %v686_v28  ;;  %690 = vst [vmem:[%s1397_s1 + $0x1f0] sm:$0xf] %v686_v28 }
  0x58   :  { %691 = vst [vmem:[%s1397_s1 + $0x270] sm:$0xf] %v686_v28  ;;  %692 = vst [vmem:[%s1397_s1 + $0x2f0] sm:$0xf] %v686_v28 }
  0x59   :  { %694 = vst [vmem:[%s1397_s1 + $0x74] sm:$0xf] %v693_v29  ;;  %695 = vst [vmem:[%s1397_s1 + $0xf4] sm:$0xf] %v693_v29 }
  0x5a   :  { %696 = vst [vmem:[%s1397_s1 + $0x174] sm:$0xf] %v693_v29  ;;  %697 = vst [vmem:[%s1397_s1 + $0x1f4] sm:$0xf] %v693_v29 }
  0x5b   :  { %698 = vst [vmem:[%s1397_s1 + $0x274] sm:$0xf] %v693_v29  ;;  %699 = vst [vmem:[%s1397_s1 + $0x2f4] sm:$0xf] %v693_v29 }
  0x5c   :  { %701 = vst [vmem:[%s1397_s1 + $0x78] sm:$0xf] %v700_v30  ;;  %702 = vst [vmem:[%s1397_s1 + $0xf8] sm:$0xf] %v700_v30 }
  0x5d   :  { %703 = vst [vmem:[%s1397_s1 + $0x178] sm:$0xf] %v700_v30  ;;  %704 = vst [vmem:[%s1397_s1 + $0x1f8] sm:$0xf] %v700_v30 }
  0x5e   :  { %705 = vst [vmem:[%s1397_s1 + $0x278] sm:$0xf] %v700_v30  ;;  %706 = vst [vmem:[%s1397_s1 + $0x2f8] sm:$0xf] %v700_v30 }
  0x5f   :  { %708 = vst [vmem:[%s1397_s1 + $0x7c] sm:$0xf] %v707_v31  ;;  %709 = vst [vmem:[%s1397_s1 + $0xfc] sm:$0xf] %v707_v31 }
  0x60   :  { %710 = vst [vmem:[%s1397_s1 + $0x17c] sm:$0xf] %v707_v31  ;;  %711 = vst [vmem:[%s1397_s1 + $0x1fc] sm:$0xf] %v707_v31 }
  0x61   :  { %712 = vst [vmem:[%s1397_s1 + $0x27c] sm:$0xf] %v707_v31  ;;  %713 = vst [vmem:[%s1397_s1 + $0x2fc] sm:$0xf] %v707_v31 }

// kernel: tile.27
= control target key start
LH: loop header
LB: loop body
LE: loop exit
PB: predicated region body
PF: predicated region fallthrough
CT: control target
= control target key end

     0   :  { %vm963_vm0 = vcmask 1047556   ;;  %s2439_s10 = smov 96   ;;  %vm965_vm1 = vcmask 261120   ;;  %vm1182_vm2 = vcmask 1048320   ;;  %vm1445_vm3 = vcmask 785920   ;;  %s3580_s0 = inlined_call_operand.vmem [shape: f32[4,32,6,32], index: 0, kind: input, shape index: {}]   ;;  %s3581_s1 = inlined_call_operand.vmem [shape: f32[128,192], index: 1, kind: output, shape index: {}]  }
   0x1   :  { %v2337_v0 = vld [vmem:[%s3580_s0 + $0x1c] sm:$0xf]  ;;  %v2338_v1 = vld [vmem:[%s3580_s0 + $0x18] sm:$0xf]  ;;  %v2339_v2 = vld [vmem:[%s3580_s0 + $0x14] sm:$0xf] }
   0x2   :  { %929 = vst [vmem:[#allocation0 + $0x38] sm:$0xf] %v2337_v0  ;;  %934 = vst [vmem:[#allocation0 + $0x30] sm:$0xf] %v2338_v1  ;;  %v2340_v3 = vld [vmem:[%s3580_s0 + $0x10] sm:$0xf] }
   0x3   :  { %939 = vst [vmem:[#allocation0 + $0x28] sm:$0xf] %v2339_v2  ;;  %v2341_v4 = vld [vmem:[%s3580_s0 + $0xc] sm:$0xf]  ;;  %v2342_v5 = vld [vmem:[%s3580_s0 + $0x8] sm:$0xf] }
   0x4   :  { %944 = vst [vmem:[#allocation0 + $0x20] sm:$0xf] %v2340_v3  ;;  %949 = vst [vmem:[#allocation0 + $0x18] sm:$0xf] %v2341_v4  ;;  %v2343_v6 = vld [vmem:[%s3580_s0 + $0x4] sm:$0xf] }
   0x5   :  { %954 = vst [vmem:[#allocation0 + $0x10] sm:$0xf] %v2342_v5  ;;  %v959_v7 = vld [vmem:[%s3580_s0] sm:$0xf]  ;;  %958 = vst [vmem:[#allocation0 + $0x8] sm:$0xf] %v2343_v6 }
   0x6   :  { %960 = vst [vmem:[#allocation0] sm:$0xf] %v959_v7  ;;  %v2273_v8 = vld [vmem:[%s3580_s0 + $0x11c] sm:$0xf]  ;;  %v2274_v9 = vld [vmem:[%s3580_s0 + $0x118] sm:$0xf] }
   0x7   :  { %v2275_v10 = vld [vmem:[%s3580_s0 + $0x114] sm:$0xf]  ;;  %609 = vst [vmem:[#allocation0 + $0x238] sm:$0xf] %v2273_v8  ;;  %614 = vst [vmem:[#allocation0 + $0x230] sm:$0xf] %v2274_v9 }
   0x8   :  { %619 = vst [vmem:[#allocation0 + $0x228] sm:$0xf] %v2275_v10  ;;  %v2276_v11 = vld [vmem:[%s3580_s0 + $0x110] sm:$0xf]  ;;  %v2277_v12 = vld [vmem:[%s3580_s0 + $0x10c] sm:$0xf] }
   0x9   :  { %v2278_v13 = vld [vmem:[%s3580_s0 + $0x108] sm:$0xf]  ;;  %624 = vst [vmem:[#allocation0 + $0x220] sm:$0xf] %v2276_v11  ;;  %629 = vst [vmem:[#allocation0 + $0x218] sm:$0xf] %v2277_v12 }
   0xa   :  { %634 = vst [vmem:[#allocation0 + $0x210] sm:$0xf] %v2278_v13  ;;  %v2279_v14 = vld [vmem:[%s3580_s0 + $0x104] sm:$0xf]  ;;  %v2280_v15 = vld [vmem:[%s3580_s0 + $0x100] sm:$0xf] }
   0xb   :  { %v2305_v16 = vld [vmem:[%s3580_s0 + $0x9c] sm:$0xf]  ;;  %639 = vst [vmem:[#allocation0 + $0x208] sm:$0xf] %v2279_v14  ;;  %644 = vst [vmem:[#allocation0 + $0x200] sm:$0xf] %v2280_v15 }
   0xc   :  { %769 = vst [vmem:[#allocation0 + $0x138] sm:$0xf] %v2305_v16  ;;  %v2306_v17 = vld [vmem:[%s3580_s0 + $0x98] sm:$0xf]  ;;  %v2307_v18 = vld [vmem:[%s3580_s0 + $0x94] sm:$0xf] }
   0xd   :  { %v2308_v19 = vld [vmem:[%s3580_s0 + $0x90] sm:$0xf]  ;;  %774 = vst [vmem:[#allocation0 + $0x130] sm:$0xf] %v2306_v17  ;;  %779 = vst [vmem:[#allocation0 + $0x128] sm:$0xf] %v2307_v18 }
   0xe   :  { %784 = vst [vmem:[#allocation0 + $0x120] sm:$0xf] %v2308_v19  ;;  %v2309_v20 = vld [vmem:[%s3580_s0 + $0x8c] sm:$0xf]  ;;  %v2310_v21 = vld [vmem:[%s3580_s0 + $0x88] sm:$0xf] }
   0xf   :  { %v2311_v22 = vld [vmem:[%s3580_s0 + $0x84] sm:$0xf]  ;;  %789 = vst [vmem:[#allocation0 + $0x118] sm:$0xf] %v2309_v20  ;;  %794 = vst [vmem:[#allocation0 + $0x110] sm:$0xf] %v2310_v21 }
  0x10   :  { %799 = vst [vmem:[#allocation0 + $0x108] sm:$0xf] %v2311_v22  ;;  %v2312_v23 = vld [vmem:[%s3580_s0 + $0x80] sm:$0xf]  ;;  %v2241_v24 = vld [vmem:[%s3580_s0 + $0x19c] sm:$0xf] }
  0x11   :  { %v2242_v25 = vld [vmem:[%s3580_s0 + $0x198] sm:$0xf]  ;;  %804 = vst [vmem:[#allocation0 + $0x100] sm:$0xf] %v2312_v23  ;;  %449 = vst [vmem:[#allocation0 + $0x338] sm:$0xf] %v2241_v24 }
  0x12   :  { %v1177_v26 = vld [vmem:[#allocation0 + $0x3] ss:$8 sm:$0xf0]   ;;  %454 = vst [vmem:[#allocation0 + $0x330] sm:$0xf] %v2242_v25  ;;  %vm1708_vm4 = vcmask 523520  }
  0x13   :  { %v2243_v27 = vld [vmem:[%s3580_s0 + $0x194] sm:$0xf]  ;;  %v1175_v28 = vld [vmem:[#allocation0 + $0x3] ss:$8 sm:$0xf]  }
  0x14   :  { %459 = vst [vmem:[#allocation0 + $0x328] sm:$0xf] %v2243_v27  ;;  %v2244_v29 = vld [vmem:[%s3580_s0 + $0x190] sm:$0xf]  ;;  %v1179_v30 = vsel %vm963_vm0, %v1177_v26, %v1175_v28  ;;  %v2245_v31 = vld [vmem:[%s3580_s0 + $0x18c] sm:$0xf] }
  0x15   :  { %464 = vst [vmem:[#allocation0 + $0x320] sm:$0xf] %v2244_v29  ;;  %v2246_v32 = vld [vmem:[%s3580_s0 + $0x188] sm:$0xf]  ;;  %v2247_v33 = vld [vmem:[%s3580_s0 + $0x184] sm:$0xf]  ;;  %1180 = vrot.lane.b32.xlu0 %v1179_v30, %s2439_s10 }
  0x16   :  { %v1198_v34 = vld [vmem:[#allocation0 + $0x203] ss:$8 sm:$0xf0]   ;;  %469 = vst [vmem:[#allocation0 + $0x318] sm:$0xf] %v2245_v31 }
  0x17   :  { %474 = vst [vmem:[#allocation0 + $0x310] sm:$0xf] %v2246_v32  ;;  %479 = vst [vmem:[#allocation0 + $0x308] sm:$0xf] %v2247_v33  ;;  %v2248_v35 = vld [vmem:[%s3580_s0 + $0x180] sm:$0xf] }
  0x18   :  { %v1196_v36 = vld [vmem:[#allocation0 + $0x203] ss:$8 sm:$0xf]   ;;  %484 = vst [vmem:[#allocation0 + $0x300] sm:$0xf] %v2248_v35 }
  0x19   :  { %v2209_v37 = vld [vmem:[%s3580_s0 + $0x21c] sm:$0xf]  ;;  %v1200_v38 = vsel %vm963_vm0, %v1198_v34, %v1196_v36  ;;  %v1187_v39 = vld [vmem:[#allocation0 + $0x103] ss:$8 sm:$0xf0]  }
  0x1a   :  { %289 = vst [vmem:[#allocation0 + $0x438] sm:$0xf] %v2209_v37  ;;  %v2210_v40 = vld [vmem:[%s3580_s0 + $0x218] sm:$0xf]  ;;  %1201 = vrot.lane.b32.xlu1 %v1200_v38, %s2439_s10  ;;  %v2211_v41 = vld [vmem:[%s3580_s0 + $0x214] sm:$0xf] }
  0x1b   :  { %294 = vst [vmem:[#allocation0 + $0x430] sm:$0xf] %v2210_v40  ;;  %v2212_v42 = vld [vmem:[%s3580_s0 + $0x210] sm:$0xf]  ;;  %v2213_v43 = vld [vmem:[%s3580_s0 + $0x20c] sm:$0xf] }
  0x1c   :  { %v1185_v44 = vld [vmem:[#allocation0 + $0x103] ss:$8 sm:$0xf]   ;;  %299 = vst [vmem:[#allocation0 + $0x428] sm:$0xf] %v2211_v41 }
  0x1d   :  { %304 = vst [vmem:[#allocation0 + $0x420] sm:$0xf] %v2212_v42  ;;  %309 = vst [vmem:[#allocation0 + $0x418] sm:$0xf] %v2213_v43  ;;  %v2214_v45 = vld [vmem:[%s3580_s0 + $0x208] sm:$0xf]  ;;  %v1189_v46 = vsel %vm963_vm0, %v1187_v39, %v1185_v44 }
  0x1e   :  { %314 = vst [vmem:[#allocation0 + $0x410] sm:$0xf] %v2214_v45  ;;  %v2215_v47 = vld [vmem:[%s3580_s0 + $0x204] sm:$0xf]  ;;  %v2216_v48 = vld [vmem:[%s3580_s0 + $0x200] sm:$0xf]  ;;  %1190 = vrot.lane.b32.xlu0 %v1189_v46, %s2439_s10 }
  0x1f   :  { %v2177_v49 = vld [vmem:[%s3580_s0 + $0x29c] sm:$0xf]  ;;  %v1209_v50 = vld [vmem:[#allocation0 + $0x303] ss:$8 sm:$0xf0]  }
  0x20   :  { %319 = vst [vmem:[#allocation0 + $0x408] sm:$0xf] %v2215_v47  ;;  %324 = vst [vmem:[#allocation0 + $0x400] sm:$0xf] %v2216_v48  ;;  %v2178_v51 = vld [vmem:[%s3580_s0 + $0x298] sm:$0xf] }
  0x21   :  { %129 = vst [vmem:[#allocation0 + $0x538] sm:$0xf] %v2177_v49  ;;  %134 = vst [vmem:[#allocation0 + $0x530] sm:$0xf] %v2178_v51  ;;  %v2179_v52 = vld [vmem:[%s3580_s0 + $0x294] sm:$0xf] }
  0x22   :  { %v2180_v53 = vld [vmem:[%s3580_s0 + $0x290] sm:$0xf]  ;;  %v2181_v54 = vld [vmem:[%s3580_s0 + $0x28c] sm:$0xf]  ;;  %139 = vst [vmem:[#allocation0 + $0x528] sm:$0xf] %v2179_v52 }
  0x23   :  { %v1207_v55 = vld [vmem:[#allocation0 + $0x303] ss:$8 sm:$0xf]   ;;  %144 = vst [vmem:[#allocation0 + $0x520] sm:$0xf] %v2180_v53 }
  0x24   :  { %149 = vst [vmem:[#allocation0 + $0x518] sm:$0xf] %v2181_v54  ;;  %v2182_v56 = vld [vmem:[%s3580_s0 + $0x288] sm:$0xf]  ;;  %v1211_v57 = vsel %vm963_vm0, %v1209_v50, %v1207_v55  ;;  %v2183_v58 = vld [vmem:[%s3580_s0 + $0x284] sm:$0xf] }
  0x25   :  { %154 = vst [vmem:[#allocation0 + $0x510] sm:$0xf] %v2182_v56  ;;  %v2184_v59 = vld [vmem:[%s3580_s0 + $0x280] sm:$0xf]  ;;  %v2329_v60 = vld [vmem:[%s3580_s0 + $0x3c] sm:$0xf]  ;;  %1212 = vrot.lane.b32.xlu1 %v1211_v57, %s2439_s10 }
  0x26   :  { %159 = vst [vmem:[#allocation0 + $0x508] sm:$0xf] %v2183_v58  ;;  %164 = vst [vmem:[#allocation0 + $0x500] sm:$0xf] %v2184_v59  ;;  %v2330_v61 = vld [vmem:[%s3580_s0 + $0x38] sm:$0xf] }
  0x27   :  { %889 = vst [vmem:[#allocation0 + $0x78] sm:$0xf] %v2329_v60  ;;  %v2331_v62 = vld [vmem:[%s3580_s0 + $0x34] sm:$0xf]  ;;  %v2332_v63 = vld [vmem:[%s3580_s0 + $0x30] sm:$0xf] }
  0x28   :  { %v1220_v0 = vld [vmem:[#allocation0 + $0x403] ss:$8 sm:$0xf0]   ;;  %894 = vst [vmem:[#allocation0 + $0x70] sm:$0xf] %v2330_v61 }
  0x29   :  { %899 = vst [vmem:[#allocation0 + $0x68] sm:$0xf] %v2331_v62  ;;  %904 = vst [vmem:[#allocation0 + $0x60] sm:$0xf] %v2332_v63  ;;  %v2333_v1 = vld [vmem:[%s3580_s0 + $0x2c] sm:$0xf] }
  0x2a   :  { %909 = vst [vmem:[#allocation0 + $0x58] sm:$0xf] %v2333_v1  ;;  %v2334_v2 = vld [vmem:[%s3580_s0 + $0x28] sm:$0xf]  ;;  %v2335_v3 = vld [vmem:[%s3580_s0 + $0x24] sm:$0xf] }
  0x2b   :  { %v2336_v4 = vld [vmem:[%s3580_s0 + $0x20] sm:$0xf]  ;;  %914 = vst [vmem:[#allocation0 + $0x50] sm:$0xf] %v2334_v2  ;;  %919 = vst [vmem:[#allocation0 + $0x48] sm:$0xf] %v2335_v3 }
  0x2c   :  { %v1218_v5 = vld [vmem:[#allocation0 + $0x403] ss:$8 sm:$0xf]   ;;  %924 = vst [vmem:[#allocation0 + $0x40] sm:$0xf] %v2336_v4 }
  0x2d   :  { %v2297_v6 = vld [vmem:[%s3580_s0 + $0xbc] sm:$0xf]  ;;  %v1222_v7 = vsel %vm963_vm0, %v1220_v0, %v1218_v5  ;;  %v2298_v8 = vld [vmem:[%s3580_s0 + $0xb8] sm:$0xf]  ;;  %v2299_v9 = vld [vmem:[%s3580_s0 + $0xb4] sm:$0xf] }
  0x2e   :  { %729 = vst [vmem:[#allocation0 + $0x178] sm:$0xf] %v2297_v6  ;;  %v2300_v10 = vld [vmem:[%s3580_s0 + $0xb0] sm:$0xf]  ;;  %1223 = vrot.lane.b32.xlu0 %v1222_v7, %s2439_s10  ;;  %734 = vst [vmem:[#allocation0 + $0x170] sm:$0xf] %v2298_v8 }
  0x2f   :  { %v1231_v11 = vld [vmem:[#allocation0 + $0x503] ss:$8 sm:$0xf0]   ;;  %739 = vst [vmem:[#allocation0 + $0x168] sm:$0xf] %v2299_v9 }
  0x30   :  { %744 = vst [vmem:[#allocation0 + $0x160] sm:$0xf] %v2300_v10  ;;  %v2301_v12 = vld [vmem:[%s3580_s0 + $0xac] sm:$0xf]  ;;  %v2302_v13 = vld [vmem:[%s3580_s0 + $0xa8] sm:$0xf] }
  0x31   :  { %749 = vst [vmem:[#allocation0 + $0x158] sm:$0xf] %v2301_v12  ;;  %v2303_v14 = vld [vmem:[%s3580_s0 + $0xa4] sm:$0xf]  ;;  %v2304_v15 = vld [vmem:[%s3580_s0 + $0xa0] sm:$0xf] }
  0x32   :  { %v1229_v16 = vld [vmem:[#allocation0 + $0x503] ss:$8 sm:$0xf]   ;;  %754 = vst [vmem:[#allocation0 + $0x150] sm:$0xf] %v2302_v13 }
  0x33   :  { %759 = vst [vmem:[#allocation0 + $0x148] sm:$0xf] %v2303_v14  ;;  %764 = vst [vmem:[#allocation0 + $0x140] sm:$0xf] %v2304_v15  ;;  %v2265_v17 = vld [vmem:[%s3580_s0 + $0x13c] sm:$0xf]  ;;  %v1233_v18 = vsel %vm963_vm0, %v1231_v11, %v1229_v16 }
  0x34   :  { %v1242_v19 = vld [vmem:[#allocation0 + $0x43] ss:$8 sm:$0xf0]   ;;  %569 = vst [vmem:[#allocation0 + $0x278] sm:$0xf] %v2265_v17  ;;  %1234 = vrot.lane.b32.xlu1 %v1233_v18, %s2439_s10 }
  0x35   :  { %v2266_v20 = vld [vmem:[%s3580_s0 + $0x138] sm:$0xf]  ;;  %v2267_v21 = vld [vmem:[%s3580_s0 + $0x134] sm:$0xf]  ;;  %v2268_v22 = vld [vmem:[%s3580_s0 + $0x130] sm:$0xf] }
  0x36   :  { %574 = vst [vmem:[#allocation0 + $0x270] sm:$0xf] %v2266_v20  ;;  %v2269_v23 = vld [vmem:[%s3580_s0 + $0x12c] sm:$0xf]  ;;  %579 = vst [vmem:[#allocation0 + $0x268] sm:$0xf] %v2267_v21 }
  0x37   :  { %v1240_v24 = vld [vmem:[#allocation0 + $0x43] ss:$8 sm:$0xf]   ;;  %584 = vst [vmem:[#allocation0 + $0x260] sm:$0xf] %v2268_v22 }
  0x38   :  { %589 = vst [vmem:[#allocation0 + $0x258] sm:$0xf] %v2269_v23  ;;  %v2270_v25 = vld [vmem:[%s3580_s0 + $0x128] sm:$0xf]  ;;  %v1244_v26 = vsel %vm963_vm0, %v1242_v19, %v1240_v24  ;;  %v2271_v27 = vld [vmem:[%s3580_s0 + $0x124] sm:$0xf] }
  0x39   :  { %594 = vst [vmem:[#allocation0 + $0x250] sm:$0xf] %v2270_v25  ;;  %v2272_v28 = vld [vmem:[%s3580_s0 + $0x120] sm:$0xf]  ;;  %v2233_v29 = vld [vmem:[%s3580_s0 + $0x1bc] sm:$0xf]  ;;  %1245 = vrot.lane.b32.xlu0 %v1244_v26, %s2439_s10 }
  0x3a   :  { %v1253_v30 = vld [vmem:[#allocation0 + $0x143] ss:$8 sm:$0xf0]   ;;  %599 = vst [vmem:[#allocation0 + $0x248] sm:$0xf] %v2271_v27 }
  0x3b   :  { %604 = vst [vmem:[#allocation0 + $0x240] sm:$0xf] %v2272_v28  ;;  %409 = vst [vmem:[#allocation0 + $0x378] sm:$0xf] %v2233_v29  ;;  %v2234_v31 = vld [vmem:[%s3580_s0 + $0x1b8] sm:$0xf] }
  0x3c   :  { %414 = vst [vmem:[#allocation0 + $0x370] sm:$0xf] %v2234_v31  ;;  %v2235_v32 = vld [vmem:[%s3580_s0 + $0x1b4] sm:$0xf]  ;;  %v2236_v33 = vld [vmem:[%s3580_s0 + $0x1b0] sm:$0xf] }
  0x3d   :  { %v2237_v34 = vld [vmem:[%s3580_s0 + $0x1ac] sm:$0xf]  ;;  %v1251_v35 = vld [vmem:[#allocation0 + $0x143] ss:$8 sm:$0xf]  }
  0x3e   :  { %419 = vst [vmem:[#allocation0 + $0x368] sm:$0xf] %v2235_v32  ;;  %424 = vst [vmem:[#allocation0 + $0x360] sm:$0xf] %v2236_v33  ;;  %v2238_v36 = vld [vmem:[%s3580_s0 + $0x1a8] sm:$0xf]  ;;  %v1255_v37 = vsel %vm963_vm0, %v1253_v30, %v1251_v35 }
  0x3f   :  { %429 = vst [vmem:[#allocation0 + $0x358] sm:$0xf] %v2237_v34  ;;  %434 = vst [vmem:[#allocation0 + $0x350] sm:$0xf] %v2238_v36  ;;  %v2239_v38 = vld [vmem:[%s3580_s0 + $0x1a4] sm:$0xf]  ;;  %1256 = vrot.lane.b32.xlu1 %v1255_v37, %s2439_s10 }
  0x40   :  { %v2240_v39 = vld [vmem:[%s3580_s0 + $0x1a0] sm:$0xf]  ;;  %v2201_v40 = vld [vmem:[%s3580_s0 + $0x23c] sm:$0xf]  ;;  %439 = vst [vmem:[#allocation0 + $0x348] sm:$0xf] %v2239_v38 }
  0x41   :  { %444 = vst [vmem:[#allocation0 + $0x340] sm:$0xf] %v2240_v39  ;;  %249 = vst [vmem:[#allocation0 + $0x478] sm:$0xf] %v2201_v40  ;;  %v2202_v41 = vld [vmem:[%s3580_s0 + $0x238] sm:$0xf] }
  0x42   :  { %v2203_v42 = vld [vmem:[%s3580_s0 + $0x234] sm:$0xf]  ;;  %v2204_v43 = vld [vmem:[%s3580_s0 + $0x230] sm:$0xf]  ;;  %254 = vst [vmem:[#allocation0 + $0x470] sm:$0xf] %v2202_v41 }
  0x43   :  { %v1264_v44 = vld [vmem:[#allocation0 + $0x243] ss:$8 sm:$0xf0]   ;;  %259 = vst [vmem:[#allocation0 + $0x468] sm:$0xf] %v2203_v42 }
  0x44   :  { %264 = vst [vmem:[#allocation0 + $0x460] sm:$0xf] %v2204_v43  ;;  %v2205_v45 = vld [vmem:[%s3580_s0 + $0x22c] sm:$0xf]  ;;  %v2206_v46 = vld [vmem:[%s3580_s0 + $0x228] sm:$0xf] }
  0x45   :  { %269 = vst [vmem:[#allocation0 + $0x458] sm:$0xf] %v2205_v45  ;;  %v2207_v47 = vld [vmem:[%s3580_s0 + $0x224] sm:$0xf]  ;;  %v2208_v48 = vld [vmem:[%s3580_s0 + $0x220] sm:$0xf] }
  0x46   :  { %v1262_v49 = vld [vmem:[#allocation0 + $0x243] ss:$8 sm:$0xf]   ;;  %274 = vst [vmem:[#allocation0 + $0x450] sm:$0xf] %v2206_v46 }
  0x47   :  { %279 = vst [vmem:[#allocation0 + $0x448] sm:$0xf] %v2207_v47  ;;  %284 = vst [vmem:[#allocation0 + $0x440] sm:$0xf] %v2208_v48  ;;  %v2169_v50 = vld [vmem:[%s3580_s0 + $0x2bc] sm:$0xf]  ;;  %v1266_v51 = vsel %vm963_vm0, %v1264_v44, %v1262_v49 }
  0x48   :  { %89 = vst [vmem:[#allocation0 + $0x578] sm:$0xf] %v2169_v50  ;;  %v2170_v52 = vld [vmem:[%s3580_s0 + $0x2b8] sm:$0xf]  ;;  %v2171_v53 = vld [vmem:[%s3580_s0 + $0x2b4] sm:$0xf]  ;;  %1267 = vrot.lane.b32.xlu0 %v1266_v51, %s2439_s10 }
  0x49   :  { %v2172_v54 = vld [vmem:[%s3580_s0 + $0x2b0] sm:$0xf]  ;;  %94 = vst [vmem:[#allocation0 + $0x570] sm:$0xf] %v2170_v52  ;;  %99 = vst [vmem:[#allocation0 + $0x568] sm:$0xf] %v2171_v53 }
  0x4a   :  { %v1275_v55 = vld [vmem:[#allocation0 + $0x343] ss:$8 sm:$0xf0]   ;;  %104 = vst [vmem:[#allocation0 + $0x560] sm:$0xf] %v2172_v54 }
  0x4b   :  { %v2173_v56 = vld [vmem:[%s3580_s0 + $0x2ac] sm:$0xf]  ;;  %v2174_v57 = vld [vmem:[%s3580_s0 + $0x2a8] sm:$0xf]  ;;  %v2175_v58 = vld [vmem:[%s3580_s0 + $0x2a4] sm:$0xf] }
  0x4c   :  { %109 = vst [vmem:[#allocation0 + $0x558] sm:$0xf] %v2173_v56  ;;  %v2176_v59 = vld [vmem:[%s3580_s0 + $0x2a0] sm:$0xf]  ;;  %114 = vst [vmem:[#allocation0 + $0x550] sm:$0xf] %v2174_v57 }
  0x4d   :  { %v1273_v60 = vld [vmem:[#allocation0 + $0x343] ss:$8 sm:$0xf]   ;;  %119 = vst [vmem:[#allocation0 + $0x548] sm:$0xf] %v2175_v58 }
  0x4e   :  { %124 = vst [vmem:[#allocation0 + $0x540] sm:$0xf] %v2176_v59  ;;  %v2321_v61 = vld [vmem:[%s3580_s0 + $0x5c] sm:$0xf]  ;;  %v1277_v62 = vsel %vm963_vm0, %v1275_v55, %v1273_v60  ;;  %v2322_v0 = vld [vmem:[%s3580_s0 + $0x58] sm:$0xf] }
  0x4f   :  { %v1286_v63 = vld [vmem:[#allocation0 + $0x443] ss:$8 sm:$0xf0]   ;;  %849 = vst [vmem:[#allocation0 + $0xb8] sm:$0xf] %v2321_v61  ;;  %1278 = vrot.lane.b32.xlu1 %v1277_v62, %s2439_s10 }
  0x50   :  { %854 = vst [vmem:[#allocation0 + $0xb0] sm:$0xf] %v2322_v0  ;;  %v2323_v1 = vld [vmem:[%s3580_s0 + $0x54] sm:$0xf]  ;;  %v2324_v2 = vld [vmem:[%s3580_s0 + $0x50] sm:$0xf] }
  0x51   :  { %v2325_v3 = vld [vmem:[%s3580_s0 + $0x4c] sm:$0xf]  ;;  %v1284_v4 = vld [vmem:[#allocation0 + $0x443] ss:$8 sm:$0xf]  }
  0x52   :  { %859 = vst [vmem:[#allocation0 + $0xa8] sm:$0xf] %v2323_v1  ;;  %864 = vst [vmem:[#allocation0 + $0xa0] sm:$0xf] %v2324_v2  ;;  %v2326_v5 = vld [vmem:[%s3580_s0 + $0x48] sm:$0xf]  ;;  %v1288_v6 = vsel %vm963_vm0, %v1286_v63, %v1284_v4 }
  0x53   :  { %869 = vst [vmem:[#allocation0 + $0x98] sm:$0xf] %v2325_v3  ;;  %874 = vst [vmem:[#allocation0 + $0x90] sm:$0xf] %v2326_v5  ;;  %v2327_v7 = vld [vmem:[%s3580_s0 + $0x44] sm:$0xf]  ;;  %1289 = vrot.lane.b32.xlu0 %v1288_v6, %s2439_s10 }
  0x54   :  { %v2328_v8 = vld [vmem:[%s3580_s0 + $0x40] sm:$0xf]  ;;  %v2289_v9 = vld [vmem:[%s3580_s0 + $0xdc] sm:$0xf]  ;;  %879 = vst [vmem:[#allocation0 + $0x88] sm:$0xf] %v2327_v7 }
  0x55   :  { %v1297_v10 = vld [vmem:[#allocation0 + $0x543] ss:$8 sm:$0xf0]   ;;  %884 = vst [vmem:[#allocation0 + $0x80] sm:$0xf] %v2328_v8 }
  0x56   :  { %689 = vst [vmem:[#allocation0 + $0x1b8] sm:$0xf] %v2289_v9  ;;  %v2290_v11 = vld [vmem:[%s3580_s0 + $0xd8] sm:$0xf]  ;;  %v2291_v12 = vld [vmem:[%s3580_s0 + $0xd4] sm:$0xf] }
  0x57   :  { %694 = vst [vmem:[#allocation0 + $0x1b0] sm:$0xf] %v2290_v11  ;;  %v2292_v13 = vld [vmem:[%s3580_s0 + $0xd0] sm:$0xf]  ;;  %v2293_v14 = vld [vmem:[%s3580_s0 + $0xcc] sm:$0xf] }
  0x58   :  { %v1295_v15 = vld [vmem:[#allocation0 + $0x543] ss:$8 sm:$0xf]   ;;  %699 = vst [vmem:[#allocation0 + $0x1a8] sm:$0xf] %v2291_v12 }
  0x59   :  { %704 = vst [vmem:[#allocation0 + $0x1a0] sm:$0xf] %v2292_v13  ;;  %709 = vst [vmem:[#allocation0 + $0x198] sm:$0xf] %v2293_v14  ;;  %v2294_v16 = vld [vmem:[%s3580_s0 + $0xc8] sm:$0xf]  ;;  %v1299_v17 = vsel %vm963_vm0, %v1297_v10, %v1295_v15 }
  0x5a   :  { %714 = vst [vmem:[#allocation0 + $0x190] sm:$0xf] %v2294_v16  ;;  %v2295_v18 = vld [vmem:[%s3580_s0 + $0xc4] sm:$0xf]  ;;  %v2296_v19 = vld [vmem:[%s3580_s0 + $0xc0] sm:$0xf]  ;;  %1300 = vrot.lane.b32.xlu1 %v1299_v17, %s2439_s10 }
  0x5b   :  { %v2257_v20 = vld [vmem:[%s3580_s0 + $0x15c] sm:$0xf]  ;;  %719 = vst [vmem:[#allocation0 + $0x188] sm:$0xf] %v2295_v18  ;;  %724 = vst [vmem:[#allocation0 + $0x180] sm:$0xf] %v2296_v19 }
  0x5c   :  { %529 = vst [vmem:[#allocation0 + $0x2b8] sm:$0xf] %v2257_v20  ;;  %v2258_v21 = vld [vmem:[%s3580_s0 + $0x158] sm:$0xf]  ;;  %v2259_v22 = vld [vmem:[%s3580_s0 + $0x154] sm:$0xf] }
  0x5d   :  { %v2260_v23 = vld [vmem:[%s3580_s0 + $0x150] sm:$0xf]  ;;  %534 = vst [vmem:[#allocation0 + $0x2b0] sm:$0xf] %v2258_v21  ;;  %539 = vst [vmem:[#allocation0 + $0x2a8] sm:$0xf] %v2259_v22 }
  0x5e   :  { %v1308_v24 = vld [vmem:[#allocation0 + $0x83] ss:$8 sm:$0xf0]   ;;  %544 = vst [vmem:[#allocation0 + $0x2a0] sm:$0xf] %v2260_v23 }
  0x5f   :  { %v2261_v25 = vld [vmem:[%s3580_s0 + $0x14c] sm:$0xf]  ;;  %v2262_v26 = vld [vmem:[%s3580_s0 + $0x148] sm:$0xf]  ;;  %v2263_v27 = vld [vmem:[%s3580_s0 + $0x144] sm:$0xf] }
  0x60   :  { %549 = vst [vmem:[#allocation0 + $0x298] sm:$0xf] %v2261_v25  ;;  %v2264_v28 = vld [vmem:[%s3580_s0 + $0x140] sm:$0xf]  ;;  %554 = vst [vmem:[#allocation0 + $0x290] sm:$0xf] %v2262_v26 }
  0x61   :  { %v1306_v29 = vld [vmem:[#allocation0 + $0x83] ss:$8 sm:$0xf]   ;;  %559 = vst [vmem:[#allocation0 + $0x288] sm:$0xf] %v2263_v27 }
  0x62   :  { %564 = vst [vmem:[#allocation0 + $0x280] sm:$0xf] %v2264_v28  ;;  %v2225_v30 = vld [vmem:[%s3580_s0 + $0x1dc] sm:$0xf]  ;;  %v1310_v31 = vsel %vm963_vm0, %v1308_v24, %v1306_v29  ;;  %v2226_v32 = vld [vmem:[%s3580_s0 + $0x1d8] sm:$0xf] }
  0x63   :  { %369 = vst [vmem:[#allocation0 + $0x3b8] sm:$0xf] %v2225_v30  ;;  %v2227_v33 = vld [vmem:[%s3580_s0 + $0x1d4] sm:$0xf]  ;;  %v2228_v34 = vld [vmem:[%s3580_s0 + $0x1d0] sm:$0xf]  ;;  %1311 = vrot.lane.b32.xlu0 %v1310_v31, %s2439_s10 }
  0x64   :  { %v1319_v35 = vld [vmem:[#allocation0 + $0x183] ss:$8 sm:$0xf0]   ;;  %374 = vst [vmem:[#allocation0 + $0x3b0] sm:$0xf] %v2226_v32 }
  0x65   :  { %379 = vst [vmem:[#allocation0 + $0x3a8] sm:$0xf] %v2227_v33  ;;  %384 = vst [vmem:[#allocation0 + $0x3a0] sm:$0xf] %v2228_v34  ;;  %v2229_v36 = vld [vmem:[%s3580_s0 + $0x1cc] sm:$0xf] }
  0x66   :  { %389 = vst [vmem:[#allocation0 + $0x398] sm:$0xf] %v2229_v36  ;;  %v2230_v37 = vld [vmem:[%s3580_s0 + $0x1c8] sm:$0xf]  ;;  %v2231_v38 = vld [vmem:[%s3580_s0 + $0x1c4] sm:$0xf] }
  0x67   :  { %v2232_v39 = vld [vmem:[%s3580_s0 + $0x1c0] sm:$0xf]  ;;  %394 = vst [vmem:[#allocation0 + $0x390] sm:$0xf] %v2230_v37  ;;  %399 = vst [vmem:[#allocation0 + $0x388] sm:$0xf] %v2231_v38 }
  0x68   :  { %v1317_v40 = vld [vmem:[#allocation0 + $0x183] ss:$8 sm:$0xf]   ;;  %404 = vst [vmem:[#allocation0 + $0x380] sm:$0xf] %v2232_v39 }
  0x69   :  { %v2193_v41 = vld [vmem:[%s3580_s0 + $0x25c] sm:$0xf]  ;;  %v1321_v42 = vsel %vm963_vm0, %v1319_v35, %v1317_v40  ;;  %v1330_v43 = vld [vmem:[#allocation0 + $0x283] ss:$8 sm:$0xf0]  }
  0x6a   :  { %209 = vst [vmem:[#allocation0 + $0x4b8] sm:$0xf] %v2193_v41  ;;  %v2194_v44 = vld [vmem:[%s3580_s0 + $0x258] sm:$0xf]  ;;  %1322 = vrot.lane.b32.xlu1 %v1321_v42, %s2439_s10  ;;  %v2195_v45 = vld [vmem:[%s3580_s0 + $0x254] sm:$0xf] }
  0x6b   :  { %214 = vst [vmem:[#allocation0 + $0x4b0] sm:$0xf] %v2194_v44  ;;  %v2196_v46 = vld [vmem:[%s3580_s0 + $0x250] sm:$0xf]  ;;  %v2197_v47 = vld [vmem:[%s3580_s0 + $0x24c] sm:$0xf] }
  0x6c   :  { %v1328_v48 = vld [vmem:[#allocation0 + $0x283] ss:$8 sm:$0xf]   ;;  %219 = vst [vmem:[#allocation0 + $0x4a8] sm:$0xf] %v2195_v45 }
  0x6d   :  { %224 = vst [vmem:[#allocation0 + $0x4a0] sm:$0xf] %v2196_v46  ;;  %229 = vst [vmem:[#allocation0 + $0x498] sm:$0xf] %v2197_v47  ;;  %v2198_v49 = vld [vmem:[%s3580_s0 + $0x248] sm:$0xf]  ;;  %v1332_v50 = vsel %vm963_vm0, %v1330_v43, %v1328_v48 }
  0x6e   :  { %234 = vst [vmem:[#allocation0 + $0x490] sm:$0xf] %v2198_v49  ;;  %v2199_v51 = vld [vmem:[%s3580_s0 + $0x244] sm:$0xf]  ;;  %v2200_v52 = vld [vmem:[%s3580_s0 + $0x240] sm:$0xf]  ;;  %1333 = vrot.lane.b32.xlu0 %v1332_v50, %s2439_s10 }
  0x6f   :  { %v2161_v53 = vld [vmem:[%s3580_s0 + $0x2dc] sm:$0xf]  ;;  %v1341_v54 = vld [vmem:[#allocation0 + $0x383] ss:$8 sm:$0xf0]  }
  0x70   :  { %239 = vst [vmem:[#allocation0 + $0x488] sm:$0xf] %v2199_v51  ;;  %244 = vst [vmem:[#allocation0 + $0x480] sm:$0xf] %v2200_v52  ;;  %v2162_v55 = vld [vmem:[%s3580_s0 + $0x2d8] sm:$0xf] }
  0x71   :  { %49 = vst [vmem:[#allocation0 + $0x5b8] sm:$0xf] %v2161_v53  ;;  %54 = vst [vmem:[#allocation0 + $0x5b0] sm:$0xf] %v2162_v55  ;;  %v2163_v56 = vld [vmem:[%s3580_s0 + $0x2d4] sm:$0xf] }
  0x72   :  { %v2164_v57 = vld [vmem:[%s3580_s0 + $0x2d0] sm:$0xf]  ;;  %v2165_v58 = vld [vmem:[%s3580_s0 + $0x2cc] sm:$0xf]  ;;  %59 = vst [vmem:[#allocation0 + $0x5a8] sm:$0xf] %v2163_v56 }
  0x73   :  { %v1339_v59 = vld [vmem:[#allocation0 + $0x383] ss:$8 sm:$0xf]   ;;  %64 = vst [vmem:[#allocation0 + $0x5a0] sm:$0xf] %v2164_v57 }
  0x74   :  { %69 = vst [vmem:[#allocation0 + $0x598] sm:$0xf] %v2165_v58  ;;  %v2166_v60 = vld [vmem:[%s3580_s0 + $0x2c8] sm:$0xf]  ;;  %v1343_v61 = vsel %vm963_vm0, %v1341_v54, %v1339_v59  ;;  %v2167_v62 = vld [vmem:[%s3580_s0 + $0x2c4] sm:$0xf] }
  0x75   :  { %74 = vst [vmem:[#allocation0 + $0x590] sm:$0xf] %v2166_v60  ;;  %v2168_v63 = vld [vmem:[%s3580_s0 + $0x2c0] sm:$0xf]  ;;  %v2313_v0 = vld [vmem:[%s3580_s0 + $0x7c] sm:$0xf]  ;;  %1344 = vrot.lane.b32.xlu1 %v1343_v61, %s2439_s10 }
  0x76   :  { %79 = vst [vmem:[#allocation0 + $0x588] sm:$0xf] %v2167_v62  ;;  %84 = vst [vmem:[#allocation0 + $0x580] sm:$0xf] %v2168_v63  ;;  %v2314_v1 = vld [vmem:[%s3580_s0 + $0x78] sm:$0xf] }
  0x77   :  { %809 = vst [vmem:[#allocation0 + $0xf8] sm:$0xf] %v2313_v0  ;;  %v2315_v2 = vld [vmem:[%s3580_s0 + $0x74] sm:$0xf]  ;;  %v2316_v3 = vld [vmem:[%s3580_s0 + $0x70] sm:$0xf] }
  0x78   :  { %v1352_v4 = vld [vmem:[#allocation0 + $0x483] ss:$8 sm:$0xf0]   ;;  %814 = vst [vmem:[#allocation0 + $0xf0] sm:$0xf] %v2314_v1 }
  0x79   :  { %819 = vst [vmem:[#allocation0 + $0xe8] sm:$0xf] %v2315_v2  ;;  %824 = vst [vmem:[#allocation0 + $0xe0] sm:$0xf] %v2316_v3  ;;  %v2317_v5 = vld [vmem:[%s3580_s0 + $0x6c] sm:$0xf] }
  0x7a   :  { %829 = vst [vmem:[#allocation0 + $0xd8] sm:$0xf] %v2317_v5  ;;  %v2318_v6 = vld [vmem:[%s3580_s0 + $0x68] sm:$0xf]  ;;  %v2319_v7 = vld [vmem:[%s3580_s0 + $0x64] sm:$0xf] }
  0x7b   :  { %v2320_v8 = vld [vmem:[%s3580_s0 + $0x60] sm:$0xf]  ;;  %834 = vst [vmem:[#allocation0 + $0xd0] sm:$0xf] %v2318_v6  ;;  %839 = vst [vmem:[#allocation0 + $0xc8] sm:$0xf] %v2319_v7 }
  0x7c   :  { %v1350_v9 = vld [vmem:[#allocation0 + $0x483] ss:$8 sm:$0xf]   ;;  %844 = vst [vmem:[#allocation0 + $0xc0] sm:$0xf] %v2320_v8 }
  0x7d   :  { %v2281_v10 = vld [vmem:[%s3580_s0 + $0xfc] sm:$0xf]  ;;  %v1354_v11 = vsel %vm963_vm0, %v1352_v4, %v1350_v9  ;;  %v2282_v12 = vld [vmem:[%s3580_s0 + $0xf8] sm:$0xf]  ;;  %v2283_v13 = vld [vmem:[%s3580_s0 + $0xf4] sm:$0xf] }
  0x7e   :  { %649 = vst [vmem:[#allocation0 + $0x1f8] sm:$0xf] %v2281_v10  ;;  %v2284_v14 = vld [vmem:[%s3580_s0 + $0xf0] sm:$0xf]  ;;  %1355 = vrot.lane.b32.xlu0 %v1354_v11, %s2439_s10  ;;  %654 = vst [vmem:[#allocation0 + $0x1f0] sm:$0xf] %v2282_v12 }
  0x7f   :  { %v1363_v15 = vld [vmem:[#allocation0 + $0x583] ss:$8 sm:$0xf0]   ;;  %659 = vst [vmem:[#allocation0 + $0x1e8] sm:$0xf] %v2283_v13 }
  0x80   :  { %664 = vst [vmem:[#allocation0 + $0x1e0] sm:$0xf] %v2284_v14  ;;  %v2285_v16 = vld [vmem:[%s3580_s0 + $0xec] sm:$0xf]  ;;  %v2286_v17 = vld [vmem:[%s3580_s0 + $0xe8] sm:$0xf] }
  0x81   :  { %669 = vst [vmem:[#allocation0 + $0x1d8] sm:$0xf] %v2285_v16  ;;  %v2287_v18 = vld [vmem:[%s3580_s0 + $0xe4] sm:$0xf]  ;;  %v2288_v19 = vld [vmem:[%s3580_s0 + $0xe0] sm:$0xf] }
  0x82   :  { %v1361_v20 = vld [vmem:[#allocation0 + $0x583] ss:$8 sm:$0xf]   ;;  %674 = vst [vmem:[#allocation0 + $0x1d0] sm:$0xf] %v2286_v17 }
  0x83   :  { %679 = vst [vmem:[#allocation0 + $0x1c8] sm:$0xf] %v2287_v18  ;;  %684 = vst [vmem:[#allocation0 + $0x1c0] sm:$0xf] %v2288_v19  ;;  %v2249_v21 = vld [vmem:[%s3580_s0 + $0x17c] sm:$0xf]  ;;  %v1365_v22 = vsel %vm963_vm0, %v1363_v15, %v1361_v20 }
  0x84   :  { %v1374_v23 = vld [vmem:[#allocation0 + $0xc3] ss:$8 sm:$0xf0]   ;;  %489 = vst [vmem:[#allocation0 + $0x2f8] sm:$0xf] %v2249_v21  ;;  %1366 = vrot.lane.b32.xlu1 %v1365_v22, %s2439_s10 }
  0x85   :  { %v2250_v24 = vld [vmem:[%s3580_s0 + $0x178] sm:$0xf]  ;;  %v2251_v25 = vld [vmem:[%s3580_s0 + $0x174] sm:$0xf]  ;;  %v2252_v26 = vld [vmem:[%s3580_s0 + $0x170] sm:$0xf] }
  0x86   :  { %494 = vst [vmem:[#allocation0 + $0x2f0] sm:$0xf] %v2250_v24  ;;  %v2253_v27 = vld [vmem:[%s3580_s0 + $0x16c] sm:$0xf]  ;;  %499 = vst [vmem:[#allocation0 + $0x2e8] sm:$0xf] %v2251_v25 }
  0x87   :  { %v1372_v28 = vld [vmem:[#allocation0 + $0xc3] ss:$8 sm:$0xf]   ;;  %504 = vst [vmem:[#allocation0 + $0x2e0] sm:$0xf] %v2252_v26 }
  0x88   :  { %509 = vst [vmem:[#allocation0 + $0x2d8] sm:$0xf] %v2253_v27  ;;  %v2254_v29 = vld [vmem:[%s3580_s0 + $0x168] sm:$0xf]  ;;  %v1376_v30 = vsel %vm963_vm0, %v1374_v23, %v1372_v28  ;;  %v2255_v31 = vld [vmem:[%s3580_s0 + $0x164] sm:$0xf] }
  0x89   :  { %514 = vst [vmem:[#allocation0 + $0x2d0] sm:$0xf] %v2254_v29  ;;  %v2256_v32 = vld [vmem:[%s3580_s0 + $0x160] sm:$0xf]  ;;  %v2217_v33 = vld [vmem:[%s3580_s0 + $0x1fc] sm:$0xf]  ;;  %1377 = vrot.lane.b32.xlu0 %v1376_v30, %s2439_s10 }
  0x8a   :  { %v1385_v34 = vld [vmem:[#allocation0 + $0x1c3] ss:$8 sm:$0xf0]   ;;  %519 = vst [vmem:[#allocation0 + $0x2c8] sm:$0xf] %v2255_v31 }
  0x8b   :  { %524 = vst [vmem:[#allocation0 + $0x2c0] sm:$0xf] %v2256_v32  ;;  %329 = vst [vmem:[#allocation0 + $0x3f8] sm:$0xf] %v2217_v33  ;;  %v2218_v35 = vld [vmem:[%s3580_s0 + $0x1f8] sm:$0xf] }
  0x8c   :  { %334 = vst [vmem:[#allocation0 + $0x3f0] sm:$0xf] %v2218_v35  ;;  %v2219_v36 = vld [vmem:[%s3580_s0 + $0x1f4] sm:$0xf]  ;;  %v2220_v37 = vld [vmem:[%s3580_s0 + $0x1f0] sm:$0xf] }
  0x8d   :  { %v2221_v38 = vld [vmem:[%s3580_s0 + $0x1ec] sm:$0xf]  ;;  %v1383_v39 = vld [vmem:[#allocation0 + $0x1c3] ss:$8 sm:$0xf]  }
  0x8e   :  { %339 = vst [vmem:[#allocation0 + $0x3e8] sm:$0xf] %v2219_v36  ;;  %344 = vst [vmem:[#allocation0 + $0x3e0] sm:$0xf] %v2220_v37  ;;  %v2222_v40 = vld [vmem:[%s3580_s0 + $0x1e8] sm:$0xf]  ;;  %v1387_v41 = vsel %vm963_vm0, %v1385_v34, %v1383_v39 }
  0x8f   :  { %349 = vst [vmem:[#allocation0 + $0x3d8] sm:$0xf] %v2221_v38  ;;  %354 = vst [vmem:[#allocation0 + $0x3d0] sm:$0xf] %v2222_v40  ;;  %v2223_v42 = vld [vmem:[%s3580_s0 + $0x1e4] sm:$0xf]  ;;  %1388 = vrot.lane.b32.xlu1 %v1387_v41, %s2439_s10 }
  0x90   :  { %v2224_v43 = vld [vmem:[%s3580_s0 + $0x1e0] sm:$0xf]  ;;  %v2185_v44 = vld [vmem:[%s3580_s0 + $0x27c] sm:$0xf]  ;;  %359 = vst [vmem:[#allocation0 + $0x3c8] sm:$0xf] %v2223_v42 }
  0x91   :  { %364 = vst [vmem:[#allocation0 + $0x3c0] sm:$0xf] %v2224_v43  ;;  %169 = vst [vmem:[#allocation0 + $0x4f8] sm:$0xf] %v2185_v44  ;;  %v2186_v45 = vld [vmem:[%s3580_s0 + $0x278] sm:$0xf] }
  0x92   :  { %v2187_v46 = vld [vmem:[%s3580_s0 + $0x274] sm:$0xf]  ;;  %v2188_v47 = vld [vmem:[%s3580_s0 + $0x270] sm:$0xf]  ;;  %174 = vst [vmem:[#allocation0 + $0x4f0] sm:$0xf] %v2186_v45 }
  0x93   :  { %v1396_v48 = vld [vmem:[#allocation0 + $0x2c3] ss:$8 sm:$0xf0]   ;;  %179 = vst [vmem:[#allocation0 + $0x4e8] sm:$0xf] %v2187_v46 }
  0x94   :  { %184 = vst [vmem:[#allocation0 + $0x4e0] sm:$0xf] %v2188_v47  ;;  %v2189_v49 = vld [vmem:[%s3580_s0 + $0x26c] sm:$0xf]  ;;  %v2190_v50 = vld [vmem:[%s3580_s0 + $0x268] sm:$0xf] }
  0x95   :  { %189 = vst [vmem:[#allocation0 + $0x4d8] sm:$0xf] %v2189_v49  ;;  %v2191_v51 = vld [vmem:[%s3580_s0 + $0x264] sm:$0xf]  ;;  %v2192_v52 = vld [vmem:[%s3580_s0 + $0x260] sm:$0xf] }
  0x96   :  { %v1394_v53 = vld [vmem:[#allocation0 + $0x2c3] ss:$8 sm:$0xf]   ;;  %194 = vst [vmem:[#allocation0 + $0x4d0] sm:$0xf] %v2190_v50 }
  0x97   :  { %199 = vst [vmem:[#allocation0 + $0x4c8] sm:$0xf] %v2191_v51  ;;  %204 = vst [vmem:[#allocation0 + $0x4c0] sm:$0xf] %v2192_v52  ;;  %v2153_v54 = vld [vmem:[%s3580_s0 + $0x2fc] sm:$0xf]  ;;  %v1398_v55 = vsel %vm963_vm0, %v1396_v48, %v1394_v53  ;;  %v1181_v51 = vpop.permute.xlu0 %1180  }
  0x98   :  { %9 = vst [vmem:[#allocation0 + $0x5f8] sm:$0xf] %v2153_v54  ;;  %v2154_v56 = vld [vmem:[%s3580_s0 + $0x2f8] sm:$0xf]  ;;  %v2155_v57 = vld [vmem:[%s3580_s0 + $0x2f4] sm:$0xf]  ;;  %1399 = vrot.lane.b32.xlu0 %v1398_v55, %s2439_s10 }
  0x99   :  { %v2156_v58 = vld [vmem:[%s3580_s0 + $0x2f0] sm:$0xf]  ;;  %14 = vst [vmem:[#allocation0 + $0x5f0] sm:$0xf] %v2154_v56  ;;  %19 = vst [vmem:[#allocation0 + $0x5e8] sm:$0xf] %v2155_v57 }
  0x9a   :  { %v1407_v59 = vld [vmem:[#allocation0 + $0x3c3] ss:$8 sm:$0xf0]   ;;  %24 = vst [vmem:[#allocation0 + $0x5e0] sm:$0xf] %v2156_v58 }
  0x9b   :  { %v2157_v60 = vld [vmem:[%s3580_s0 + $0x2ec] sm:$0xf]  ;;  %v2158_v61 = vld [vmem:[%s3580_s0 + $0x2e8] sm:$0xf]  ;;  %v2159_v62 = vld [vmem:[%s3580_s0 + $0x2e4] sm:$0xf] }
  0x9c   :  { %29 = vst [vmem:[#allocation0 + $0x5d8] sm:$0xf] %v2157_v60  ;;  %v2160_v63 = vld [vmem:[%s3580_s0 + $0x2e0] sm:$0xf]  ;;  %34 = vst [vmem:[#allocation0 + $0x5d0] sm:$0xf] %v2158_v61 }
  0x9d   :  { %v1405_v0 = vld [vmem:[#allocation0 + $0x3c3] ss:$8 sm:$0xf]   ;;  %39 = vst [vmem:[#allocation0 + $0x5c8] sm:$0xf] %v2159_v62  ;;  %s2440_s0 = smov 64  }
  0x9e   :  { %44 = vst [vmem:[#allocation0 + $0x5c0] sm:$0xf] %v2160_v63  ;;  %v1409_v1 = vsel %vm963_vm0, %v1407_v59, %v1405_v0  ;;  %v1418_v2 = vld [vmem:[#allocation0 + $0x4c3] ss:$8 sm:$0xf0]   ;;  %v1202_v59 = vpop.permute.xlu1 %1201  }
  0x9f   :  { %1410 = vrot.lane.b32.xlu1 %v1409_v1, %s2439_s10  ;;  %v1438_v3 = vld [vmem:[#allocation0 + $0x2] ss:$8 sm:$0xf]   ;;  %v1416_v4 = vld [vmem:[#allocation0 + $0x4c3] ss:$8 sm:$0xf]  }
  0xa0   :  { %v1440_v5 = vld [vmem:[#allocation0 + $0x2] ss:$8 sm:$0xf0]   ;;  %v1420_v6 = vsel %vm963_vm0, %v1418_v2, %v1416_v4  ;;  %v961_v58 = vld [vmem:[#allocation0] ss:$8 sm:$0xf]  }
  0xa1   :  { %1421 = vrot.lane.b32.xlu0 %v1420_v6, %s2439_s10  ;;  %v1429_v7 = vld [vmem:[#allocation0 + $0x5c3] ss:$8 sm:$0xf0]   ;;  %v1448_v8 = vld [vmem:[#allocation0 + $0x102] ss:$8 sm:$0xf]   ;;  %v1442_v9 = vsel %vm963_vm0, %v1440_v5, %v1438_v3 }
  0xa2   :  { %v1450_v10 = vld [vmem:[#allocation0 + $0x102] ss:$8 sm:$0xf0]   ;;  %v962_v61 = vld [vmem:[#allocation0] ss:$8 sm:$0xf0]  }
  0xa3   :  { %v1459_v11 = vld [vmem:[#allocation0 + $0x202] ss:$8 sm:$0xf]   ;;  %v1452_v15 = vsel %vm963_vm0, %v1450_v10, %v1448_v8  ;;  %v1031_v62 = vld [vmem:[#allocation0 + $0x200] ss:$8 sm:$0xf]   ;;  %v964_v2 = vsel %vm963_vm0, %v962_v61, %v961_v58 }
  0xa4   :  { %v1461_v13 = vld [vmem:[#allocation0 + $0x202] ss:$8 sm:$0xf0]   ;;  %v1033_v3 = vld [vmem:[#allocation0 + $0x200] ss:$8 sm:$0xf0]  }
  0xa5   :  { %v1427_v12 = vld [vmem:[#allocation0 + $0x5c3] ss:$8 sm:$0xf]   ;;  %1443 = vrot.lane.b32.xlu0 %v1442_v9, %s2440_s0  ;;  %v1463_v16 = vsel %vm963_vm0, %v1461_v13, %v1459_v11  ;;  %v1470_v17 = vld [vmem:[#allocation0 + $0x302] ss:$8 sm:$0xf]   ;;  %v1035_v6 = vsel %vm963_vm0, %v1033_v3, %v1031_v62 }
  0xa6   :  { %v1431_v14 = vsel %vm963_vm0, %v1429_v7, %v1427_v12  ;;  %v1472_v18 = vld [vmem:[#allocation0 + $0x302] ss:$8 sm:$0xf0]   ;;  %966 = vst.msk [vmem:[%s3581_s1] sm:$0xff] %vm965_vm1, %v964_v2   ;;  %v1191_v7 = vpop.permute.xlu0 %1190   ;;  %2351 = vst.msk [vmem:[%s3581_s1 + $0x40] sm:$0xff] %vm965_vm1, %v1035_v6  }
  0xa7   :  { %1432 = vrot.lane.b32.xlu1 %v1431_v14, %s2439_s10  ;;  %v1481_v19 = vld [vmem:[#allocation0 + $0x402] ss:$8 sm:$0xf]   ;;  %v1474_v21 = vsel %vm963_vm0, %v1472_v18, %v1470_v17  ;;  %1183 = vst.msk [vmem:[%s3581_s1] sm:$0xff] %vm1182_vm2, %v1181_v51   ;;  %2368 = vst.msk [vmem:[%s3581_s1 + $0x40] sm:$0xff] %vm1182_vm2, %v1202_v59  }
  0xa8   :  { %v1483_v20 = vld [vmem:[#allocation0 + $0x402] ss:$8 sm:$0xf0]   ;;  %v995_v8 = vld [vmem:[#allocation0 + $0x100] ss:$8 sm:$0xf]  }
  0xa9   :  { %1464 = vrot.lane.b32.xlu0 %v1463_v16, %s2440_s0  ;;  %v1485_v22 = vsel %vm963_vm0, %v1483_v20, %v1481_v19  ;;  %v1492_v23 = vld [vmem:[#allocation0 + $0x502] ss:$8 sm:$0xf]   ;;  %v997_v10 = vld [vmem:[#allocation0 + $0x100] ss:$8 sm:$0xf0]   ;;  %v1213_v19 = vpop.permute.xlu1 %1212  }
  0xaa   :  { %v1494_v24 = vld [vmem:[#allocation0 + $0x502] ss:$8 sm:$0xf0]   ;;  %v1067_v11 = vld [vmem:[#allocation0 + $0x300] ss:$8 sm:$0xf]  }
  0xab   :  { %1453 = vrot.lane.b32.xlu1 %v1452_v15, %s2440_s0  ;;  %v1503_v25 = vld [vmem:[#allocation0 + $0x42] ss:$8 sm:$0xf]   ;;  %v1496_v27 = vsel %vm963_vm0, %v1494_v24, %v1492_v23  ;;  %v999_v15 = vsel %vm963_vm0, %v997_v10, %v995_v8  ;;  %v1069_v16 = vld [vmem:[#allocation0 + $0x300] ss:$8 sm:$0xf0]  }
  0xac   :  { %v1505_v26 = vld [vmem:[#allocation0 + $0x42] ss:$8 sm:$0xf0]   ;;  %2347 = vst.msk [vmem:[%s3581_s1 + $0x20] sm:$0xff] %vm965_vm1, %v999_v15   ;;  %v1071_v20 = vsel %vm963_vm0, %v1069_v16, %v1067_v11 }
  0xad   :  { %1486 = vrot.lane.b32.xlu0 %v1485_v22, %s2440_s0  ;;  %v1507_v28 = vsel %vm963_vm0, %v1505_v26, %v1503_v25  ;;  %v1514_v29 = vld [vmem:[#allocation0 + $0x142] ss:$8 sm:$0xf]   ;;  %2367 = vst.msk [vmem:[%s3581_s1 + $0x20] sm:$0xff] %vm1182_vm2, %v1191_v7  }
  0xae   :  { %v1516_v30 = vld [vmem:[#allocation0 + $0x142] ss:$8 sm:$0xf0]   ;;  %2355 = vst.msk [vmem:[%s3581_s1 + $0x60] sm:$0xff] %vm965_vm1, %v1071_v20  }
  0xaf   :  { %1475 = vrot.lane.b32.xlu1 %v1474_v21, %s2440_s0  ;;  %v1525_v31 = vld [vmem:[#allocation0 + $0x242] ss:$8 sm:$0xf]   ;;  %v1518_v33 = vsel %vm963_vm0, %v1516_v30, %v1514_v29  ;;  %v1103_v21 = vld [vmem:[#allocation0 + $0x400] ss:$8 sm:$0xf]  }
  0xb0   :  { %v1527_v32 = vld [vmem:[#allocation0 + $0x242] ss:$8 sm:$0xf0]   ;;  %2369 = vst.msk [vmem:[%s3581_s1 + $0x60] sm:$0xff] %vm1182_vm2, %v1213_v19  }
  0xb1   :  { %1508 = vrot.lane.b32.xlu0 %v1507_v28, %s2440_s0  ;;  %v1529_v34 = vsel %vm963_vm0, %v1527_v32, %v1525_v31  ;;  %v1536_v35 = vld [vmem:[#allocation0 + $0x342] ss:$8 sm:$0xf]   ;;  %v1105_v23 = vld [vmem:[#allocation0 + $0x400] ss:$8 sm:$0xf0]  }
  0xb2   :  { %v1538_v36 = vld [vmem:[#allocation0 + $0x342] ss:$8 sm:$0xf0]   ;;  %v1139_v24 = vld [vmem:[#allocation0 + $0x500] ss:$8 sm:$0xf]   ;;  %v1107_v28 = vsel %vm963_vm0, %v1105_v23, %v1103_v21 }
  0xb3   :  { %1497 = vrot.lane.b32.xlu1 %v1496_v27, %s2440_s0  ;;  %v1547_v37 = vld [vmem:[#allocation0 + $0x442] ss:$8 sm:$0xf]   ;;  %v1540_v39 = vsel %vm963_vm0, %v1538_v36, %v1536_v35  ;;  %v1141_v29 = vld [vmem:[#allocation0 + $0x500] ss:$8 sm:$0xf0]  }
  0xb4   :  { %v1549_v38 = vld [vmem:[#allocation0 + $0x442] ss:$8 sm:$0xf0]   ;;  %2359 = vst.msk [vmem:[%s3581_s1 + $0x80] sm:$0xff] %vm965_vm1, %v1107_v28   ;;  %v1143_v32 = vsel %vm963_vm0, %v1141_v29, %v1139_v24 }
  0xb5   :  { %1530 = vrot.lane.b32.xlu0 %v1529_v34, %s2440_s0  ;;  %v1551_v40 = vsel %vm963_vm0, %v1549_v38, %v1547_v37  ;;  %v1558_v41 = vld [vmem:[#allocation0 + $0x542] ss:$8 sm:$0xf]   ;;  %2363 = vst.msk [vmem:[%s3581_s1 + $0xa0] sm:$0xff] %vm965_vm1, %v1143_v32  }
  0xb6   :  { %v1560_v42 = vld [vmem:[#allocation0 + $0x542] ss:$8 sm:$0xf0]   ;;  %v968_v34 = vld [vmem:[#allocation0 + $0x40] ss:$8 sm:$0xf]  }
  0xb7   :  { %1519 = vrot.lane.b32.xlu1 %v1518_v33, %s2440_s0  ;;  %v1569_v43 = vld [vmem:[#allocation0 + $0x82] ss:$8 sm:$0xf]   ;;  %v1562_v45 = vsel %vm963_vm0, %v1560_v42, %v1558_v41  ;;  %v1224_v33 = vpop.permute.xlu0 %1223   ;;  %v970_v36 = vld [vmem:[#allocation0 + $0x40] ss:$8 sm:$0xf0]  }
  0xb8   :  { %v1571_v44 = vld [vmem:[#allocation0 + $0x82] ss:$8 sm:$0xf0]   ;;  %2370 = vst.msk [vmem:[%s3581_s1 + $0x80] sm:$0xff] %vm1182_vm2, %v1224_v33   ;;  %v972_v41 = vsel %vm963_vm0, %v970_v36, %v968_v34 }
  0xb9   :  { %1552 = vrot.lane.b32.xlu0 %v1551_v40, %s2440_s0  ;;  %v1573_v46 = vsel %vm963_vm0, %v1571_v44, %v1569_v43  ;;  %v1580_v47 = vld [vmem:[#allocation0 + $0x182] ss:$8 sm:$0xf]   ;;  %v1004_v37 = vld [vmem:[#allocation0 + $0x140] ss:$8 sm:$0xf]  }
  0xba   :  { %v1582_v48 = vld [vmem:[#allocation0 + $0x182] ss:$8 sm:$0xf0]   ;;  %v1006_v42 = vld [vmem:[#allocation0 + $0x140] ss:$8 sm:$0xf0]  }
  0xbb   :  { %1541 = vrot.lane.b32.xlu1 %v1540_v39, %s2440_s0  ;;  %v1591_v49 = vld [vmem:[#allocation0 + $0x282] ss:$8 sm:$0xf]   ;;  %v1584_v52 = vsel %vm963_vm0, %v1582_v48, %v1580_v47  ;;  %v1701_v43 = vld [vmem:[#allocation0 + $0x1] ss:$8 sm:$0xf]   ;;  %v1246_v58 = vpop.permute.xlu0 %1245  }
  0xbc   :  { %v1593_v50 = vld [vmem:[#allocation0 + $0x282] ss:$8 sm:$0xf0]   ;;  %v1703_v44 = vld [vmem:[#allocation0 + $0x1] ss:$8 sm:$0xf0]  }
  0xbd   :  { %1574 = vrot.lane.b32.xlu0 %v1573_v46, %s2440_s0  ;;  %v1595_v53 = vsel %vm963_vm0, %v1593_v50, %v1591_v49  ;;  %v1602_v54 = vld [vmem:[#allocation0 + $0x382] ss:$8 sm:$0xf]   ;;  %2344 = vst.msk [vmem:[%s3581_s1 + $0x8] sm:$0xff] %vm965_vm1, %v972_v41   ;;  %v1235_v46 = vpop.permute.xlu1 %1234  }
  0xbe   :  { %v1604_v55 = vld [vmem:[#allocation0 + $0x382] ss:$8 sm:$0xf0]   ;;  %v1040_v47 = vld [vmem:[#allocation0 + $0x240] ss:$8 sm:$0xf]  }
  0xbf   :  { %1563 = vrot.lane.b32.xlu1 %v1562_v45, %s2440_s0  ;;  %v1613_v56 = vld [vmem:[#allocation0 + $0x482] ss:$8 sm:$0xf]   ;;  %v1606_v63 = vsel %vm963_vm0, %v1604_v55, %v1602_v54  ;;  %v1008_v45 = vsel %vm963_vm0, %v1006_v42, %v1004_v37  ;;  %v1711_v48 = vld [vmem:[#allocation0 + $0x101] ss:$8 sm:$0xf]   ;;  %v1268_v21 = vpop.permute.xlu0 %1267  }
  0xc0   :  { %v1615_v57 = vld [vmem:[#allocation0 + $0x482] ss:$8 sm:$0xf0]   ;;  %2348 = vst.msk [vmem:[%s3581_s1 + $0x28] sm:$0xff] %vm965_vm1, %v1008_v45  }
  0xc1   :  { %1596 = vrot.lane.b32.xlu0 %v1595_v53, %s2440_s0  ;;  %v1624_v60 = vld [vmem:[#allocation0 + $0x582] ss:$8 sm:$0xf]   ;;  %v1617_v0 = vsel %vm963_vm0, %v1615_v57, %v1613_v56  ;;  %2371 = vst.msk [vmem:[%s3581_s1 + $0xa0] sm:$0xff] %vm1182_vm2, %v1235_v46   ;;  %2372 = vst.msk [vmem:[%s3581_s1 + $0x8] sm:$0xff] %vm1182_vm2, %v1246_v58   ;;  %v1257_v7 = vpop.permute.xlu1 %1256  }
  0xc2   :  { %v1626_v1 = vld [vmem:[#allocation0 + $0x582] ss:$8 sm:$0xf0]   ;;  %v1042_v49 = vld [vmem:[#allocation0 + $0x240] ss:$8 sm:$0xf0]  }
  0xc3   :  { %1585 = vrot.lane.b32.xlu1 %v1584_v52, %s2440_s0  ;;  %v1635_v4 = vld [vmem:[#allocation0 + $0xc2] ss:$8 sm:$0xf]   ;;  %v1628_v12 = vsel %vm963_vm0, %v1626_v1, %v1624_v60  ;;  %v1076_v50 = vld [vmem:[#allocation0 + $0x340] ss:$8 sm:$0xf]   ;;  %v1705_v52 = vsel %vm963_vm0, %v1703_v44, %v1701_v43  ;;  %v1044_v54 = vsel %vm963_vm0, %v1042_v49, %v1040_v47 }
  0xc4   :  { %v1637_v5 = vld [vmem:[#allocation0 + $0xc2] ss:$8 sm:$0xf0]   ;;  %v1713_v53 = vld [vmem:[#allocation0 + $0x101] ss:$8 sm:$0xf0]  }
  0xc5   :  { %1618 = vrot.lane.b32.xlu0 %v1617_v0, %s2440_s0  ;;  %v1646_v9 = vld [vmem:[#allocation0 + $0x1c2] ss:$8 sm:$0xf]   ;;  %v1639_v13 = vsel %vm963_vm0, %v1637_v5, %v1635_v4  ;;  %v1078_v55 = vld [vmem:[#allocation0 + $0x340] ss:$8 sm:$0xf0]   ;;  %v1715_v0 = vsel %vm963_vm0, %v1713_v53, %v1711_v48  ;;  %v1279_v37 = vpop.permute.xlu1 %1278   ;;  %v1290_v53 = vpop.permute.xlu0 %1289  }
  0xc6   :  { %v1648_v14 = vld [vmem:[#allocation0 + $0x1c2] ss:$8 sm:$0xf0]   ;;  %v1722_v56 = vld [vmem:[#allocation0 + $0x201] ss:$8 sm:$0xf]   ;;  %v1080_v59 = vsel %vm963_vm0, %v1078_v55, %v1076_v50 }
  0xc7   :  { %1607 = vrot.lane.b32.xlu1 %v1606_v63, %s2440_s0  ;;  %v1657_v17 = vld [vmem:[#allocation0 + $0x2c2] ss:$8 sm:$0xf]   ;;  %v1650_v25 = vsel %vm963_vm0, %v1648_v14, %v1646_v9  ;;  %v1724_v57 = vld [vmem:[#allocation0 + $0x201] ss:$8 sm:$0xf0]  }
  0xc8   :  { %v1659_v18 = vld [vmem:[#allocation0 + $0x2c2] ss:$8 sm:$0xf0]   ;;  %2352 = vst.msk [vmem:[%s3581_s1 + $0x48] sm:$0xff] %vm965_vm1, %v1044_v54   ;;  %2356 = vst.msk [vmem:[%s3581_s1 + $0x68] sm:$0xff] %vm965_vm1, %v1080_v59   ;;  %v1726_v1 = vsel %vm963_vm0, %v1724_v57, %v1722_v56 }
  0xc9   :  { %1640 = vrot.lane.b32.xlu0 %v1639_v13, %s2440_s0  ;;  %v1668_v22 = vld [vmem:[#allocation0 + $0x3c2] ss:$8 sm:$0xf]   ;;  %v1661_v26 = vsel %vm963_vm0, %v1659_v18, %v1657_v17  ;;  %v1112_v60 = vld [vmem:[#allocation0 + $0x440] ss:$8 sm:$0xf]  }
  0xca   :  { %v1670_v27 = vld [vmem:[#allocation0 + $0x3c2] ss:$8 sm:$0xf0]   ;;  %v1733_v61 = vld [vmem:[#allocation0 + $0x301] ss:$8 sm:$0xf]  }
  0xcb   :  { %1629 = vrot.lane.b32.xlu1 %v1628_v12, %s2440_s0  ;;  %v1679_v30 = vld [vmem:[#allocation0 + $0x4c2] ss:$8 sm:$0xf]   ;;  %v1672_v38 = vsel %vm963_vm0, %v1670_v27, %v1668_v22  ;;  %v1114_v62 = vld [vmem:[#allocation0 + $0x440] ss:$8 sm:$0xf0]  }
  0xcc   :  { %v1681_v31 = vld [vmem:[#allocation0 + $0x4c2] ss:$8 sm:$0xf0]   ;;  %v1148_v63 = vld [vmem:[#allocation0 + $0x540] ss:$8 sm:$0xf]   ;;  %v1116_v3 = vsel %vm963_vm0, %v1114_v62, %v1112_v60 }
  0xcd   :  { %1662 = vrot.lane.b32.xlu0 %v1661_v26, %s2440_s0  ;;  %v1690_v35 = vld [vmem:[#allocation0 + $0x5c2] ss:$8 sm:$0xf]   ;;  %v1683_v39 = vsel %vm963_vm0, %v1681_v31, %v1679_v30  ;;  %v1735_v2 = vld [vmem:[#allocation0 + $0x301] ss:$8 sm:$0xf0]  }
  0xce   :  { %v1692_v40 = vld [vmem:[#allocation0 + $0x5c2] ss:$8 sm:$0xf0]   ;;  %v1150_v4 = vld [vmem:[#allocation0 + $0x540] ss:$8 sm:$0xf0]   ;;  %v1737_v13 = vsel %vm963_vm0, %v1735_v2, %v1733_v61 }
  0xcf   :  { %1651 = vrot.lane.b32.xlu1 %v1650_v25, %s2440_s0  ;;  %v1694_v51 = vsel %vm963_vm0, %v1692_v40, %v1690_v35  ;;  %v1744_v5 = vld [vmem:[#allocation0 + $0x401] ss:$8 sm:$0xf]   ;;  %2360 = vst.msk [vmem:[%s3581_s1 + $0x88] sm:$0xff] %vm965_vm1, %v1116_v3   ;;  %v1152_v8 = vsel %vm963_vm0, %v1150_v4, %v1148_v63 }
  0xd0   :  { %v1746_v6 = vld [vmem:[#allocation0 + $0x401] ss:$8 sm:$0xf0]   ;;  %2373 = vst.msk [vmem:[%s3581_s1 + $0x28] sm:$0xff] %vm1182_vm2, %v1257_v7   ;;  %2374 = vst.msk [vmem:[%s3581_s1 + $0x48] sm:$0xff] %vm1182_vm2, %v1268_v21   ;;  %v1301_v7 = vpop.permute.xlu1 %1300  }
  0xd1   :  { %1684 = vrot.lane.b32.xlu0 %v1683_v39, %s2440_s0  ;;  %2364 = vst.msk [vmem:[%s3581_s1 + $0xa8] sm:$0xff] %vm965_vm1, %v1152_v8   ;;  %v977_v9 = vld [vmem:[#allocation0 + $0x80] ss:$8 sm:$0xf]   ;;  %v1748_v14 = vsel %vm963_vm0, %v1746_v6, %v1744_v5 }
  0xd2   :  { %v1755_v10 = vld [vmem:[#allocation0 + $0x501] ss:$8 sm:$0xf]   ;;  %v979_v11 = vld [vmem:[#allocation0 + $0x80] ss:$8 sm:$0xf0]  }
  0xd3   :  { %1673 = vrot.lane.b32.xlu1 %v1672_v38, %s2440_s0  ;;  %v1013_v12 = vld [vmem:[#allocation0 + $0x180] ss:$8 sm:$0xf]   ;;  %v1757_v15 = vld [vmem:[#allocation0 + $0x501] ss:$8 sm:$0xf0]   ;;  %v981_v16 = vsel %vm963_vm0, %v979_v11, %v977_v9 }
  0xd4   :  { %v1015_v17 = vld [vmem:[#allocation0 + $0x180] ss:$8 sm:$0xf0]   ;;  %v1766_v18 = vld [vmem:[#allocation0 + $0x41] ss:$8 sm:$0xf]   ;;  %v1759_v29 = vsel %vm963_vm0, %v1757_v15, %v1755_v10 }
  0xd5   :  { %v1768_v19 = vld [vmem:[#allocation0 + $0x41] ss:$8 sm:$0xf0]   ;;  %2345 = vst.msk [vmem:[%s3581_s1 + $0x10] sm:$0xff] %vm965_vm1, %v981_v16   ;;  %v1017_v20 = vsel %vm963_vm0, %v1015_v17, %v1013_v12  ;;  %v1312_v15 = vpop.permute.xlu0 %1311  }
  0xd6   :  { %2349 = vst.msk [vmem:[%s3581_s1 + $0x30] sm:$0xff] %vm965_vm1, %v1017_v20   ;;  %v1049_v22 = vld [vmem:[#allocation0 + $0x280] ss:$8 sm:$0xf]   ;;  %v1770_v30 = vsel %vm963_vm0, %v1768_v19, %v1766_v18 }
  0xd7   :  { %1695 = vrot.lane.b32.xlu1 %v1694_v51, %s2440_s0  ;;  %s2441_s0 = smov 32   ;;  %v1777_v23 = vld [vmem:[#allocation0 + $0x141] ss:$8 sm:$0xf]   ;;  %2375 = vst.msk [vmem:[%s3581_s1 + $0x68] sm:$0xff] %vm1182_vm2, %v1279_v37   ;;  %2376 = vst.msk [vmem:[%s3581_s1 + $0x88] sm:$0xff] %vm1182_vm2, %v1290_v53  }
  0xd8   :  { %1706 = vrot.lane.b32.xlu0 %v1705_v52, %s2441_s0  ;;  %v1779_v24 = vld [vmem:[#allocation0 + $0x141] ss:$8 sm:$0xf0]   ;;  %v1051_v27 = vld [vmem:[#allocation0 + $0x280] ss:$8 sm:$0xf0]  }
  0xd9   :  { %v1788_v25 = vld [vmem:[#allocation0 + $0x241] ss:$8 sm:$0xf]   ;;  %v1085_v28 = vld [vmem:[#allocation0 + $0x380] ss:$8 sm:$0xf]   ;;  %v1053_v31 = vsel %vm963_vm0, %v1051_v27, %v1049_v22  ;;  %v1781_v48 = vsel %vm963_vm0, %v1779_v24, %v1777_v23 }
  0xda   :  { %v1790_v26 = vld [vmem:[#allocation0 + $0x241] ss:$8 sm:$0xf0]   ;;  %v1087_v32 = vld [vmem:[#allocation0 + $0x380] ss:$8 sm:$0xf0]  }
  0xdb   :  { %1716 = vrot.lane.b32.xlu1 %v1715_v0, %s2441_s0  ;;  %v1121_v33 = vld [vmem:[#allocation0 + $0x480] ss:$8 sm:$0xf]   ;;  %2353 = vst.msk [vmem:[%s3581_s1 + $0x50] sm:$0xff] %vm965_vm1, %v1053_v31   ;;  %v1089_v34 = vsel %vm963_vm0, %v1087_v32, %v1085_v28  ;;  %v1792_v49 = vsel %vm963_vm0, %v1790_v26, %v1788_v25 }
  0xdc   :  { %1727 = vrot.lane.b32.xlu0 %v1726_v1, %s2441_s0  ;;  %v1123_v35 = vld [vmem:[#allocation0 + $0x480] ss:$8 sm:$0xf0]   ;;  %2357 = vst.msk [vmem:[%s3581_s1 + $0x70] sm:$0xff] %vm965_vm1, %v1089_v34   ;;  %v1323_v22 = vpop.permute.xlu1 %1322  }
  0xdd   :  { %v1157_v36 = vld [vmem:[#allocation0 + $0x580] ss:$8 sm:$0xf]   ;;  %v1125_v38 = vsel %vm963_vm0, %v1123_v35, %v1121_v33  ;;  %v1799_v41 = vld [vmem:[#allocation0 + $0x341] ss:$8 sm:$0xf]  }
  0xde   :  { %v1159_v39 = vld [vmem:[#allocation0 + $0x580] ss:$8 sm:$0xf0]   ;;  %v1801_v42 = vld [vmem:[#allocation0 + $0x341] ss:$8 sm:$0xf0]  }
  0xdf   :  { %1738 = vrot.lane.b32.xlu1 %v1737_v13, %s2441_s0  ;;  %v986_v40 = vld [vmem:[#allocation0 + $0xc0] ss:$8 sm:$0xf]   ;;  %v1810_v43 = vld [vmem:[#allocation0 + $0x441] ss:$8 sm:$0xf]   ;;  %v1161_v45 = vsel %vm963_vm0, %v1159_v39, %v1157_v36  ;;  %v1803_v0 = vsel %vm963_vm0, %v1801_v42, %v1799_v41 }
  0xe0   :  { %1749 = vrot.lane.b32.xlu0 %v1748_v14, %s2441_s0  ;;  %v1812_v44 = vld [vmem:[#allocation0 + $0x441] ss:$8 sm:$0xf0]   ;;  %2361 = vst.msk [vmem:[%s3581_s1 + $0x90] sm:$0xff] %vm965_vm1, %v1125_v38   ;;  %2365 = vst.msk [vmem:[%s3581_s1 + $0xb0] sm:$0xff] %vm965_vm1, %v1161_v45  }
  0xe1   :  { %v988_v46 = vld [vmem:[#allocation0 + $0xc0] ss:$8 sm:$0xf0]   ;;  %v1821_v60 = vld [vmem:[#allocation0 + $0x541] ss:$8 sm:$0xf]   ;;  %v1814_v1 = vsel %vm963_vm0, %v1812_v44, %v1810_v43 }
  0xe2   :  { %v1022_v47 = vld [vmem:[#allocation0 + $0x1c0] ss:$8 sm:$0xf]   ;;  %v990_v50 = vsel %vm963_vm0, %v988_v46, %v986_v40  ;;  %v1823_v2 = vld [vmem:[#allocation0 + $0x541] ss:$8 sm:$0xf0]  }
  0xe3   :  { %1760 = vrot.lane.b32.xlu1 %v1759_v29, %s2441_s0  ;;  %v1024_v51 = vld [vmem:[#allocation0 + $0x1c0] ss:$8 sm:$0xf0]   ;;  %2346 = vst.msk [vmem:[%s3581_s1 + $0x18] sm:$0xff] %vm965_vm1, %v990_v50   ;;  %v1825_v9 = vsel %vm963_vm0, %v1823_v2, %v1821_v60  ;;  %v1334_v29 = vpop.permute.xlu0 %1333  }
  0xe4   :  { %1771 = vrot.lane.b32.xlu0 %v1770_v30, %s2441_s0  ;;  %v1058_v52 = vld [vmem:[#allocation0 + $0x2c0] ss:$8 sm:$0xf]   ;;  %v1026_v54 = vsel %vm963_vm0, %v1024_v51, %v1022_v47  ;;  %v1832_v5 = vld [vmem:[#allocation0 + $0x81] ss:$8 sm:$0xf]  }
  0xe5   :  { %v1060_v55 = vld [vmem:[#allocation0 + $0x2c0] ss:$8 sm:$0xf0]   ;;  %2350 = vst.msk [vmem:[%s3581_s1 + $0x38] sm:$0xff] %vm965_vm1, %v1026_v54  }
  0xe6   :  { %v1094_v56 = vld [vmem:[#allocation0 + $0x3c0] ss:$8 sm:$0xf]   ;;  %v1062_v57 = vsel %vm963_vm0, %v1060_v55, %v1058_v52  ;;  %v1834_v6 = vld [vmem:[#allocation0 + $0x81] ss:$8 sm:$0xf0]  }
  0xe7   :  { %v1096_v58 = vld [vmem:[#allocation0 + $0x3c0] ss:$8 sm:$0xf0]   ;;  %1782 = vrot.lane.b32.xlu1 %v1781_v48, %s2441_s0  ;;  %2354 = vst.msk [vmem:[%s3581_s1 + $0x58] sm:$0xff] %vm965_vm1, %v1062_v57   ;;  %v1836_v10 = vsel %vm963_vm0, %v1834_v6, %v1832_v5  ;;  %v1345_v36 = vpop.permute.xlu1 %1344  }
  0xe8   :  { %v1130_v59 = vld [vmem:[#allocation0 + $0x4c0] ss:$8 sm:$0xf]   ;;  %1793 = vrot.lane.b32.xlu0 %v1792_v49, %s2441_s0  ;;  %v1098_v61 = vsel %vm963_vm0, %v1096_v58, %v1094_v56  ;;  %2377 = vst.msk [vmem:[%s3581_s1 + $0xa8] sm:$0xff] %vm1182_vm2, %v1301_v7   ;;  %2378 = vst.msk [vmem:[%s3581_s1 + $0x10] sm:$0xff] %vm1182_vm2, %v1312_v15  }
  0xe9   :  { %v1132_v62 = vld [vmem:[#allocation0 + $0x4c0] ss:$8 sm:$0xf0]   ;;  %2358 = vst.msk [vmem:[%s3581_s1 + $0x78] sm:$0xff] %vm965_vm1, %v1098_v61  }
  0xea   :  { %v1166_v63 = vld [vmem:[#allocation0 + $0x5c0] ss:$8 sm:$0xf]   ;;  %v1134_v3 = vsel %vm963_vm0, %v1132_v62, %v1130_v59  ;;  %v1843_v11 = vld [vmem:[#allocation0 + $0x181] ss:$8 sm:$0xf]  }
  0xeb   :  { %v1168_v4 = vld [vmem:[#allocation0 + $0x5c0] ss:$8 sm:$0xf0]   ;;  %2362 = vst.msk [vmem:[%s3581_s1 + $0x98] sm:$0xff] %vm965_vm1, %v1134_v3   ;;  %1804 = vrot.lane.b32.xlu1 %v1803_v0, %s2441_s0 }
  0xec   :  { %v1170_v8 = vsel %vm963_vm0, %v1168_v4, %v1166_v63  ;;  %1815 = vrot.lane.b32.xlu0 %v1814_v1, %s2441_s0  ;;  %v1845_v12 = vld [vmem:[#allocation0 + $0x181] ss:$8 sm:$0xf0]   ;;  %2379 = vst.msk [vmem:[%s3581_s1 + $0x30] sm:$0xff] %vm1182_vm2, %v1323_v22   ;;  %2380 = vst.msk [vmem:[%s3581_s1 + $0x50] sm:$0xff] %vm1182_vm2, %v1334_v29  }
  0xed   :  { %2366 = vst.msk [vmem:[%s3581_s1 + $0xb8] sm:$0xff] %vm965_vm1, %v1170_v8   ;;  %v1854_v13 = vld [vmem:[#allocation0 + $0x281] ss:$8 sm:$0xf]   ;;  %v1847_v16 = vsel %vm963_vm0, %v1845_v12, %v1843_v11 }
  0xee   :  { %v1856_v14 = vld [vmem:[#allocation0 + $0x281] ss:$8 sm:$0xf0]   ;;  %2381 = vst.msk [vmem:[%s3581_s1 + $0x70] sm:$0xff] %vm1182_vm2, %v1345_v36  }
  0xef   :  { %1826 = vrot.lane.b32.xlu1 %v1825_v9, %s2441_s0  ;;  %v1858_v17 = vsel %vm963_vm0, %v1856_v14, %v1854_v13  ;;  %v1865_v18 = vld [vmem:[#allocation0 + $0x381] ss:$8 sm:$0xf]  }
  0xf0   :  { %1837 = vrot.lane.b32.xlu0 %v1836_v10, %s2441_s0  ;;  %v1867_v19 = vld [vmem:[#allocation0 + $0x381] ss:$8 sm:$0xf0]   ;;  %v1356_v43 = vpop.permute.xlu0 %1355  }
  0xf1   :  { %v1876_v20 = vld [vmem:[#allocation0 + $0x481] ss:$8 sm:$0xf]   ;;  %v1869_v23 = vsel %vm963_vm0, %v1867_v19, %v1865_v18  ;;  %2382 = vst.msk [vmem:[%s3581_s1 + $0x90] sm:$0xff] %vm1182_vm2, %v1356_v43  }
  0xf2   :  { %v1878_v21 = vld [vmem:[#allocation0 + $0x481] ss:$8 sm:$0xf0]  }
  0xf3   :  { %1848 = vrot.lane.b32.xlu1 %v1847_v16, %s2441_s0  ;;  %v1880_v24 = vsel %vm963_vm0, %v1878_v21, %v1876_v20  ;;  %v1887_v25 = vld [vmem:[#allocation0 + $0x581] ss:$8 sm:$0xf]  }
  0xf4   :  { %1859 = vrot.lane.b32.xlu0 %v1858_v17, %s2441_s0  ;;  %v1889_v26 = vld [vmem:[#allocation0 + $0x581] ss:$8 sm:$0xf0]  }
  0xf5   :  { %v1898_v27 = vld [vmem:[#allocation0 + $0xc1] ss:$8 sm:$0xf]   ;;  %v1891_v30 = vsel %vm963_vm0, %v1889_v26, %v1887_v25 }
  0xf6   :  { %v1900_v28 = vld [vmem:[#allocation0 + $0xc1] ss:$8 sm:$0xf0]   ;;  %v1367_v48 = vpop.permute.xlu1 %1366  }
  0xf7   :  { %1870 = vrot.lane.b32.xlu1 %v1869_v23, %s2441_s0  ;;  %v1902_v31 = vsel %vm963_vm0, %v1900_v28, %v1898_v27  ;;  %v1909_v32 = vld [vmem:[#allocation0 + $0x1c1] ss:$8 sm:$0xf]   ;;  %2383 = vst.msk [vmem:[%s3581_s1 + $0xb0] sm:$0xff] %vm1182_vm2, %v1367_v48  }
  0xf8   :  { %1881 = vrot.lane.b32.xlu0 %v1880_v24, %s2441_s0  ;;  %v1911_v33 = vld [vmem:[#allocation0 + $0x1c1] ss:$8 sm:$0xf0]  }
  0xf9   :  { %v1920_v34 = vld [vmem:[#allocation0 + $0x2c1] ss:$8 sm:$0xf]   ;;  %v1913_v37 = vsel %vm963_vm0, %v1911_v33, %v1909_v32 }
  0xfa   :  { %v1922_v35 = vld [vmem:[#allocation0 + $0x2c1] ss:$8 sm:$0xf0]  }
  0xfb   :  { %1892 = vrot.lane.b32.xlu1 %v1891_v30, %s2441_s0  ;;  %v1924_v38 = vsel %vm963_vm0, %v1922_v35, %v1920_v34  ;;  %v1931_v39 = vld [vmem:[#allocation0 + $0x3c1] ss:$8 sm:$0xf]   ;;  %v1378_v50 = vpop.permute.xlu0 %1377  }
  0xfc   :  { %1903 = vrot.lane.b32.xlu0 %v1902_v31, %s2441_s0  ;;  %v1933_v40 = vld [vmem:[#allocation0 + $0x3c1] ss:$8 sm:$0xf0]   ;;  %2384 = vst.msk [vmem:[%s3581_s1 + $0x18] sm:$0xff] %vm1182_vm2, %v1378_v50  }
  0xfd   :  { %v1942_v41 = vld [vmem:[#allocation0 + $0x4c1] ss:$8 sm:$0xf]   ;;  %v1935_v44 = vsel %vm963_vm0, %v1933_v40, %v1931_v39 }
  0xfe   :  { %v1944_v42 = vld [vmem:[#allocation0 + $0x4c1] ss:$8 sm:$0xf0]  }
  0xff   :  { %1914 = vrot.lane.b32.xlu1 %v1913_v37, %s2441_s0  ;;  %v1946_v45 = vsel %vm963_vm0, %v1944_v42, %v1942_v41  ;;  %v1953_v46 = vld [vmem:[#allocation0 + $0x5c1] ss:$8 sm:$0xf]  }
 0x100   :  { %1925 = vrot.lane.b32.xlu0 %v1924_v38, %s2441_s0  ;;  %v1955_v47 = vld [vmem:[#allocation0 + $0x5c1] ss:$8 sm:$0xf0]  }
 0x101   :  { %v1957_v49 = vsel %vm963_vm0, %v1955_v47, %v1953_v46  ;;  %v1389_v51 = vpop.permute.xlu1 %1388  }
 0x102   :  { %2385 = vst.msk [vmem:[%s3581_s1 + $0x38] sm:$0xff] %vm1182_vm2, %v1389_v51  }
 0x103   :  { %1936 = vrot.lane.b32.xlu1 %v1935_v44, %s2441_s0 }
 0x104   :  { %1947 = vrot.lane.b32.xlu0 %v1946_v45, %s2441_s0 }
 0x107   :  { %1958 = vrot.lane.b32.xlu1 %v1957_v49, %s2441_s0 }
 0x10a   :  { %v1400_v52 = vpop.permute.xlu0 %1399  }
 0x10b   :  { %2386 = vst.msk [vmem:[%s3581_s1 + $0x58] sm:$0xff] %vm1182_vm2, %v1400_v52  }
 0x111   :  { %v1411_v53 = vpop.permute.xlu1 %1410  }
 0x112   :  { %2387 = vst.msk [vmem:[%s3581_s1 + $0x78] sm:$0xff] %vm1182_vm2, %v1411_v53  }
 0x113   :  { %v1422_v54 = vpop.permute.xlu0 %1421  }
 0x114   :  { %2388 = vst.msk [vmem:[%s3581_s1 + $0x98] sm:$0xff] %vm1182_vm2, %v1422_v54  }
 0x117   :  { %v1444_v56 = vpop.permute.xlu0 %1443  }
 0x118   :  { %1446 = vst.msk [vmem:[%s3581_s1] sm:$0xff] %vm1445_vm3, %v1444_v56  }
 0x119   :  { %v1433_v55 = vpop.permute.xlu1 %1432  }
 0x11a   :  { %2389 = vst.msk [vmem:[%s3581_s1 + $0xb8] sm:$0xff] %vm1182_vm2, %v1433_v55  }
 0x11b   :  { %v1465_v58 = vpop.permute.xlu0 %1464  }
 0x11c   :  { %2391 = vst.msk [vmem:[%s3581_s1 + $0x40] sm:$0xff] %vm1445_vm3, %v1465_v58  }
 0x11d   :  { %v1454_v57 = vpop.permute.xlu1 %1453  }
 0x11e   :  { %2390 = vst.msk [vmem:[%s3581_s1 + $0x20] sm:$0xff] %vm1445_vm3, %v1454_v57  }
 0x11f   :  { %v1487_v60 = vpop.permute.xlu0 %1486  }
 0x120   :  { %2393 = vst.msk [vmem:[%s3581_s1 + $0x80] sm:$0xff] %vm1445_vm3, %v1487_v60  }
 0x121   :  { %v1476_v59 = vpop.permute.xlu1 %1475  }
 0x122   :  { %2392 = vst.msk [vmem:[%s3581_s1 + $0x60] sm:$0xff] %vm1445_vm3, %v1476_v59  }
 0x123   :  { %v1509_v62 = vpop.permute.xlu0 %1508  }
 0x124   :  { %2395 = vst.msk [vmem:[%s3581_s1 + $0x8] sm:$0xff] %vm1445_vm3, %v1509_v62  }
 0x125   :  { %v1498_v61 = vpop.permute.xlu1 %1497  }
 0x126   :  { %2394 = vst.msk [vmem:[%s3581_s1 + $0xa0] sm:$0xff] %vm1445_vm3, %v1498_v61  }
 0x127   :  { %v1531_v0 = vpop.permute.xlu0 %1530  }
 0x128   :  { %2397 = vst.msk [vmem:[%s3581_s1 + $0x48] sm:$0xff] %vm1445_vm3, %v1531_v0  }
 0x129   :  { %v1520_v63 = vpop.permute.xlu1 %1519  }
 0x12a   :  { %2396 = vst.msk [vmem:[%s3581_s1 + $0x28] sm:$0xff] %vm1445_vm3, %v1520_v63  }
 0x12b   :  { %v1553_v2 = vpop.permute.xlu0 %1552  }
 0x12c   :  { %2399 = vst.msk [vmem:[%s3581_s1 + $0x88] sm:$0xff] %vm1445_vm3, %v1553_v2  }
 0x12d   :  { %v1542_v1 = vpop.permute.xlu1 %1541  }
 0x12e   :  { %2398 = vst.msk [vmem:[%s3581_s1 + $0x68] sm:$0xff] %vm1445_vm3, %v1542_v1  }
 0x12f   :  { %v1575_v4 = vpop.permute.xlu0 %1574  }
 0x130   :  { %2401 = vst.msk [vmem:[%s3581_s1 + $0x10] sm:$0xff] %vm1445_vm3, %v1575_v4  }
 0x131   :  { %v1564_v3 = vpop.permute.xlu1 %1563  }
 0x132   :  { %2400 = vst.msk [vmem:[%s3581_s1 + $0xa8] sm:$0xff] %vm1445_vm3, %v1564_v3  }
 0x133   :  { %v1597_v6 = vpop.permute.xlu0 %1596  }
 0x134   :  { %2403 = vst.msk [vmem:[%s3581_s1 + $0x50] sm:$0xff] %vm1445_vm3, %v1597_v6  }
 0x135   :  { %v1586_v5 = vpop.permute.xlu1 %1585  }
 0x136   :  { %2402 = vst.msk [vmem:[%s3581_s1 + $0x30] sm:$0xff] %vm1445_vm3, %v1586_v5  }
 0x137   :  { %v1619_v8 = vpop.permute.xlu0 %1618  }
 0x138   :  { %2405 = vst.msk [vmem:[%s3581_s1 + $0x90] sm:$0xff] %vm1445_vm3, %v1619_v8  }
 0x139   :  { %v1608_v7 = vpop.permute.xlu1 %1607  }
 0x13a   :  { %2404 = vst.msk [vmem:[%s3581_s1 + $0x70] sm:$0xff] %vm1445_vm3, %v1608_v7  }
 0x13b   :  { %v1641_v10 = vpop.permute.xlu0 %1640  }
 0x13c   :  { %2407 = vst.msk [vmem:[%s3581_s1 + $0x18] sm:$0xff] %vm1445_vm3, %v1641_v10  }
 0x13d   :  { %v1630_v9 = vpop.permute.xlu1 %1629  }
 0x13e   :  { %2406 = vst.msk [vmem:[%s3581_s1 + $0xb0] sm:$0xff] %vm1445_vm3, %v1630_v9  }
 0x13f   :  { %v1663_v12 = vpop.permute.xlu0 %1662  }
 0x140   :  { %2409 = vst.msk [vmem:[%s3581_s1 + $0x58] sm:$0xff] %vm1445_vm3, %v1663_v12  }
 0x141   :  { %v1652_v11 = vpop.permute.xlu1 %1651  }
 0x142   :  { %2408 = vst.msk [vmem:[%s3581_s1 + $0x38] sm:$0xff] %vm1445_vm3, %v1652_v11  }
 0x143   :  { %v1685_v14 = vpop.permute.xlu0 %1684  }
 0x144   :  { %2411 = vst.msk [vmem:[%s3581_s1 + $0x98] sm:$0xff] %vm1445_vm3, %v1685_v14  }
 0x145   :  { %v1674_v13 = vpop.permute.xlu1 %1673  }
 0x146   :  { %2410 = vst.msk [vmem:[%s3581_s1 + $0x78] sm:$0xff] %vm1445_vm3, %v1674_v13  }
 0x149   :  { %v1696_v15 = vpop.permute.xlu1 %1695  }
 0x14a   :  { %v1707_v16 = vpop.permute.xlu0 %1706   ;;  %2412 = vst.msk [vmem:[%s3581_s1 + $0xb8] sm:$0xff] %vm1445_vm3, %v1696_v15  }
 0x14b   :  { %1709 = vst.msk [vmem:[%s3581_s1] sm:$0xff] %vm1708_vm4, %v1707_v16  }
 0x14d   :  { %v1717_v17 = vpop.permute.xlu1 %1716  }
 0x14e   :  { %v1728_v18 = vpop.permute.xlu0 %1727   ;;  %2413 = vst.msk [vmem:[%s3581_s1 + $0x20] sm:$0xff] %vm1708_vm4, %v1717_v17  }
 0x14f   :  { %2414 = vst.msk [vmem:[%s3581_s1 + $0x40] sm:$0xff] %vm1708_vm4, %v1728_v18  }
 0x151   :  { %v1739_v19 = vpop.permute.xlu1 %1738  }
 0x152   :  { %v1750_v20 = vpop.permute.xlu0 %1749   ;;  %2415 = vst.msk [vmem:[%s3581_s1 + $0x60] sm:$0xff] %vm1708_vm4, %v1739_v19  }
 0x153   :  { %2416 = vst.msk [vmem:[%s3581_s1 + $0x80] sm:$0xff] %vm1708_vm4, %v1750_v20  }
 0x155   :  { %v1761_v21 = vpop.permute.xlu1 %1760  }
 0x156   :  { %v1772_v22 = vpop.permute.xlu0 %1771   ;;  %2417 = vst.msk [vmem:[%s3581_s1 + $0xa0] sm:$0xff] %vm1708_vm4, %v1761_v21  }
 0x157   :  { %2418 = vst.msk [vmem:[%s3581_s1 + $0x8] sm:$0xff] %vm1708_vm4, %v1772_v22  }
 0x159   :  { %v1783_v23 = vpop.permute.xlu1 %1782  }
 0x15a   :  { %v1794_v24 = vpop.permute.xlu0 %1793   ;;  %2419 = vst.msk [vmem:[%s3581_s1 + $0x28] sm:$0xff] %vm1708_vm4, %v1783_v23  }
 0x15b   :  { %2420 = vst.msk [vmem:[%s3581_s1 + $0x48] sm:$0xff] %vm1708_vm4, %v1794_v24  }
 0x15d   :  { %v1805_v25 = vpop.permute.xlu1 %1804  }
 0x15e   :  { %v1816_v26 = vpop.permute.xlu0 %1815   ;;  %2421 = vst.msk [vmem:[%s3581_s1 + $0x68] sm:$0xff] %vm1708_vm4, %v1805_v25  }
 0x15f   :  { %2422 = vst.msk [vmem:[%s3581_s1 + $0x88] sm:$0xff] %vm1708_vm4, %v1816_v26  }
 0x161   :  { %v1827_v27 = vpop.permute.xlu1 %1826  }
 0x162   :  { %v1838_v28 = vpop.permute.xlu0 %1837   ;;  %2423 = vst.msk [vmem:[%s3581_s1 + $0xa8] sm:$0xff] %vm1708_vm4, %v1827_v27  }
 0x163   :  { %2424 = vst.msk [vmem:[%s3581_s1 + $0x10] sm:$0xff] %vm1708_vm4, %v1838_v28  }
 0x165   :  { %v1849_v29 = vpop.permute.xlu1 %1848  }
 0x166   :  { %v1860_v30 = vpop.permute.xlu0 %1859   ;;  %2425 = vst.msk [vmem:[%s3581_s1 + $0x30] sm:$0xff] %vm1708_vm4, %v1849_v29  }
 0x167   :  { %2426 = vst.msk [vmem:[%s3581_s1 + $0x50] sm:$0xff] %vm1708_vm4, %v1860_v30  }
 0x169   :  { %v1871_v31 = vpop.permute.xlu1 %1870  }
 0x16a   :  { %v1882_v32 = vpop.permute.xlu0 %1881   ;;  %2427 = vst.msk [vmem:[%s3581_s1 + $0x70] sm:$0xff] %vm1708_vm4, %v1871_v31  }
 0x16b   :  { %2428 = vst.msk [vmem:[%s3581_s1 + $0x90] sm:$0xff] %vm1708_vm4, %v1882_v32  }
 0x16d   :  { %v1893_v33 = vpop.permute.xlu1 %1892  }
 0x16e   :  { %v1904_v34 = vpop.permute.xlu0 %1903   ;;  %2429 = vst.msk [vmem:[%s3581_s1 + $0xb0] sm:$0xff] %vm1708_vm4, %v1893_v33  }
 0x16f   :  { %2430 = vst.msk [vmem:[%s3581_s1 + $0x18] sm:$0xff] %vm1708_vm4, %v1904_v34  }
 0x171   :  { %v1915_v35 = vpop.permute.xlu1 %1914  }
 0x172   :  { %v1926_v36 = vpop.permute.xlu0 %1925   ;;  %2431 = vst.msk [vmem:[%s3581_s1 + $0x38] sm:$0xff] %vm1708_vm4, %v1915_v35  }
 0x173   :  { %2432 = vst.msk [vmem:[%s3581_s1 + $0x58] sm:$0xff] %vm1708_vm4, %v1926_v36  }
 0x175   :  { %v1937_v37 = vpop.permute.xlu1 %1936  }
 0x176   :  { %v1948_v38 = vpop.permute.xlu0 %1947   ;;  %2433 = vst.msk [vmem:[%s3581_s1 + $0x78] sm:$0xff] %vm1708_vm4, %v1937_v37  }
 0x177   :  { %2434 = vst.msk [vmem:[%s3581_s1 + $0x98] sm:$0xff] %vm1708_vm4, %v1948_v38  }
 0x179   :  { %v1959_v39 = vpop.permute.xlu1 %1958  }
 0x17a   :  { %2435 = vst.msk [vmem:[%s3581_s1 + $0xb8] sm:$0xff] %vm1708_vm4, %v1959_v39  }

// kernel: tile.21
= control target key start
LH: loop header
LB: loop body
LE: loop exit
PB: predicated region body
PF: predicated region fallthrough
CT: control target
= control target key end

     0   :  { %s1396_s0 = inlined_call_operand.vmem [shape: f32[32,32], index: 0, kind: input, shape index: {}]   ;;  %s1397_s1 = inlined_call_operand.vmem [shape: f32[6,32,4,32], index: 1, kind: output, shape index: {}]  }
   0x1   :  { %v4_v0 = vld [vmem:[%s1396_s0] ss:$0 sm:$0xff]  ;;  %v497_v1 = vld [vmem:[%s1396_s0 + $0x1] ss:$0 sm:$0xff]  ;;  %v504_v2 = vld [vmem:[%s1396_s0 + $0x2] ss:$0 sm:$0xff] }
   0x2   :  { %5 = vst [vmem:[%s1397_s1] sm:$0xf] %v4_v0  ;;  %492 = vst [vmem:[%s1397_s1 + $0x80] sm:$0xf] %v4_v0  ;;  %v511_v3 = vld [vmem:[%s1396_s0 + $0x3] ss:$0 sm:$0xff] }
   0x3   :  { %493 = vst [vmem:[%s1397_s1 + $0x100] sm:$0xf] %v4_v0  ;;  %494 = vst [vmem:[%s1397_s1 + $0x180] sm:$0xf] %v4_v0  ;;  %v518_v4 = vld [vmem:[%s1396_s0 + $0x4] ss:$0 sm:$0xff] }
   0x4   :  { %495 = vst [vmem:[%s1397_s1 + $0x200] sm:$0xf] %v4_v0  ;;  %496 = vst [vmem:[%s1397_s1 + $0x280] sm:$0xf] %v4_v0  ;;  %v525_v5 = vld [vmem:[%s1396_s0 + $0x5] ss:$0 sm:$0xff] }
   0x5   :  { %498 = vst [vmem:[%s1397_s1 + $0x4] sm:$0xf] %v497_v1  ;;  %499 = vst [vmem:[%s1397_s1 + $0x84] sm:$0xf] %v497_v1  ;;  %v532_v6 = vld [vmem:[%s1396_s0 + $0x6] ss:$0 sm:$0xff] }
   0x6   :  { %500 = vst [vmem:[%s1397_s1 + $0x104] sm:$0xf] %v497_v1  ;;  %501 = vst [vmem:[%s1397_s1 + $0x184] sm:$0xf] %v497_v1  ;;  %v539_v7 = vld [vmem:[%s1396_s0 + $0x7] ss:$0 sm:$0xff] }
   0x7   :  { %502 = vst [vmem:[%s1397_s1 + $0x204] sm:$0xf] %v497_v1  ;;  %503 = vst [vmem:[%s1397_s1 + $0x284] sm:$0xf] %v497_v1  ;;  %v546_v8 = vld [vmem:[%s1396_s0 + $0x8] ss:$0 sm:$0xff] }
   0x8   :  { %505 = vst [vmem:[%s1397_s1 + $0x8] sm:$0xf] %v504_v2  ;;  %506 = vst [vmem:[%s1397_s1 + $0x88] sm:$0xf] %v504_v2  ;;  %v553_v9 = vld [vmem:[%s1396_s0 + $0x9] ss:$0 sm:$0xff] }
   0x9   :  { %507 = vst [vmem:[%s1397_s1 + $0x108] sm:$0xf] %v504_v2  ;;  %508 = vst [vmem:[%s1397_s1 + $0x188] sm:$0xf] %v504_v2  ;;  %v560_v10 = vld [vmem:[%s1396_s0 + $0xa] ss:$0 sm:$0xff] }
   0xa   :  { %509 = vst [vmem:[%s1397_s1 + $0x208] sm:$0xf] %v504_v2  ;;  %510 = vst [vmem:[%s1397_s1 + $0x288] sm:$0xf] %v504_v2  ;;  %v567_v11 = vld [vmem:[%s1396_s0 + $0xb] ss:$0 sm:$0xff] }
   0xb   :  { %512 = vst [vmem:[%s1397_s1 + $0xc] sm:$0xf] %v511_v3  ;;  %513 = vst [vmem:[%s1397_s1 + $0x8c] sm:$0xf] %v511_v3  ;;  %v574_v12 = vld [vmem:[%s1396_s0 + $0xc] ss:$0 sm:$0xff] }
   0xc   :  { %514 = vst [vmem:[%s1397_s1 + $0x10c] sm:$0xf] %v511_v3  ;;  %515 = vst [vmem:[%s1397_s1 + $0x18c] sm:$0xf] %v511_v3  ;;  %v581_v13 = vld [vmem:[%s1396_s0 + $0xd] ss:$0 sm:$0xff] }
   0xd   :  { %516 = vst [vmem:[%s1397_s1 + $0x20c] sm:$0xf] %v511_v3  ;;  %517 = vst [vmem:[%s1397_s1 + $0x28c] sm:$0xf] %v511_v3  ;;  %v588_v14 = vld [vmem:[%s1396_s0 + $0xe] ss:$0 sm:$0xff] }
   0xe   :  { %519 = vst [vmem:[%s1397_s1 + $0x10] sm:$0xf] %v518_v4  ;;  %520 = vst [vmem:[%s1397_s1 + $0x90] sm:$0xf] %v518_v4  ;;  %v595_v15 = vld [vmem:[%s1396_s0 + $0xf] ss:$0 sm:$0xff] }
   0xf   :  { %521 = vst [vmem:[%s1397_s1 + $0x110] sm:$0xf] %v518_v4  ;;  %522 = vst [vmem:[%s1397_s1 + $0x190] sm:$0xf] %v518_v4  ;;  %v602_v16 = vld [vmem:[%s1396_s0 + $0x10] ss:$0 sm:$0xff] }
  0x10   :  { %523 = vst [vmem:[%s1397_s1 + $0x210] sm:$0xf] %v518_v4  ;;  %524 = vst [vmem:[%s1397_s1 + $0x290] sm:$0xf] %v518_v4  ;;  %v609_v17 = vld [vmem:[%s1396_s0 + $0x11] ss:$0 sm:$0xff] }
  0x11   :  { %526 = vst [vmem:[%s1397_s1 + $0x14] sm:$0xf] %v525_v5  ;;  %527 = vst [vmem:[%s1397_s1 + $0x94] sm:$0xf] %v525_v5  ;;  %v616_v18 = vld [vmem:[%s1396_s0 + $0x12] ss:$0 sm:$0xff] }
  0x12   :  { %528 = vst [vmem:[%s1397_s1 + $0x114] sm:$0xf] %v525_v5  ;;  %529 = vst [vmem:[%s1397_s1 + $0x194] sm:$0xf] %v525_v5  ;;  %v623_v19 = vld [vmem:[%s1396_s0 + $0x13] ss:$0 sm:$0xff] }
  0x13   :  { %530 = vst [vmem:[%s1397_s1 + $0x214] sm:$0xf] %v525_v5  ;;  %531 = vst [vmem:[%s1397_s1 + $0x294] sm:$0xf] %v525_v5  ;;  %v630_v20 = vld [vmem:[%s1396_s0 + $0x14] ss:$0 sm:$0xff] }
  0x14   :  { %533 = vst [vmem:[%s1397_s1 + $0x18] sm:$0xf] %v532_v6  ;;  %534 = vst [vmem:[%s1397_s1 + $0x98] sm:$0xf] %v532_v6  ;;  %v637_v21 = vld [vmem:[%s1396_s0 + $0x15] ss:$0 sm:$0xff] }
  0x15   :  { %535 = vst [vmem:[%s1397_s1 + $0x118] sm:$0xf] %v532_v6  ;;  %536 = vst [vmem:[%s1397_s1 + $0x198] sm:$0xf] %v532_v6  ;;  %v644_v22 = vld [vmem:[%s1396_s0 + $0x16] ss:$0 sm:$0xff] }
  0x16   :  { %537 = vst [vmem:[%s1397_s1 + $0x218] sm:$0xf] %v532_v6  ;;  %538 = vst [vmem:[%s1397_s1 + $0x298] sm:$0xf] %v532_v6  ;;  %v651_v23 = vld [vmem:[%s1396_s0 + $0x17] ss:$0 sm:$0xff] }
  0x17   :  { %540 = vst [vmem:[%s1397_s1 + $0x1c] sm:$0xf] %v539_v7  ;;  %541 = vst [vmem:[%s1397_s1 + $0x9c] sm:$0xf] %v539_v7  ;;  %v658_v24 = vld [vmem:[%s1396_s0 + $0x18] ss:$0 sm:$0xff] }
  0x18   :  { %542 = vst [vmem:[%s1397_s1 + $0x11c] sm:$0xf] %v539_v7  ;;  %543 = vst [vmem:[%s1397_s1 + $0x19c] sm:$0xf] %v539_v7  ;;  %v665_v25 = vld [vmem:[%s1396_s0 + $0x19] ss:$0 sm:$0xff] }
  0x19   :  { %544 = vst [vmem:[%s1397_s1 + $0x21c] sm:$0xf] %v539_v7  ;;  %545 = vst [vmem:[%s1397_s1 + $0x29c] sm:$0xf] %v539_v7  ;;  %v672_v26 = vld [vmem:[%s1396_s0 + $0x1a] ss:$0 sm:$0xff] }
  0x1a   :  { %547 = vst [vmem:[%s1397_s1 + $0x20] sm:$0xf] %v546_v8  ;;  %548 = vst [vmem:[%s1397_s1 + $0xa0] sm:$0xf] %v546_v8  ;;  %v679_v27 = vld [vmem:[%s1396_s0 + $0x1b] ss:$0 sm:$0xff] }
  0x1b   :  { %549 = vst [vmem:[%s1397_s1 + $0x120] sm:$0xf] %v546_v8  ;;  %550 = vst [vmem:[%s1397_s1 + $0x1a0] sm:$0xf] %v546_v8  ;;  %v686_v28 = vld [vmem:[%s1396_s0 + $0x1c] ss:$0 sm:$0xff] }
  0x1c   :  { %551 = vst [vmem:[%s1397_s1 + $0x220] sm:$0xf] %v546_v8  ;;  %552 = vst [vmem:[%s1397_s1 + $0x2a0] sm:$0xf] %v546_v8  ;;  %v693_v29 = vld [vmem:[%s1396_s0 + $0x1d] ss:$0 sm:$0xff] }
  0x1d   :  { %554 = vst [vmem:[%s1397_s1 + $0x24] sm:$0xf] %v553_v9  ;;  %555 = vst [vmem:[%s1397_s1 + $0xa4] sm:$0xf] %v553_v9  ;;  %v700_v30 = vld [vmem:[%s1396_s0 + $0x1e] ss:$0 sm:$0xff] }
  0x1e   :  { %556 = vst [vmem:[%s1397_s1 + $0x124] sm:$0xf] %v553_v9  ;;  %557 = vst [vmem:[%s1397_s1 + $0x1a4] sm:$0xf] %v553_v9  ;;  %v707_v31 = vld [vmem:[%s1396_s0 + $0x1f] ss:$0 sm:$0xff] }
  0x1f   :  { %558 = vst [vmem:[%s1397_s1 + $0x224] sm:$0xf] %v553_v9  ;;  %559 = vst [vmem:[%s1397_s1 + $0x2a4] sm:$0xf] %v553_v9 }
  0x20   :  { %561 = vst [vmem:[%s1397_s1 + $0x28] sm:$0xf] %v560_v10  ;;  %562 = vst [vmem:[%s1397_s1 + $0xa8] sm:$0xf] %v560_v10 }
  0x21   :  { %563 = vst [vmem:[%s1397_s1 + $0x128] sm:$0xf] %v560_v10  ;;  %564 = vst [vmem:[%s1397_s1 + $0x1a8] sm:$0xf] %v560_v10 }
  0x22   :  { %565 = vst [vmem:[%s1397_s1 + $0x228] sm:$0xf] %v560_v10  ;;  %566 = vst [vmem:[%s1397_s1 + $0x2a8] sm:$0xf] %v560_v10 }
  0x23   :  { %568 = vst [vmem:[%s1397_s1 + $0x2c] sm:$0xf] %v567_v11  ;;  %569 = vst [vmem:[%s1397_s1 + $0xac] sm:$0xf] %v567_v11 }
  0x24   :  { %570 = vst [vmem:[%s1397_s1 + $0x12c] sm:$0xf] %v567_v11  ;;  %571 = vst [vmem:[%s1397_s1 + $0x1ac] sm:$0xf] %v567_v11 }
  0x25   :  { %572 = vst [vmem:[%s1397_s1 + $0x22c] sm:$0xf] %v567_v11  ;;  %573 = vst [vmem:[%s1397_s1 + $0x2ac] sm:$0xf] %v567_v11 }
  0x26   :  { %575 = vst [vmem:[%s1397_s1 + $0x30] sm:$0xf] %v574_v12  ;;  %576 = vst [vmem:[%s1397_s1 + $0xb0] sm:$0xf] %v574_v12 }
  0x27   :  { %577 = vst [vmem:[%s1397_s1 + $0x130] sm:$0xf] %v574_v12  ;;  %578 = vst [vmem:[%s1397_s1 + $0x1b0] sm:$0xf] %v574_v12 }
  0x28   :  { %579 = vst [vmem:[%s1397_s1 + $0x230] sm:$0xf] %v574_v12  ;;  %580 = vst [vmem:[%s1397_s1 + $0x2b0] sm:$0xf] %v574_v12 }
  0x29   :  { %582 = vst [vmem:[%s1397_s1 + $0x34] sm:$0xf] %v581_v13  ;;  %583 = vst [vmem:[%s1397_s1 + $0xb4] sm:$0xf] %v581_v13 }
  0x2a   :  { %584 = vst [vmem:[%s1397_s1 + $0x134] sm:$0xf] %v581_v13  ;;  %585 = vst [vmem:[%s1397_s1 + $0x1b4] sm:$0xf] %v581_v13 }
  0x2b   :  { %586 = vst [vmem:[%s1397_s1 + $0x234] sm:$0xf] %v581_v13  ;;  %587 = vst [vmem:[%s1397_s1 + $0x2b4] sm:$0xf] %v581_v13 }
  0x2c   :  { %589 = vst [vmem:[%s1397_s1 + $0x38] sm:$0xf] %v588_v14  ;;  %590 = vst [vmem:[%s1397_s1 + $0xb8] sm:$0xf] %v588_v14 }
  0x2d   :  { %591 = vst [vmem:[%s1397_s1 + $0x138] sm:$0xf] %v588_v14  ;;  %592 = vst [vmem:[%s1397_s1 + $0x1b8] sm:$0xf] %v588_v14 }
  0x2e   :  { %593 = vst [vmem:[%s1397_s1 + $0x238] sm:$0xf] %v588_v14  ;;  %594 = vst [vmem:[%s1397_s1 + $0x2b8] sm:$0xf] %v588_v14 }
  0x2f   :  { %596 = vst [vmem:[%s1397_s1 + $0x3c] sm:$0xf] %v595_v15  ;;  %597 = vst [vmem:[%s1397_s1 + $0xbc] sm:$0xf] %v595_v15 }
  0x30   :  { %598 = vst [vmem:[%s1397_s1 + $0x13c] sm:$0xf] %v595_v15  ;;  %599 = vst [vmem:[%s1397_s1 + $0x1bc] sm:$0xf] %v595_v15 }
  0x31   :  { %600 = vst [vmem:[%s1397_s1 + $0x23c] sm:$0xf] %v595_v15  ;;  %601 = vst [vmem:[%s1397_s1 + $0x2bc] sm:$0xf] %v595_v15 }
  0x32   :  { %603 = vst [vmem:[%s1397_s1 + $0x40] sm:$0xf] %v602_v16  ;;  %604 = vst [vmem:[%s1397_s1 + $0xc0] sm:$0xf] %v602_v16 }
  0x33   :  { %605 = vst [vmem:[%s1397_s1 + $0x140] sm:$0xf] %v602_v16  ;;  %606 = vst [vmem:[%s1397_s1 + $0x1c0] sm:$0xf] %v602_v16 }
  0x34   :  { %607 = vst [vmem:[%s1397_s1 + $0x240] sm:$0xf] %v602_v16  ;;  %608 = vst [vmem:[%s1397_s1 + $0x2c0] sm:$0xf] %v602_v16 }
  0x35   :  { %610 = vst [vmem:[%s1397_s1 + $0x44] sm:$0xf] %v609_v17  ;;  %611 = vst [vmem:[%s1397_s1 + $0xc4] sm:$0xf] %v609_v17 }
  0x36   :  { %612 = vst [vmem:[%s1397_s1 + $0x144] sm:$0xf] %v609_v17  ;;  %613 = vst [vmem:[%s1397_s1 + $0x1c4] sm:$0xf] %v609_v17 }
  0x37   :  { %614 = vst [vmem:[%s1397_s1 + $0x244] sm:$0xf] %v609_v17  ;;  %615 = vst [vmem:[%s1397_s1 + $0x2c4] sm:$0xf] %v609_v17 }
  0x38   :  { %617 = vst [vmem:[%s1397_s1 + $0x48] sm:$0xf] %v616_v18  ;;  %618 = vst [vmem:[%s1397_s1 + $0xc8] sm:$0xf] %v616_v18 }
  0x39   :  { %619 = vst [vmem:[%s1397_s1 + $0x148] sm:$0xf] %v616_v18  ;;  %620 = vst [vmem:[%s1397_s1 + $0x1c8] sm:$0xf] %v616_v18 }
  0x3a   :  { %621 = vst [vmem:[%s1397_s1 + $0x248] sm:$0xf] %v616_v18  ;;  %622 = vst [vmem:[%s1397_s1 + $0x2c8] sm:$0xf] %v616_v18 }
  0x3b   :  { %624 = vst [vmem:[%s1397_s1 + $0x4c] sm:$0xf] %v623_v19  ;;  %625 = vst [vmem:[%s1397_s1 + $0xcc] sm:$0xf] %v623_v19 }
  0x3c   :  { %626 = vst [vmem:[%s1397_s1 + $0x14c] sm:$0xf] %v623_v19  ;;  %627 = vst [vmem:[%s1397_s1 + $0x1cc] sm:$0xf] %v623_v19 }
  0x3d   :  { %628 = vst [vmem:[%s1397_s1 + $0x24c] sm:$0xf] %v623_v19  ;;  %629 = vst [vmem:[%s1397_s1 + $0x2cc] sm:$0xf] %v623_v19 }
  0x3e   :  { %631 = vst [vmem:[%s1397_s1 + $0x50] sm:$0xf] %v630_v20  ;;  %632 = vst [vmem:[%s1397_s1 + $0xd0] sm:$0xf] %v630_v20 }
  0x3f   :  { %633 = vst [vmem:[%s1397_s1 + $0x150] sm:$0xf] %v630_v20  ;;  %634 = vst [vmem:[%s1397_s1 + $0x1d0] sm:$0xf] %v630_v20 }
  0x40   :  { %635 = vst [vmem:[%s1397_s1 + $0x250] sm:$0xf] %v630_v20  ;;  %636 = vst [vmem:[%s1397_s1 + $0x2d0] sm:$0xf] %v630_v20 }
  0x41   :  { %638 = vst [vmem:[%s1397_s1 + $0x54] sm:$0xf] %v637_v21  ;;  %639 = vst [vmem:[%s1397_s1 + $0xd4] sm:$0xf] %v637_v21 }
  0x42   :  { %640 = vst [vmem:[%s1397_s1 + $0x154] sm:$0xf] %v637_v21  ;;  %641 = vst [vmem:[%s1397_s1 + $0x1d4] sm:$0xf] %v637_v21 }
  0x43   :  { %642 = vst [vmem:[%s1397_s1 + $0x254] sm:$0xf] %v637_v21  ;;  %643 = vst [vmem:[%s1397_s1 + $0x2d4] sm:$0xf] %v637_v21 }
  0x44   :  { %645 = vst [vmem:[%s1397_s1 + $0x58] sm:$0xf] %v644_v22  ;;  %646 = vst [vmem:[%s1397_s1 + $0xd8] sm:$0xf] %v644_v22 }
  0x45   :  { %647 = vst [vmem:[%s1397_s1 + $0x158] sm:$0xf] %v644_v22  ;;  %648 = vst [vmem:[%s1397_s1 + $0x1d8] sm:$0xf] %v644_v22 }
  0x46   :  { %649 = vst [vmem:[%s1397_s1 + $0x258] sm:$0xf] %v644_v22  ;;  %650 = vst [vmem:[%s1397_s1 + $0x2d8] sm:$0xf] %v644_v22 }
  0x47   :  { %652 = vst [vmem:[%s1397_s1 + $0x5c] sm:$0xf] %v651_v23  ;;  %653 = vst [vmem:[%s1397_s1 + $0xdc] sm:$0xf] %v651_v23 }
  0x48   :  { %654 = vst [vmem:[%s1397_s1 + $0x15c] sm:$0xf] %v651_v23  ;;  %655 = vst [vmem:[%s1397_s1 + $0x1dc] sm:$0xf] %v651_v23 }
  0x49   :  { %656 = vst [vmem:[%s1397_s1 + $0x25c] sm:$0xf] %v651_v23  ;;  %657 = vst [vmem:[%s1397_s1 + $0x2dc] sm:$0xf] %v651_v23 }
  0x4a   :  { %659 = vst [vmem:[%s1397_s1 + $0x60] sm:$0xf] %v658_v24  ;;  %660 = vst [vmem:[%s1397_s1 + $0xe0] sm:$0xf] %v658_v24 }
  0x4b   :  { %661 = vst [vmem:[%s1397_s1 + $0x160] sm:$0xf] %v658_v24  ;;  %662 = vst [vmem:[%s1397_s1 + $0x1e0] sm:$0xf] %v658_v24 }
  0x4c   :  { %663 = vst [vmem:[%s1397_s1 + $0x260] sm:$0xf] %v658_v24  ;;  %664 = vst [vmem:[%s1397_s1 + $0x2e0] sm:$0xf] %v658_v24 }
  0x4d   :  { %666 = vst [vmem:[%s1397_s1 + $0x64] sm:$0xf] %v665_v25  ;;  %667 = vst [vmem:[%s1397_s1 + $0xe4] sm:$0xf] %v665_v25 }
  0x4e   :  { %668 = vst [vmem:[%s1397_s1 + $0x164] sm:$0xf] %v665_v25  ;;  %669 = vst [vmem:[%s1397_s1 + $0x1e4] sm:$0xf] %v665_v25 }
  0x4f   :  { %670 = vst [vmem:[%s1397_s1 + $0x264] sm:$0xf] %v665_v25  ;;  %671 = vst [vmem:[%s1397_s1 + $0x2e4] sm:$0xf] %v665_v25 }
  0x50   :  { %673 = vst [vmem:[%s1397_s1 + $0x68] sm:$0xf] %v672_v26  ;;  %674 = vst [vmem:[%s1397_s1 + $0xe8] sm:$0xf] %v672_v26 }
  0x51   :  { %675 = vst [vmem:[%s1397_s1 + $0x168] sm:$0xf] %v672_v26  ;;  %676 = vst [vmem:[%s1397_s1 + $0x1e8] sm:$0xf] %v672_v26 }
  0x52   :  { %677 = vst [vmem:[%s1397_s1 + $0x268] sm:$0xf] %v672_v26  ;;  %678 = vst [vmem:[%s1397_s1 + $0x2e8] sm:$0xf] %v672_v26 }
  0x53   :  { %680 = vst [vmem:[%s1397_s1 + $0x6c] sm:$0xf] %v679_v27  ;;  %681 = vst [vmem:[%s1397_s1 + $0xec] sm:$0xf] %v679_v27 }
  0x54   :  { %682 = vst [vmem:[%s1397_s1 + $0x16c] sm:$0xf] %v679_v27  ;;  %683 = vst [vmem:[%s1397_s1 + $0x1ec] sm:$0xf] %v679_v27 }
  0x55   :  { %684 = vst [vmem:[%s1397_s1 + $0x26c] sm:$0xf] %v679_v27  ;;  %685 = vst [vmem:[%s1397_s1 + $0x2ec] sm:$0xf] %v679_v27 }
  0x56   :  { %687 = vst [vmem:[%s1397_s1 + $0x70] sm:$0xf] %v686_v28  ;;  %688 = vst [vmem:[%s1397_s1 + $0xf0] sm:$0xf] %v686_v28 }
  0x57   :  { %689 = vst [vmem:[%s1397_s1 + $0x170] sm:$0xf] %v686_v28  ;;  %690 = vst [vmem:[%s1397_s1 + $0x1f0] sm:$0xf] %v686_v28 }
  0x58   :  { %691 = vst [vmem:[%s1397_s1 + $0x270] sm:$0xf] %v686_v28  ;;  %692 = vst [vmem:[%s1397_s1 + $0x2f0] sm:$0xf] %v686_v28 }
  0x59   :  { %694 = vst [vmem:[%s1397_s1 + $0x74] sm:$0xf] %v693_v29  ;;  %695 = vst [vmem:[%s1397_s1 + $0xf4] sm:$0xf] %v693_v29 }
  0x5a   :  { %696 = vst [vmem:[%s1397_s1 + $0x174] sm:$0xf] %v693_v29  ;;  %697 = vst [vmem:[%s1397_s1 + $0x1f4] sm:$0xf] %v693_v29 }
  0x5b   :  { %698 = vst [vmem:[%s1397_s1 + $0x274] sm:$0xf] %v693_v29  ;;  %699 = vst [vmem:[%s1397_s1 + $0x2f4] sm:$0xf] %v693_v29 }
  0x5c   :  { %701 = vst [vmem:[%s1397_s1 + $0x78] sm:$0xf] %v700_v30  ;;  %702 = vst [vmem:[%s1397_s1 + $0xf8] sm:$0xf] %v700_v30 }
  0x5d   :  { %703 = vst [vmem:[%s1397_s1 + $0x178] sm:$0xf] %v700_v30  ;;  %704 = vst [vmem:[%s1397_s1 + $0x1f8] sm:$0xf] %v700_v30 }
  0x5e   :  { %705 = vst [vmem:[%s1397_s1 + $0x278] sm:$0xf] %v700_v30  ;;  %706 = vst [vmem:[%s1397_s1 + $0x2f8] sm:$0xf] %v700_v30 }
  0x5f   :  { %708 = vst [vmem:[%s1397_s1 + $0x7c] sm:$0xf] %v707_v31  ;;  %709 = vst [vmem:[%s1397_s1 + $0xfc] sm:$0xf] %v707_v31 }
  0x60   :  { %710 = vst [vmem:[%s1397_s1 + $0x17c] sm:$0xf] %v707_v31  ;;  %711 = vst [vmem:[%s1397_s1 + $0x1fc] sm:$0xf] %v707_v31 }
  0x61   :  { %712 = vst [vmem:[%s1397_s1 + $0x27c] sm:$0xf] %v707_v31  ;;  %713 = vst [vmem:[%s1397_s1 + $0x2fc] sm:$0xf] %v707_v31 }

// kernel: tile.22
= control target key start
LH: loop header
LB: loop body
LE: loop exit
PB: predicated region body
PF: predicated region fallthrough
CT: control target
= control target key end

     0   :  { %vm963_vm0 = vcmask 1047556   ;;  %s2439_s10 = smov 96   ;;  %vm965_vm1 = vcmask 261120   ;;  %vm1182_vm2 = vcmask 1048320   ;;  %vm1445_vm3 = vcmask 785920   ;;  %s3580_s0 = inlined_call_operand.vmem [shape: f32[6,32,4,32], index: 0, kind: input, shape index: {}]   ;;  %s3581_s1 = inlined_call_operand.vmem [shape: f32[192,128], index: 1, kind: output, shape index: {}]  }
   0x1   :  { %v2337_v0 = vld [vmem:[%s3580_s0 + $0x1c] sm:$0xf]  ;;  %v2338_v1 = vld [vmem:[%s3580_s0 + $0x18] sm:$0xf]  ;;  %v2339_v2 = vld [vmem:[%s3580_s0 + $0x14] sm:$0xf] }
   0x2   :  { %929 = vst [vmem:[#allocation0 + $0x38] sm:$0xf] %v2337_v0  ;;  %934 = vst [vmem:[#allocation0 + $0x30] sm:$0xf] %v2338_v1  ;;  %v2340_v3 = vld [vmem:[%s3580_s0 + $0x10] sm:$0xf] }
   0x3   :  { %939 = vst [vmem:[#allocation0 + $0x28] sm:$0xf] %v2339_v2  ;;  %v2341_v4 = vld [vmem:[%s3580_s0 + $0xc] sm:$0xf]  ;;  %v2342_v5 = vld [vmem:[%s3580_s0 + $0x8] sm:$0xf] }
   0x4   :  { %944 = vst [vmem:[#allocation0 + $0x20] sm:$0xf] %v2340_v3  ;;  %949 = vst [vmem:[#allocation0 + $0x18] sm:$0xf] %v2341_v4  ;;  %v2343_v6 = vld [vmem:[%s3580_s0 + $0x4] sm:$0xf] }
   0x5   :  { %954 = vst [vmem:[#allocation0 + $0x10] sm:$0xf] %v2342_v5  ;;  %v959_v7 = vld [vmem:[%s3580_s0] sm:$0xf]  ;;  %958 = vst [vmem:[#allocation0 + $0x8] sm:$0xf] %v2343_v6 }
   0x6   :  { %960 = vst [vmem:[#allocation0] sm:$0xf] %v959_v7  ;;  %v2273_v8 = vld [vmem:[%s3580_s0 + $0x11c] sm:$0xf]  ;;  %v2274_v9 = vld [vmem:[%s3580_s0 + $0x118] sm:$0xf] }
   0x7   :  { %v2275_v10 = vld [vmem:[%s3580_s0 + $0x114] sm:$0xf]  ;;  %609 = vst [vmem:[#allocation0 + $0x238] sm:$0xf] %v2273_v8  ;;  %614 = vst [vmem:[#allocation0 + $0x230] sm:$0xf] %v2274_v9 }
   0x8   :  { %619 = vst [vmem:[#allocation0 + $0x228] sm:$0xf] %v2275_v10  ;;  %v2276_v11 = vld [vmem:[%s3580_s0 + $0x110] sm:$0xf]  ;;  %v2277_v12 = vld [vmem:[%s3580_s0 + $0x10c] sm:$0xf] }
   0x9   :  { %v2278_v13 = vld [vmem:[%s3580_s0 + $0x108] sm:$0xf]  ;;  %624 = vst [vmem:[#allocation0 + $0x220] sm:$0xf] %v2276_v11  ;;  %629 = vst [vmem:[#allocation0 + $0x218] sm:$0xf] %v2277_v12 }
   0xa   :  { %634 = vst [vmem:[#allocation0 + $0x210] sm:$0xf] %v2278_v13  ;;  %v2279_v14 = vld [vmem:[%s3580_s0 + $0x104] sm:$0xf]  ;;  %v2280_v15 = vld [vmem:[%s3580_s0 + $0x100] sm:$0xf] }
   0xb   :  { %v2305_v16 = vld [vmem:[%s3580_s0 + $0x9c] sm:$0xf]  ;;  %639 = vst [vmem:[#allocation0 + $0x208] sm:$0xf] %v2279_v14  ;;  %644 = vst [vmem:[#allocation0 + $0x200] sm:$0xf] %v2280_v15 }
   0xc   :  { %769 = vst [vmem:[#allocation0 + $0x138] sm:$0xf] %v2305_v16  ;;  %v2306_v17 = vld [vmem:[%s3580_s0 + $0x98] sm:$0xf]  ;;  %v2307_v18 = vld [vmem:[%s3580_s0 + $0x94] sm:$0xf] }
   0xd   :  { %v2308_v19 = vld [vmem:[%s3580_s0 + $0x90] sm:$0xf]  ;;  %774 = vst [vmem:[#allocation0 + $0x130] sm:$0xf] %v2306_v17  ;;  %779 = vst [vmem:[#allocation0 + $0x128] sm:$0xf] %v2307_v18 }
   0xe   :  { %784 = vst [vmem:[#allocation0 + $0x120] sm:$0xf] %v2308_v19  ;;  %v2309_v20 = vld [vmem:[%s3580_s0 + $0x8c] sm:$0xf]  ;;  %v2310_v21 = vld [vmem:[%s3580_s0 + $0x88] sm:$0xf] }
   0xf   :  { %v2311_v22 = vld [vmem:[%s3580_s0 + $0x84] sm:$0xf]  ;;  %789 = vst [vmem:[#allocation0 + $0x118] sm:$0xf] %v2309_v20  ;;  %794 = vst [vmem:[#allocation0 + $0x110] sm:$0xf] %v2310_v21 }
  0x10   :  { %799 = vst [vmem:[#allocation0 + $0x108] sm:$0xf] %v2311_v22  ;;  %v2312_v23 = vld [vmem:[%s3580_s0 + $0x80] sm:$0xf]  ;;  %v2241_v24 = vld [vmem:[%s3580_s0 + $0x19c] sm:$0xf] }
  0x11   :  { %v2242_v25 = vld [vmem:[%s3580_s0 + $0x198] sm:$0xf]  ;;  %804 = vst [vmem:[#allocation0 + $0x100] sm:$0xf] %v2312_v23  ;;  %449 = vst [vmem:[#allocation0 + $0x338] sm:$0xf] %v2241_v24 }
  0x12   :  { %v1177_v26 = vld [vmem:[#allocation0 + $0x3] ss:$8 sm:$0xf0]   ;;  %454 = vst [vmem:[#allocation0 + $0x330] sm:$0xf] %v2242_v25  ;;  %vm1708_vm4 = vcmask 523520  }
  0x13   :  { %v2243_v27 = vld [vmem:[%s3580_s0 + $0x194] sm:$0xf]  ;;  %v1175_v28 = vld [vmem:[#allocation0 + $0x3] ss:$8 sm:$0xf]  }
  0x14   :  { %459 = vst [vmem:[#allocation0 + $0x328] sm:$0xf] %v2243_v27  ;;  %v2244_v29 = vld [vmem:[%s3580_s0 + $0x190] sm:$0xf]  ;;  %v1179_v30 = vsel %vm963_vm0, %v1177_v26, %v1175_v28  ;;  %v2245_v31 = vld [vmem:[%s3580_s0 + $0x18c] sm:$0xf] }
  0x15   :  { %464 = vst [vmem:[#allocation0 + $0x320] sm:$0xf] %v2244_v29  ;;  %v2246_v32 = vld [vmem:[%s3580_s0 + $0x188] sm:$0xf]  ;;  %v2247_v33 = vld [vmem:[%s3580_s0 + $0x184] sm:$0xf]  ;;  %1180 = vrot.lane.b32.xlu0 %v1179_v30, %s2439_s10 }
  0x16   :  { %v1198_v34 = vld [vmem:[#allocation0 + $0x203] ss:$8 sm:$0xf0]   ;;  %469 = vst [vmem:[#allocation0 + $0x318] sm:$0xf] %v2245_v31 }
  0x17   :  { %474 = vst [vmem:[#allocation0 + $0x310] sm:$0xf] %v2246_v32  ;;  %479 = vst [vmem:[#allocation0 + $0x308] sm:$0xf] %v2247_v33  ;;  %v2248_v35 = vld [vmem:[%s3580_s0 + $0x180] sm:$0xf] }
  0x18   :  { %v1196_v36 = vld [vmem:[#allocation0 + $0x203] ss:$8 sm:$0xf]   ;;  %484 = vst [vmem:[#allocation0 + $0x300] sm:$0xf] %v2248_v35 }
  0x19   :  { %v2209_v37 = vld [vmem:[%s3580_s0 + $0x21c] sm:$0xf]  ;;  %v1200_v38 = vsel %vm963_vm0, %v1198_v34, %v1196_v36  ;;  %v1187_v39 = vld [vmem:[#allocation0 + $0x103] ss:$8 sm:$0xf0]  }
  0x1a   :  { %289 = vst [vmem:[#allocation0 + $0x438] sm:$0xf] %v2209_v37  ;;  %v2210_v40 = vld [vmem:[%s3580_s0 + $0x218] sm:$0xf]  ;;  %1201 = vrot.lane.b32.xlu1 %v1200_v38, %s2439_s10  ;;  %v2211_v41 = vld [vmem:[%s3580_s0 + $0x214] sm:$0xf] }
  0x1b   :  { %294 = vst [vmem:[#allocation0 + $0x430] sm:$0xf] %v2210_v40  ;;  %v2212_v42 = vld [vmem:[%s3580_s0 + $0x210] sm:$0xf]  ;;  %v2213_v43 = vld [vmem:[%s3580_s0 + $0x20c] sm:$0xf] }
  0x1c   :  { %v1185_v44 = vld [vmem:[#allocation0 + $0x103] ss:$8 sm:$0xf]   ;;  %299 = vst [vmem:[#allocation0 + $0x428] sm:$0xf] %v2211_v41 }
  0x1d   :  { %304 = vst [vmem:[#allocation0 + $0x420] sm:$0xf] %v2212_v42  ;;  %309 = vst [vmem:[#allocation0 + $0x418] sm:$0xf] %v2213_v43  ;;  %v2214_v45 = vld [vmem:[%s3580_s0 + $0x208] sm:$0xf]  ;;  %v1189_v46 = vsel %vm963_vm0, %v1187_v39, %v1185_v44 }
  0x1e   :  { %314 = vst [vmem:[#allocation0 + $0x410] sm:$0xf] %v2214_v45  ;;  %v2215_v47 = vld [vmem:[%s3580_s0 + $0x204] sm:$0xf]  ;;  %v2216_v48 = vld [vmem:[%s3580_s0 + $0x200] sm:$0xf]  ;;  %1190 = vrot.lane.b32.xlu0 %v1189_v46, %s2439_s10 }
  0x1f   :  { %v2177_v49 = vld [vmem:[%s3580_s0 + $0x29c] sm:$0xf]  ;;  %v1209_v50 = vld [vmem:[#allocation0 + $0x303] ss:$8 sm:$0xf0]  }
  0x20   :  { %319 = vst [vmem:[#allocation0 + $0x408] sm:$0xf] %v2215_v47  ;;  %324 = vst [vmem:[#allocation0 + $0x400] sm:$0xf] %v2216_v48  ;;  %v2178_v51 = vld [vmem:[%s3580_s0 + $0x298] sm:$0xf] }
  0x21   :  { %129 = vst [vmem:[#allocation0 + $0x538] sm:$0xf] %v2177_v49  ;;  %134 = vst [vmem:[#allocation0 + $0x530] sm:$0xf] %v2178_v51  ;;  %v2179_v52 = vld [vmem:[%s3580_s0 + $0x294] sm:$0xf] }
  0x22   :  { %v2180_v53 = vld [vmem:[%s3580_s0 + $0x290] sm:$0xf]  ;;  %v2181_v54 = vld [vmem:[%s3580_s0 + $0x28c] sm:$0xf]  ;;  %139 = vst [vmem:[#allocation0 + $0x528] sm:$0xf] %v2179_v52 }
  0x23   :  { %v1207_v55 = vld [vmem:[#allocation0 + $0x303] ss:$8 sm:$0xf]   ;;  %144 = vst [vmem:[#allocation0 + $0x520] sm:$0xf] %v2180_v53 }
  0x24   :  { %149 = vst [vmem:[#allocation0 + $0x518] sm:$0xf] %v2181_v54  ;;  %v2182_v56 = vld [vmem:[%s3580_s0 + $0x288] sm:$0xf]  ;;  %v1211_v57 = vsel %vm963_vm0, %v1209_v50, %v1207_v55  ;;  %v2183_v58 = vld [vmem:[%s3580_s0 + $0x284] sm:$0xf] }
  0x25   :  { %154 = vst [vmem:[#allocation0 + $0x510] sm:$0xf] %v2182_v56  ;;  %v2184_v59 = vld [vmem:[%s3580_s0 + $0x280] sm:$0xf]  ;;  %v2329_v60 = vld [vmem:[%s3580_s0 + $0x3c] sm:$0xf]  ;;  %1212 = vrot.lane.b32.xlu1 %v1211_v57, %s2439_s10 }
  0x26   :  { %159 = vst [vmem:[#allocation0 + $0x508] sm:$0xf] %v2183_v58  ;;  %164 = vst [vmem:[#allocation0 + $0x500] sm:$0xf] %v2184_v59  ;;  %v2330_v61 = vld [vmem:[%s3580_s0 + $0x38] sm:$0xf] }
  0x27   :  { %889 = vst [vmem:[#allocation0 + $0x78] sm:$0xf] %v2329_v60  ;;  %v2331_v62 = vld [vmem:[%s3580_s0 + $0x34] sm:$0xf]  ;;  %v2332_v63 = vld [vmem:[%s3580_s0 + $0x30] sm:$0xf] }
  0x28   :  { %v1220_v0 = vld [vmem:[#allocation0 + $0x403] ss:$8 sm:$0xf0]   ;;  %894 = vst [vmem:[#allocation0 + $0x70] sm:$0xf] %v2330_v61 }
  0x29   :  { %899 = vst [vmem:[#allocation0 + $0x68] sm:$0xf] %v2331_v62  ;;  %904 = vst [vmem:[#allocation0 + $0x60] sm:$0xf] %v2332_v63  ;;  %v2333_v1 = vld [vmem:[%s3580_s0 + $0x2c] sm:$0xf] }
  0x2a   :  { %909 = vst [vmem:[#allocation0 + $0x58] sm:$0xf] %v2333_v1  ;;  %v2334_v2 = vld [vmem:[%s3580_s0 + $0x28] sm:$0xf]  ;;  %v2335_v3 = vld [vmem:[%s3580_s0 + $0x24] sm:$0xf] }
  0x2b   :  { %v2336_v4 = vld [vmem:[%s3580_s0 + $0x20] sm:$0xf]  ;;  %914 = vst [vmem:[#allocation0 + $0x50] sm:$0xf] %v2334_v2  ;;  %919 = vst [vmem:[#allocation0 + $0x48] sm:$0xf] %v2335_v3 }
  0x2c   :  { %v1218_v5 = vld [vmem:[#allocation0 + $0x403] ss:$8 sm:$0xf]   ;;  %924 = vst [vmem:[#allocation0 + $0x40] sm:$0xf] %v2336_v4 }
  0x2d   :  { %v2297_v6 = vld [vmem:[%s3580_s0 + $0xbc] sm:$0xf]  ;;  %v1222_v7 = vsel %vm963_vm0, %v1220_v0, %v1218_v5  ;;  %v2298_v8 = vld [vmem:[%s3580_s0 + $0xb8] sm:$0xf]  ;;  %v2299_v9 = vld [vmem:[%s3580_s0 + $0xb4] sm:$0xf] }
  0x2e   :  { %729 = vst [vmem:[#allocation0 + $0x178] sm:$0xf] %v2297_v6  ;;  %v2300_v10 = vld [vmem:[%s3580_s0 + $0xb0] sm:$0xf]  ;;  %1223 = vrot.lane.b32.xlu0 %v1222_v7, %s2439_s10  ;;  %734 = vst [vmem:[#allocation0 + $0x170] sm:$0xf] %v2298_v8 }
  0x2f   :  { %v1231_v11 = vld [vmem:[#allocation0 + $0x503] ss:$8 sm:$0xf0]   ;;  %739 = vst [vmem:[#allocation0 + $0x168] sm:$0xf] %v2299_v9 }
  0x30   :  { %744 = vst [vmem:[#allocation0 + $0x160] sm:$0xf] %v2300_v10  ;;  %v2301_v12 = vld [vmem:[%s3580_s0 + $0xac] sm:$0xf]  ;;  %v2302_v13 = vld [vmem:[%s3580_s0 + $0xa8] sm:$0xf] }
  0x31   :  { %749 = vst [vmem:[#allocation0 + $0x158] sm:$0xf] %v2301_v12  ;;  %v2303_v14 = vld [vmem:[%s3580_s0 + $0xa4] sm:$0xf]  ;;  %v2304_v15 = vld [vmem:[%s3580_s0 + $0xa0] sm:$0xf] }
  0x32   :  { %v1229_v16 = vld [vmem:[#allocation0 + $0x503] ss:$8 sm:$0xf]   ;;  %754 = vst [vmem:[#allocation0 + $0x150] sm:$0xf] %v2302_v13 }
  0x33   :  { %759 = vst [vmem:[#allocation0 + $0x148] sm:$0xf] %v2303_v14  ;;  %764 = vst [vmem:[#allocation0 + $0x140] sm:$0xf] %v2304_v15  ;;  %v2265_v17 = vld [vmem:[%s3580_s0 + $0x13c] sm:$0xf]  ;;  %v1233_v18 = vsel %vm963_vm0, %v1231_v11, %v1229_v16 }
  0x34   :  { %v1242_v19 = vld [vmem:[#allocation0 + $0x43] ss:$8 sm:$0xf0]   ;;  %569 = vst [vmem:[#allocation0 + $0x278] sm:$0xf] %v2265_v17  ;;  %1234 = vrot.lane.b32.xlu1 %v1233_v18, %s2439_s10 }
  0x35   :  { %v2266_v20 = vld [vmem:[%s3580_s0 + $0x138] sm:$0xf]  ;;  %v2267_v21 = vld [vmem:[%s3580_s0 + $0x134] sm:$0xf]  ;;  %v2268_v22 = vld [vmem:[%s3580_s0 + $0x130] sm:$0xf] }
  0x36   :  { %574 = vst [vmem:[#allocation0 + $0x270] sm:$0xf] %v2266_v20  ;;  %v2269_v23 = vld [vmem:[%s3580_s0 + $0x12c] sm:$0xf]  ;;  %579 = vst [vmem:[#allocation0 + $0x268] sm:$0xf] %v2267_v21 }
  0x37   :  { %v1240_v24 = vld [vmem:[#allocation0 + $0x43] ss:$8 sm:$0xf]   ;;  %584 = vst [vmem:[#allocation0 + $0x260] sm:$0xf] %v2268_v22 }
  0x38   :  { %589 = vst [vmem:[#allocation0 + $0x258] sm:$0xf] %v2269_v23  ;;  %v2270_v25 = vld [vmem:[%s3580_s0 + $0x128] sm:$0xf]  ;;  %v1244_v26 = vsel %vm963_vm0, %v1242_v19, %v1240_v24  ;;  %v2271_v27 = vld [vmem:[%s3580_s0 + $0x124] sm:$0xf] }
  0x39   :  { %594 = vst [vmem:[#allocation0 + $0x250] sm:$0xf] %v2270_v25  ;;  %v2272_v28 = vld [vmem:[%s3580_s0 + $0x120] sm:$0xf]  ;;  %v2233_v29 = vld [vmem:[%s3580_s0 + $0x1bc] sm:$0xf]  ;;  %1245 = vrot.lane.b32.xlu0 %v1244_v26, %s2439_s10 }
  0x3a   :  { %v1253_v30 = vld [vmem:[#allocation0 + $0x143] ss:$8 sm:$0xf0]   ;;  %599 = vst [vmem:[#allocation0 + $0x248] sm:$0xf] %v2271_v27 }
  0x3b   :  { %604 = vst [vmem:[#allocation0 + $0x240] sm:$0xf] %v2272_v28  ;;  %409 = vst [vmem:[#allocation0 + $0x378] sm:$0xf] %v2233_v29  ;;  %v2234_v31 = vld [vmem:[%s3580_s0 + $0x1b8] sm:$0xf] }
  0x3c   :  { %414 = vst [vmem:[#allocation0 + $0x370] sm:$0xf] %v2234_v31  ;;  %v2235_v32 = vld [vmem:[%s3580_s0 + $0x1b4] sm:$0xf]  ;;  %v2236_v33 = vld [vmem:[%s3580_s0 + $0x1b0] sm:$0xf] }
  0x3d   :  { %v2237_v34 = vld [vmem:[%s3580_s0 + $0x1ac] sm:$0xf]  ;;  %v1251_v35 = vld [vmem:[#allocation0 + $0x143] ss:$8 sm:$0xf]  }
  0x3e   :  { %419 = vst [vmem:[#allocation0 + $0x368] sm:$0xf] %v2235_v32  ;;  %424 = vst [vmem:[#allocation0 + $0x360] sm:$0xf] %v2236_v33  ;;  %v2238_v36 = vld [vmem:[%s3580_s0 + $0x1a8] sm:$0xf]  ;;  %v1255_v37 = vsel %vm963_vm0, %v1253_v30, %v1251_v35 }
  0x3f   :  { %429 = vst [vmem:[#allocation0 + $0x358] sm:$0xf] %v2237_v34  ;;  %434 = vst [vmem:[#allocation0 + $0x350] sm:$0xf] %v2238_v36  ;;  %v2239_v38 = vld [vmem:[%s3580_s0 + $0x1a4] sm:$0xf]  ;;  %1256 = vrot.lane.b32.xlu1 %v1255_v37, %s2439_s10 }
  0x40   :  { %v2240_v39 = vld [vmem:[%s3580_s0 + $0x1a0] sm:$0xf]  ;;  %v2201_v40 = vld [vmem:[%s3580_s0 + $0x23c] sm:$0xf]  ;;  %439 = vst [vmem:[#allocation0 + $0x348] sm:$0xf] %v2239_v38 }
  0x41   :  { %444 = vst [vmem:[#allocation0 + $0x340] sm:$0xf] %v2240_v39  ;;  %249 = vst [vmem:[#allocation0 + $0x478] sm:$0xf] %v2201_v40  ;;  %v2202_v41 = vld [vmem:[%s3580_s0 + $0x238] sm:$0xf] }
  0x42   :  { %v2203_v42 = vld [vmem:[%s3580_s0 + $0x234] sm:$0xf]  ;;  %v2204_v43 = vld [vmem:[%s3580_s0 + $0x230] sm:$0xf]  ;;  %254 = vst [vmem:[#allocation0 + $0x470] sm:$0xf] %v2202_v41 }
  0x43   :  { %v1264_v44 = vld [vmem:[#allocation0 + $0x243] ss:$8 sm:$0xf0]   ;;  %259 = vst [vmem:[#allocation0 + $0x468] sm:$0xf] %v2203_v42 }
  0x44   :  { %264 = vst [vmem:[#allocation0 + $0x460] sm:$0xf] %v2204_v43  ;;  %v2205_v45 = vld [vmem:[%s3580_s0 + $0x22c] sm:$0xf]  ;;  %v2206_v46 = vld [vmem:[%s3580_s0 + $0x228] sm:$0xf] }
  0x45   :  { %269 = vst [vmem:[#allocation0 + $0x458] sm:$0xf] %v2205_v45  ;;  %v2207_v47 = vld [vmem:[%s3580_s0 + $0x224] sm:$0xf]  ;;  %v2208_v48 = vld [vmem:[%s3580_s0 + $0x220] sm:$0xf] }
  0x46   :  { %v1262_v49 = vld [vmem:[#allocation0 + $0x243] ss:$8 sm:$0xf]   ;;  %274 = vst [vmem:[#allocation0 + $0x450] sm:$0xf] %v2206_v46 }
  0x47   :  { %279 = vst [vmem:[#allocation0 + $0x448] sm:$0xf] %v2207_v47  ;;  %284 = vst [vmem:[#allocation0 + $0x440] sm:$0xf] %v2208_v48  ;;  %v2169_v50 = vld [vmem:[%s3580_s0 + $0x2bc] sm:$0xf]  ;;  %v1266_v51 = vsel %vm963_vm0, %v1264_v44, %v1262_v49 }
  0x48   :  { %89 = vst [vmem:[#allocation0 + $0x578] sm:$0xf] %v2169_v50  ;;  %v2170_v52 = vld [vmem:[%s3580_s0 + $0x2b8] sm:$0xf]  ;;  %v2171_v53 = vld [vmem:[%s3580_s0 + $0x2b4] sm:$0xf]  ;;  %1267 = vrot.lane.b32.xlu0 %v1266_v51, %s2439_s10 }
  0x49   :  { %v2172_v54 = vld [vmem:[%s3580_s0 + $0x2b0] sm:$0xf]  ;;  %94 = vst [vmem:[#allocation0 + $0x570] sm:$0xf] %v2170_v52  ;;  %99 = vst [vmem:[#allocation0 + $0x568] sm:$0xf] %v2171_v53 }
  0x4a   :  { %v1275_v55 = vld [vmem:[#allocation0 + $0x343] ss:$8 sm:$0xf0]   ;;  %104 = vst [vmem:[#allocation0 + $0x560] sm:$0xf] %v2172_v54 }
  0x4b   :  { %v2173_v56 = vld [vmem:[%s3580_s0 + $0x2ac] sm:$0xf]  ;;  %v2174_v57 = vld [vmem:[%s3580_s0 + $0x2a8] sm:$0xf]  ;;  %v2175_v58 = vld [vmem:[%s3580_s0 + $0x2a4] sm:$0xf] }
  0x4c   :  { %109 = vst [vmem:[#allocation0 + $0x558] sm:$0xf] %v2173_v56  ;;  %v2176_v59 = vld [vmem:[%s3580_s0 + $0x2a0] sm:$0xf]  ;;  %114 = vst [vmem:[#allocation0 + $0x550] sm:$0xf] %v2174_v57 }
  0x4d   :  { %v1273_v60 = vld [vmem:[#allocation0 + $0x343] ss:$8 sm:$0xf]   ;;  %119 = vst [vmem:[#allocation0 + $0x548] sm:$0xf] %v2175_v58 }
  0x4e   :  { %124 = vst [vmem:[#allocation0 + $0x540] sm:$0xf] %v2176_v59  ;;  %v2321_v61 = vld [vmem:[%s3580_s0 + $0x5c] sm:$0xf]  ;;  %v1277_v62 = vsel %vm963_vm0, %v1275_v55, %v1273_v60  ;;  %v2322_v0 = vld [vmem:[%s3580_s0 + $0x58] sm:$0xf] }
  0x4f   :  { %v1286_v63 = vld [vmem:[#allocation0 + $0x443] ss:$8 sm:$0xf0]   ;;  %849 = vst [vmem:[#allocation0 + $0xb8] sm:$0xf] %v2321_v61  ;;  %1278 = vrot.lane.b32.xlu1 %v1277_v62, %s2439_s10 }
  0x50   :  { %854 = vst [vmem:[#allocation0 + $0xb0] sm:$0xf] %v2322_v0  ;;  %v2323_v1 = vld [vmem:[%s3580_s0 + $0x54] sm:$0xf]  ;;  %v2324_v2 = vld [vmem:[%s3580_s0 + $0x50] sm:$0xf] }
  0x51   :  { %v2325_v3 = vld [vmem:[%s3580_s0 + $0x4c] sm:$0xf]  ;;  %v1284_v4 = vld [vmem:[#allocation0 + $0x443] ss:$8 sm:$0xf]  }
  0x52   :  { %859 = vst [vmem:[#allocation0 + $0xa8] sm:$0xf] %v2323_v1  ;;  %864 = vst [vmem:[#allocation0 + $0xa0] sm:$0xf] %v2324_v2  ;;  %v2326_v5 = vld [vmem:[%s3580_s0 + $0x48] sm:$0xf]  ;;  %v1288_v6 = vsel %vm963_vm0, %v1286_v63, %v1284_v4 }
  0x53   :  { %869 = vst [vmem:[#allocation0 + $0x98] sm:$0xf] %v2325_v3  ;;  %874 = vst [vmem:[#allocation0 + $0x90] sm:$0xf] %v2326_v5  ;;  %v2327_v7 = vld [vmem:[%s3580_s0 + $0x44] sm:$0xf]  ;;  %1289 = vrot.lane.b32.xlu0 %v1288_v6, %s2439_s10 }
  0x54   :  { %v2328_v8 = vld [vmem:[%s3580_s0 + $0x40] sm:$0xf]  ;;  %v2289_v9 = vld [vmem:[%s3580_s0 + $0xdc] sm:$0xf]  ;;  %879 = vst [vmem:[#allocation0 + $0x88] sm:$0xf] %v2327_v7 }
  0x55   :  { %v1297_v10 = vld [vmem:[#allocation0 + $0x543] ss:$8 sm:$0xf0]   ;;  %884 = vst [vmem:[#allocation0 + $0x80] sm:$0xf] %v2328_v8 }
  0x56   :  { %689 = vst [vmem:[#allocation0 + $0x1b8] sm:$0xf] %v2289_v9  ;;  %v2290_v11 = vld [vmem:[%s3580_s0 + $0xd8] sm:$0xf]  ;;  %v2291_v12 = vld [vmem:[%s3580_s0 + $0xd4] sm:$0xf] }
  0x57   :  { %694 = vst [vmem:[#allocation0 + $0x1b0] sm:$0xf] %v2290_v11  ;;  %v2292_v13 = vld [vmem:[%s3580_s0 + $0xd0] sm:$0xf]  ;;  %v2293_v14 = vld [vmem:[%s3580_s0 + $0xcc] sm:$0xf] }
  0x58   :  { %v1295_v15 = vld [vmem:[#allocation0 + $0x543] ss:$8 sm:$0xf]   ;;  %699 = vst [vmem:[#allocation0 + $0x1a8] sm:$0xf] %v2291_v12 }
  0x59   :  { %704 = vst [vmem:[#allocation0 + $0x1a0] sm:$0xf] %v2292_v13  ;;  %709 = vst [vmem:[#allocation0 + $0x198] sm:$0xf] %v2293_v14  ;;  %v2294_v16 = vld [vmem:[%s3580_s0 + $0xc8] sm:$0xf]  ;;  %v1299_v17 = vsel %vm963_vm0, %v1297_v10, %v1295_v15 }
  0x5a   :  { %714 = vst [vmem:[#allocation0 + $0x190] sm:$0xf] %v2294_v16  ;;  %v2295_v18 = vld [vmem:[%s3580_s0 + $0xc4] sm:$0xf]  ;;  %v2296_v19 = vld [vmem:[%s3580_s0 + $0xc0] sm:$0xf]  ;;  %1300 = vrot.lane.b32.xlu1 %v1299_v17, %s2439_s10 }
  0x5b   :  { %v2257_v20 = vld [vmem:[%s3580_s0 + $0x15c] sm:$0xf]  ;;  %719 = vst [vmem:[#allocation0 + $0x188] sm:$0xf] %v2295_v18  ;;  %724 = vst [vmem:[#allocation0 + $0x180] sm:$0xf] %v2296_v19 }
  0x5c   :  { %529 = vst [vmem:[#allocation0 + $0x2b8] sm:$0xf] %v2257_v20  ;;  %v2258_v21 = vld [vmem:[%s3580_s0 + $0x158] sm:$0xf]  ;;  %v2259_v22 = vld [vmem:[%s3580_s0 + $0x154] sm:$0xf] }
  0x5d   :  { %v2260_v23 = vld [vmem:[%s3580_s0 + $0x150] sm:$0xf]  ;;  %534 = vst [vmem:[#allocation0 + $0x2b0] sm:$0xf] %v2258_v21  ;;  %539 = vst [vmem:[#allocation0 + $0x2a8] sm:$0xf] %v2259_v22 }
  0x5e   :  { %v1308_v24 = vld [vmem:[#allocation0 + $0x83] ss:$8 sm:$0xf0]   ;;  %544 = vst [vmem:[#allocation0 + $0x2a0] sm:$0xf] %v2260_v23 }
  0x5f   :  { %v2261_v25 = vld [vmem:[%s3580_s0 + $0x14c] sm:$0xf]  ;;  %v2262_v26 = vld [vmem:[%s3580_s0 + $0x148] sm:$0xf]  ;;  %v2263_v27 = vld [vmem:[%s3580_s0 + $0x144] sm:$0xf] }
  0x60   :  { %549 = vst [vmem:[#allocation0 + $0x298] sm:$0xf] %v2261_v25  ;;  %v2264_v28 = vld [vmem:[%s3580_s0 + $0x140] sm:$0xf]  ;;  %554 = vst [vmem:[#allocation0 + $0x290] sm:$0xf] %v2262_v26 }
  0x61   :  { %v1306_v29 = vld [vmem:[#allocation0 + $0x83] ss:$8 sm:$0xf]   ;;  %559 = vst [vmem:[#allocation0 + $0x288] sm:$0xf] %v2263_v27 }
  0x62   :  { %564 = vst [vmem:[#allocation0 + $0x280] sm:$0xf] %v2264_v28  ;;  %v2225_v30 = vld [vmem:[%s3580_s0 + $0x1dc] sm:$0xf]  ;;  %v1310_v31 = vsel %vm963_vm0, %v1308_v24, %v1306_v29  ;;  %v2226_v32 = vld [vmem:[%s3580_s0 + $0x1d8] sm:$0xf] }
  0x63   :  { %369 = vst [vmem:[#allocation0 + $0x3b8] sm:$0xf] %v2225_v30  ;;  %v2227_v33 = vld [vmem:[%s3580_s0 + $0x1d4] sm:$0xf]  ;;  %v2228_v34 = vld [vmem:[%s3580_s0 + $0x1d0] sm:$0xf]  ;;  %1311 = vrot.lane.b32.xlu0 %v1310_v31, %s2439_s10 }
  0x64   :  { %v1319_v35 = vld [vmem:[#allocation0 + $0x183] ss:$8 sm:$0xf0]   ;;  %374 = vst [vmem:[#allocation0 + $0x3b0] sm:$0xf] %v2226_v32 }
  0x65   :  { %379 = vst [vmem:[#allocation0 + $0x3a8] sm:$0xf] %v2227_v33  ;;  %384 = vst [vmem:[#allocation0 + $0x3a0] sm:$0xf] %v2228_v34  ;;  %v2229_v36 = vld [vmem:[%s3580_s0 + $0x1cc] sm:$0xf] }
  0x66   :  { %389 = vst [vmem:[#allocation0 + $0x398] sm:$0xf] %v2229_v36  ;;  %v2230_v37 = vld [vmem:[%s3580_s0 + $0x1c8] sm:$0xf]  ;;  %v2231_v38 = vld [vmem:[%s3580_s0 + $0x1c4] sm:$0xf] }
  0x67   :  { %v2232_v39 = vld [vmem:[%s3580_s0 + $0x1c0] sm:$0xf]  ;;  %394 = vst [vmem:[#allocation0 + $0x390] sm:$0xf] %v2230_v37  ;;  %399 = vst [vmem:[#allocation0 + $0x388] sm:$0xf] %v2231_v38 }
  0x68   :  { %v1317_v40 = vld [vmem:[#allocation0 + $0x183] ss:$8 sm:$0xf]   ;;  %404 = vst [vmem:[#allocation0 + $0x380] sm:$0xf] %v2232_v39 }
  0x69   :  { %v2193_v41 = vld [vmem:[%s3580_s0 + $0x25c] sm:$0xf]  ;;  %v1321_v42 = vsel %vm963_vm0, %v1319_v35, %v1317_v40  ;;  %v1330_v43 = vld [vmem:[#allocation0 + $0x283] ss:$8 sm:$0xf0]  }
  0x6a   :  { %209 = vst [vmem:[#allocation0 + $0x4b8] sm:$0xf] %v2193_v41  ;;  %v2194_v44 = vld [vmem:[%s3580_s0 + $0x258] sm:$0xf]  ;;  %1322 = vrot.lane.b32.xlu1 %v1321_v42, %s2439_s10  ;;  %v2195_v45 = vld [vmem:[%s3580_s0 + $0x254] sm:$0xf] }
  0x6b   :  { %214 = vst [vmem:[#allocation0 + $0x4b0] sm:$0xf] %v2194_v44  ;;  %v2196_v46 = vld [vmem:[%s3580_s0 + $0x250] sm:$0xf]  ;;  %v2197_v47 = vld [vmem:[%s3580_s0 + $0x24c] sm:$0xf] }
  0x6c   :  { %v1328_v48 = vld [vmem:[#allocation0 + $0x283] ss:$8 sm:$0xf]   ;;  %219 = vst [vmem:[#allocation0 + $0x4a8] sm:$0xf] %v2195_v45 }
  0x6d   :  { %224 = vst [vmem:[#allocation0 + $0x4a0] sm:$0xf] %v2196_v46  ;;  %229 = vst [vmem:[#allocation0 + $0x498] sm:$0xf] %v2197_v47  ;;  %v2198_v49 = vld [vmem:[%s3580_s0 + $0x248] sm:$0xf]  ;;  %v1332_v50 = vsel %vm963_vm0, %v1330_v43, %v1328_v48 }
  0x6e   :  { %234 = vst [vmem:[#allocation0 + $0x490] sm:$0xf] %v2198_v49  ;;  %v2199_v51 = vld [vmem:[%s3580_s0 + $0x244] sm:$0xf]  ;;  %v2200_v52 = vld [vmem:[%s3580_s0 + $0x240] sm:$0xf]  ;;  %1333 = vrot.lane.b32.xlu0 %v1332_v50, %s2439_s10 }
  0x6f   :  { %v2161_v53 = vld [vmem:[%s3580_s0 + $0x2dc] sm:$0xf]  ;;  %v1341_v54 = vld [vmem:[#allocation0 + $0x383] ss:$8 sm:$0xf0]  }
  0x70   :  { %239 = vst [vmem:[#allocation0 + $0x488] sm:$0xf] %v2199_v51  ;;  %244 = vst [vmem:[#allocation0 + $0x480] sm:$0xf] %v2200_v52  ;;  %v2162_v55 = vld [vmem:[%s3580_s0 + $0x2d8] sm:$0xf] }
  0x71   :  { %49 = vst [vmem:[#allocation0 + $0x5b8] sm:$0xf] %v2161_v53  ;;  %54 = vst [vmem:[#allocation0 + $0x5b0] sm:$0xf] %v2162_v55  ;;  %v2163_v56 = vld [vmem:[%s3580_s0 + $0x2d4] sm:$0xf] }
  0x72   :  { %v2164_v57 = vld [vmem:[%s3580_s0 + $0x2d0] sm:$0xf]  ;;  %v2165_v58 = vld [vmem:[%s3580_s0 + $0x2cc] sm:$0xf]  ;;  %59 = vst [vmem:[#allocation0 + $0x5a8] sm:$0xf] %v2163_v56 }
  0x73   :  { %v1339_v59 = vld [vmem:[#allocation0 + $0x383] ss:$8 sm:$0xf]   ;;  %64 = vst [vmem:[#allocation0 + $0x5a0] sm:$0xf] %v2164_v57 }
  0x74   :  { %69 = vst [vmem:[#allocation0 + $0x598] sm:$0xf] %v2165_v58  ;;  %v2166_v60 = vld [vmem:[%s3580_s0 + $0x2c8] sm:$0xf]  ;;  %v1343_v61 = vsel %vm963_vm0, %v1341_v54, %v1339_v59  ;;  %v2167_v62 = vld [vmem:[%s3580_s0 + $0x2c4] sm:$0xf] }
  0x75   :  { %74 = vst [vmem:[#allocation0 + $0x590] sm:$0xf] %v2166_v60  ;;  %v2168_v63 = vld [vmem:[%s3580_s0 + $0x2c0] sm:$0xf]  ;;  %v2313_v0 = vld [vmem:[%s3580_s0 + $0x7c] sm:$0xf]  ;;  %1344 = vrot.lane.b32.xlu1 %v1343_v61, %s2439_s10 }
  0x76   :  { %79 = vst [vmem:[#allocation0 + $0x588] sm:$0xf] %v2167_v62  ;;  %84 = vst [vmem:[#allocation0 + $0x580] sm:$0xf] %v2168_v63  ;;  %v2314_v1 = vld [vmem:[%s3580_s0 + $0x78] sm:$0xf] }
  0x77   :  { %809 = vst [vmem:[#allocation0 + $0xf8] sm:$0xf] %v2313_v0  ;;  %v2315_v2 = vld [vmem:[%s3580_s0 + $0x74] sm:$0xf]  ;;  %v2316_v3 = vld [vmem:[%s3580_s0 + $0x70] sm:$0xf] }
  0x78   :  { %v1352_v4 = vld [vmem:[#allocation0 + $0x483] ss:$8 sm:$0xf0]   ;;  %814 = vst [vmem:[#allocation0 + $0xf0] sm:$0xf] %v2314_v1 }
  0x79   :  { %819 = vst [vmem:[#allocation0 + $0xe8] sm:$0xf] %v2315_v2  ;;  %824 = vst [vmem:[#allocation0 + $0xe0] sm:$0xf] %v2316_v3  ;;  %v2317_v5 = vld [vmem:[%s3580_s0 + $0x6c] sm:$0xf] }
  0x7a   :  { %829 = vst [vmem:[#allocation0 + $0xd8] sm:$0xf] %v2317_v5  ;;  %v2318_v6 = vld [vmem:[%s3580_s0 + $0x68] sm:$0xf]  ;;  %v2319_v7 = vld [vmem:[%s3580_s0 + $0x64] sm:$0xf] }
  0x7b   :  { %v2320_v8 = vld [vmem:[%s3580_s0 + $0x60] sm:$0xf]  ;;  %834 = vst [vmem:[#allocation0 + $0xd0] sm:$0xf] %v2318_v6  ;;  %839 = vst [vmem:[#allocation0 + $0xc8] sm:$0xf] %v2319_v7 }
  0x7c   :  { %v1350_v9 = vld [vmem:[#allocation0 + $0x483] ss:$8 sm:$0xf]   ;;  %844 = vst [vmem:[#allocation0 + $0xc0] sm:$0xf] %v2320_v8 }
  0x7d   :  { %v2281_v10 = vld [vmem:[%s3580_s0 + $0xfc] sm:$0xf]  ;;  %v1354_v11 = vsel %vm963_vm0, %v1352_v4, %v1350_v9  ;;  %v2282_v12 = vld [vmem:[%s3580_s0 + $0xf8] sm:$0xf]  ;;  %v2283_v13 = vld [vmem:[%s3580_s0 + $0xf4] sm:$0xf] }
  0x7e   :  { %649 = vst [vmem:[#allocation0 + $0x1f8] sm:$0xf] %v2281_v10  ;;  %v2284_v14 = vld [vmem:[%s3580_s0 + $0xf0] sm:$0xf]  ;;  %1355 = vrot.lane.b32.xlu0 %v1354_v11, %s2439_s10  ;;  %654 = vst [vmem:[#allocation0 + $0x1f0] sm:$0xf] %v2282_v12 }
  0x7f   :  { %v1363_v15 = vld [vmem:[#allocation0 + $0x583] ss:$8 sm:$0xf0]   ;;  %659 = vst [vmem:[#allocation0 + $0x1e8] sm:$0xf] %v2283_v13 }
  0x80   :  { %664 = vst [vmem:[#allocation0 + $0x1e0] sm:$0xf] %v2284_v14  ;;  %v2285_v16 = vld [vmem:[%s3580_s0 + $0xec] sm:$0xf]  ;;  %v2286_v17 = vld [vmem:[%s3580_s0 + $0xe8] sm:$0xf] }
  0x81   :  { %669 = vst [vmem:[#allocation0 + $0x1d8] sm:$0xf] %v2285_v16  ;;  %v2287_v18 = vld [vmem:[%s3580_s0 + $0xe4] sm:$0xf]  ;;  %v2288_v19 = vld [vmem:[%s3580_s0 + $0xe0] sm:$0xf] }
  0x82   :  { %v1361_v20 = vld [vmem:[#allocation0 + $0x583] ss:$8 sm:$0xf]   ;;  %674 = vst [vmem:[#allocation0 + $0x1d0] sm:$0xf] %v2286_v17 }
  0x83   :  { %679 = vst [vmem:[#allocation0 + $0x1c8] sm:$0xf] %v2287_v18  ;;  %684 = vst [vmem:[#allocation0 + $0x1c0] sm:$0xf] %v2288_v19  ;;  %v2249_v21 = vld [vmem:[%s3580_s0 + $0x17c] sm:$0xf]  ;;  %v1365_v22 = vsel %vm963_vm0, %v1363_v15, %v1361_v20 }
  0x84   :  { %v1374_v23 = vld [vmem:[#allocation0 + $0xc3] ss:$8 sm:$0xf0]   ;;  %489 = vst [vmem:[#allocation0 + $0x2f8] sm:$0xf] %v2249_v21  ;;  %1366 = vrot.lane.b32.xlu1 %v1365_v22, %s2439_s10 }
  0x85   :  { %v2250_v24 = vld [vmem:[%s3580_s0 + $0x178] sm:$0xf]  ;;  %v2251_v25 = vld [vmem:[%s3580_s0 + $0x174] sm:$0xf]  ;;  %v2252_v26 = vld [vmem:[%s3580_s0 + $0x170] sm:$0xf] }
  0x86   :  { %494 = vst [vmem:[#allocation0 + $0x2f0] sm:$0xf] %v2250_v24  ;;  %v2253_v27 = vld [vmem:[%s3580_s0 + $0x16c] sm:$0xf]  ;;  %499 = vst [vmem:[#allocation0 + $0x2e8] sm:$0xf] %v2251_v25 }
  0x87   :  { %v1372_v28 = vld [vmem:[#allocation0 + $0xc3] ss:$8 sm:$0xf]   ;;  %504 = vst [vmem:[#allocation0 + $0x2e0] sm:$0xf] %v2252_v26 }
  0x88   :  { %509 = vst [vmem:[#allocation0 + $0x2d8] sm:$0xf] %v2253_v27  ;;  %v2254_v29 = vld [vmem:[%s3580_s0 + $0x168] sm:$0xf]  ;;  %v1376_v30 = vsel %vm963_vm0, %v1374_v23, %v1372_v28  ;;  %v2255_v31 = vld [vmem:[%s3580_s0 + $0x164] sm:$0xf] }
  0x89   :  { %514 = vst [vmem:[#allocation0 + $0x2d0] sm:$0xf] %v2254_v29  ;;  %v2256_v32 = vld [vmem:[%s3580_s0 + $0x160] sm:$0xf]  ;;  %v2217_v33 = vld [vmem:[%s3580_s0 + $0x1fc] sm:$0xf]  ;;  %1377 = vrot.lane.b32.xlu0 %v1376_v30, %s2439_s10 }
  0x8a   :  { %v1385_v34 = vld [vmem:[#allocation0 + $0x1c3] ss:$8 sm:$0xf0]   ;;  %519 = vst [vmem:[#allocation0 + $0x2c8] sm:$0xf] %v2255_v31 }
  0x8b   :  { %524 = vst [vmem:[#allocation0 + $0x2c0] sm:$0xf] %v2256_v32  ;;  %329 = vst [vmem:[#allocation0 + $0x3f8] sm:$0xf] %v2217_v33  ;;  %v2218_v35 = vld [vmem:[%s3580_s0 + $0x1f8] sm:$0xf] }
  0x8c   :  { %334 = vst [vmem:[#allocation0 + $0x3f0] sm:$0xf] %v2218_v35  ;;  %v2219_v36 = vld [vmem:[%s3580_s0 + $0x1f4] sm:$0xf]  ;;  %v2220_v37 = vld [vmem:[%s3580_s0 + $0x1f0] sm:$0xf] }
  0x8d   :  { %v2221_v38 = vld [vmem:[%s3580_s0 + $0x1ec] sm:$0xf]  ;;  %v1383_v39 = vld [vmem:[#allocation0 + $0x1c3] ss:$8 sm:$0xf]  }
  0x8e   :  { %339 = vst [vmem:[#allocation0 + $0x3e8] sm:$0xf] %v2219_v36  ;;  %344 = vst [vmem:[#allocation0 + $0x3e0] sm:$0xf] %v2220_v37  ;;  %v2222_v40 = vld [vmem:[%s3580_s0 + $0x1e8] sm:$0xf]  ;;  %v1387_v41 = vsel %vm963_vm0, %v1385_v34, %v1383_v39 }
  0x8f   :  { %349 = vst [vmem:[#allocation0 + $0x3d8] sm:$0xf] %v2221_v38  ;;  %354 = vst [vmem:[#allocation0 + $0x3d0] sm:$0xf] %v2222_v40  ;;  %v2223_v42 = vld [vmem:[%s3580_s0 + $0x1e4] sm:$0xf]  ;;  %1388 = vrot.lane.b32.xlu1 %v1387_v41, %s2439_s10 }
  0x90   :  { %v2224_v43 = vld [vmem:[%s3580_s0 + $0x1e0] sm:$0xf]  ;;  %v2185_v44 = vld [vmem:[%s3580_s0 + $0x27c] sm:$0xf]  ;;  %359 = vst [vmem:[#allocation0 + $0x3c8] sm:$0xf] %v2223_v42 }
  0x91   :  { %364 = vst [vmem:[#allocation0 + $0x3c0] sm:$0xf] %v2224_v43  ;;  %169 = vst [vmem:[#allocation0 + $0x4f8] sm:$0xf] %v2185_v44  ;;  %v2186_v45 = vld [vmem:[%s3580_s0 + $0x278] sm:$0xf] }
  0x92   :  { %v2187_v46 = vld [vmem:[%s3580_s0 + $0x274] sm:$0xf]  ;;  %v2188_v47 = vld [vmem:[%s3580_s0 + $0x270] sm:$0xf]  ;;  %174 = vst [vmem:[#allocation0 + $0x4f0] sm:$0xf] %v2186_v45 }
  0x93   :  { %v1396_v48 = vld [vmem:[#allocation0 + $0x2c3] ss:$8 sm:$0xf0]   ;;  %179 = vst [vmem:[#allocation0 + $0x4e8] sm:$0xf] %v2187_v46 }
  0x94   :  { %184 = vst [vmem:[#allocation0 + $0x4e0] sm:$0xf] %v2188_v47  ;;  %v2189_v49 = vld [vmem:[%s3580_s0 + $0x26c] sm:$0xf]  ;;  %v2190_v50 = vld [vmem:[%s3580_s0 + $0x268] sm:$0xf] }
  0x95   :  { %189 = vst [vmem:[#allocation0 + $0x4d8] sm:$0xf] %v2189_v49  ;;  %v2191_v51 = vld [vmem:[%s3580_s0 + $0x264] sm:$0xf]  ;;  %v2192_v52 = vld [vmem:[%s3580_s0 + $0x260] sm:$0xf] }
  0x96   :  { %v1394_v53 = vld [vmem:[#allocation0 + $0x2c3] ss:$8 sm:$0xf]   ;;  %194 = vst [vmem:[#allocation0 + $0x4d0] sm:$0xf] %v2190_v50 }
  0x97   :  { %199 = vst [vmem:[#allocation0 + $0x4c8] sm:$0xf] %v2191_v51  ;;  %204 = vst [vmem:[#allocation0 + $0x4c0] sm:$0xf] %v2192_v52  ;;  %v2153_v54 = vld [vmem:[%s3580_s0 + $0x2fc] sm:$0xf]  ;;  %v1398_v55 = vsel %vm963_vm0, %v1396_v48, %v1394_v53  ;;  %v1181_v51 = vpop.permute.xlu0 %1180  }
  0x98   :  { %9 = vst [vmem:[#allocation0 + $0x5f8] sm:$0xf] %v2153_v54  ;;  %v2154_v56 = vld [vmem:[%s3580_s0 + $0x2f8] sm:$0xf]  ;;  %v2155_v57 = vld [vmem:[%s3580_s0 + $0x2f4] sm:$0xf]  ;;  %1399 = vrot.lane.b32.xlu0 %v1398_v55, %s2439_s10 }
  0x99   :  { %v2156_v58 = vld [vmem:[%s3580_s0 + $0x2f0] sm:$0xf]  ;;  %14 = vst [vmem:[#allocation0 + $0x5f0] sm:$0xf] %v2154_v56  ;;  %19 = vst [vmem:[#allocation0 + $0x5e8] sm:$0xf] %v2155_v57 }
  0x9a   :  { %v1407_v59 = vld [vmem:[#allocation0 + $0x3c3] ss:$8 sm:$0xf0]   ;;  %24 = vst [vmem:[#allocation0 + $0x5e0] sm:$0xf] %v2156_v58 }
  0x9b   :  { %v2157_v60 = vld [vmem:[%s3580_s0 + $0x2ec] sm:$0xf]  ;;  %v2158_v61 = vld [vmem:[%s3580_s0 + $0x2e8] sm:$0xf]  ;;  %v2159_v62 = vld [vmem:[%s3580_s0 + $0x2e4] sm:$0xf] }
  0x9c   :  { %29 = vst [vmem:[#allocation0 + $0x5d8] sm:$0xf] %v2157_v60  ;;  %v2160_v63 = vld [vmem:[%s3580_s0 + $0x2e0] sm:$0xf]  ;;  %34 = vst [vmem:[#allocation0 + $0x5d0] sm:$0xf] %v2158_v61 }
  0x9d   :  { %v1405_v0 = vld [vmem:[#allocation0 + $0x3c3] ss:$8 sm:$0xf]   ;;  %39 = vst [vmem:[#allocation0 + $0x5c8] sm:$0xf] %v2159_v62  ;;  %s2440_s0 = smov 64  }
  0x9e   :  { %44 = vst [vmem:[#allocation0 + $0x5c0] sm:$0xf] %v2160_v63  ;;  %v1409_v1 = vsel %vm963_vm0, %v1407_v59, %v1405_v0  ;;  %v1418_v2 = vld [vmem:[#allocation0 + $0x4c3] ss:$8 sm:$0xf0]   ;;  %v1202_v59 = vpop.permute.xlu1 %1201  }
  0x9f   :  { %1410 = vrot.lane.b32.xlu1 %v1409_v1, %s2439_s10  ;;  %v1438_v3 = vld [vmem:[#allocation0 + $0x2] ss:$8 sm:$0xf]   ;;  %v1416_v4 = vld [vmem:[#allocation0 + $0x4c3] ss:$8 sm:$0xf]  }
  0xa0   :  { %v1440_v5 = vld [vmem:[#allocation0 + $0x2] ss:$8 sm:$0xf0]   ;;  %v1420_v6 = vsel %vm963_vm0, %v1418_v2, %v1416_v4  ;;  %v961_v58 = vld [vmem:[#allocation0] ss:$8 sm:$0xf]  }
  0xa1   :  { %1421 = vrot.lane.b32.xlu0 %v1420_v6, %s2439_s10  ;;  %v1429_v7 = vld [vmem:[#allocation0 + $0x5c3] ss:$8 sm:$0xf0]   ;;  %v1448_v8 = vld [vmem:[#allocation0 + $0x102] ss:$8 sm:$0xf]   ;;  %v1442_v9 = vsel %vm963_vm0, %v1440_v5, %v1438_v3 }
  0xa2   :  { %v1450_v10 = vld [vmem:[#allocation0 + $0x102] ss:$8 sm:$0xf0]   ;;  %v962_v61 = vld [vmem:[#allocation0] ss:$8 sm:$0xf0]  }
  0xa3   :  { %v1459_v11 = vld [vmem:[#allocation0 + $0x202] ss:$8 sm:$0xf]   ;;  %v1452_v15 = vsel %vm963_vm0, %v1450_v10, %v1448_v8  ;;  %v1031_v62 = vld [vmem:[#allocation0 + $0x200] ss:$8 sm:$0xf]   ;;  %v964_v2 = vsel %vm963_vm0, %v962_v61, %v961_v58 }
  0xa4   :  { %v1461_v13 = vld [vmem:[#allocation0 + $0x202] ss:$8 sm:$0xf0]   ;;  %v1033_v3 = vld [vmem:[#allocation0 + $0x200] ss:$8 sm:$0xf0]  }
  0xa5   :  { %v1427_v12 = vld [vmem:[#allocation0 + $0x5c3] ss:$8 sm:$0xf]   ;;  %1443 = vrot.lane.b32.xlu0 %v1442_v9, %s2440_s0  ;;  %v1463_v16 = vsel %vm963_vm0, %v1461_v13, %v1459_v11  ;;  %v1470_v17 = vld [vmem:[#allocation0 + $0x302] ss:$8 sm:$0xf]   ;;  %v1035_v6 = vsel %vm963_vm0, %v1033_v3, %v1031_v62 }
  0xa6   :  { %v1431_v14 = vsel %vm963_vm0, %v1429_v7, %v1427_v12  ;;  %v1472_v18 = vld [vmem:[#allocation0 + $0x302] ss:$8 sm:$0xf0]   ;;  %966 = vst.msk [vmem:[%s3581_s1] sm:$0xff] %vm965_vm1, %v964_v2   ;;  %v1191_v7 = vpop.permute.xlu0 %1190   ;;  %2351 = vst.msk [vmem:[%s3581_s1 + $0x40] sm:$0xff] %vm965_vm1, %v1035_v6  }
  0xa7   :  { %1432 = vrot.lane.b32.xlu1 %v1431_v14, %s2439_s10  ;;  %v1481_v19 = vld [vmem:[#allocation0 + $0x402] ss:$8 sm:$0xf]   ;;  %v1474_v21 = vsel %vm963_vm0, %v1472_v18, %v1470_v17  ;;  %1183 = vst.msk [vmem:[%s3581_s1] sm:$0xff] %vm1182_vm2, %v1181_v51   ;;  %2368 = vst.msk [vmem:[%s3581_s1 + $0x40] sm:$0xff] %vm1182_vm2, %v1202_v59  }
  0xa8   :  { %v1483_v20 = vld [vmem:[#allocation0 + $0x402] ss:$8 sm:$0xf0]   ;;  %v995_v8 = vld [vmem:[#allocation0 + $0x100] ss:$8 sm:$0xf]  }
  0xa9   :  { %1464 = vrot.lane.b32.xlu0 %v1463_v16, %s2440_s0  ;;  %v1485_v22 = vsel %vm963_vm0, %v1483_v20, %v1481_v19  ;;  %v1492_v23 = vld [vmem:[#allocation0 + $0x502] ss:$8 sm:$0xf]   ;;  %v997_v10 = vld [vmem:[#allocation0 + $0x100] ss:$8 sm:$0xf0]   ;;  %v1213_v19 = vpop.permute.xlu1 %1212  }
  0xaa   :  { %v1494_v24 = vld [vmem:[#allocation0 + $0x502] ss:$8 sm:$0xf0]   ;;  %v1067_v11 = vld [vmem:[#allocation0 + $0x300] ss:$8 sm:$0xf]  }
  0xab   :  { %1453 = vrot.lane.b32.xlu1 %v1452_v15, %s2440_s0  ;;  %v1503_v25 = vld [vmem:[#allocation0 + $0x42] ss:$8 sm:$0xf]   ;;  %v1496_v27 = vsel %vm963_vm0, %v1494_v24, %v1492_v23  ;;  %v999_v15 = vsel %vm963_vm0, %v997_v10, %v995_v8  ;;  %v1069_v16 = vld [vmem:[#allocation0 + $0x300] ss:$8 sm:$0xf0]  }
  0xac   :  { %v1505_v26 = vld [vmem:[#allocation0 + $0x42] ss:$8 sm:$0xf0]   ;;  %2347 = vst.msk [vmem:[%s3581_s1 + $0x20] sm:$0xff] %vm965_vm1, %v999_v15   ;;  %v1071_v20 = vsel %vm963_vm0, %v1069_v16, %v1067_v11 }
  0xad   :  { %1486 = vrot.lane.b32.xlu0 %v1485_v22, %s2440_s0  ;;  %v1507_v28 = vsel %vm963_vm0, %v1505_v26, %v1503_v25  ;;  %v1514_v29 = vld [vmem:[#allocation0 + $0x142] ss:$8 sm:$0xf]   ;;  %2367 = vst.msk [vmem:[%s3581_s1 + $0x20] sm:$0xff] %vm1182_vm2, %v1191_v7  }
  0xae   :  { %v1516_v30 = vld [vmem:[#allocation0 + $0x142] ss:$8 sm:$0xf0]   ;;  %2355 = vst.msk [vmem:[%s3581_s1 + $0x60] sm:$0xff] %vm965_vm1, %v1071_v20  }
  0xaf   :  { %1475 = vrot.lane.b32.xlu1 %v1474_v21, %s2440_s0  ;;  %v1525_v31 = vld [vmem:[#allocation0 + $0x242] ss:$8 sm:$0xf]   ;;  %v1518_v33 = vsel %vm963_vm0, %v1516_v30, %v1514_v29  ;;  %v1103_v21 = vld [vmem:[#allocation0 + $0x400] ss:$8 sm:$0xf]  }
  0xb0   :  { %v1527_v32 = vld [vmem:[#allocation0 + $0x242] ss:$8 sm:$0xf0]   ;;  %2369 = vst.msk [vmem:[%s3581_s1 + $0x60] sm:$0xff] %vm1182_vm2, %v1213_v19  }
  0xb1   :  { %1508 = vrot.lane.b32.xlu0 %v1507_v28, %s2440_s0  ;;  %v1529_v34 = vsel %vm963_vm0, %v1527_v32, %v1525_v31  ;;  %v1536_v35 = vld [vmem:[#allocation0 + $0x342] ss:$8 sm:$0xf]   ;;  %v1105_v23 = vld [vmem:[#allocation0 + $0x400] ss:$8 sm:$0xf0]  }
  0xb2   :  { %v1538_v36 = vld [vmem:[#allocation0 + $0x342] ss:$8 sm:$0xf0]   ;;  %v1139_v24 = vld [vmem:[#allocation0 + $0x500] ss:$8 sm:$0xf]   ;;  %v1107_v28 = vsel %vm963_vm0, %v1105_v23, %v1103_v21 }
  0xb3   :  { %1497 = vrot.lane.b32.xlu1 %v1496_v27, %s2440_s0  ;;  %v1547_v37 = vld [vmem:[#allocation0 + $0x442] ss:$8 sm:$0xf]   ;;  %v1540_v39 = vsel %vm963_vm0, %v1538_v36, %v1536_v35  ;;  %v1141_v29 = vld [vmem:[#allocation0 + $0x500] ss:$8 sm:$0xf0]  }
  0xb4   :  { %v1549_v38 = vld [vmem:[#allocation0 + $0x442] ss:$8 sm:$0xf0]   ;;  %2359 = vst.msk [vmem:[%s3581_s1 + $0x80] sm:$0xff] %vm965_vm1, %v1107_v28   ;;  %v1143_v32 = vsel %vm963_vm0, %v1141_v29, %v1139_v24 }
  0xb5   :  { %1530 = vrot.lane.b32.xlu0 %v1529_v34, %s2440_s0  ;;  %v1551_v40 = vsel %vm963_vm0, %v1549_v38, %v1547_v37  ;;  %v1558_v41 = vld [vmem:[#allocation0 + $0x542] ss:$8 sm:$0xf]   ;;  %2363 = vst.msk [vmem:[%s3581_s1 + $0xa0] sm:$0xff] %vm965_vm1, %v1143_v32  }
  0xb6   :  { %v1560_v42 = vld [vmem:[#allocation0 + $0x542] ss:$8 sm:$0xf0]   ;;  %v968_v34 = vld [vmem:[#allocation0 + $0x40] ss:$8 sm:$0xf]  }
  0xb7   :  { %1519 = vrot.lane.b32.xlu1 %v1518_v33, %s2440_s0  ;;  %v1569_v43 = vld [vmem:[#allocation0 + $0x82] ss:$8 sm:$0xf]   ;;  %v1562_v45 = vsel %vm963_vm0, %v1560_v42, %v1558_v41  ;;  %v1224_v33 = vpop.permute.xlu0 %1223   ;;  %v970_v36 = vld [vmem:[#allocation0 + $0x40] ss:$8 sm:$0xf0]  }
  0xb8   :  { %v1571_v44 = vld [vmem:[#allocation0 + $0x82] ss:$8 sm:$0xf0]   ;;  %2370 = vst.msk [vmem:[%s3581_s1 + $0x80] sm:$0xff] %vm1182_vm2, %v1224_v33   ;;  %v972_v41 = vsel %vm963_vm0, %v970_v36, %v968_v34 }
  0xb9   :  { %1552 = vrot.lane.b32.xlu0 %v1551_v40, %s2440_s0  ;;  %v1573_v46 = vsel %vm963_vm0, %v1571_v44, %v1569_v43  ;;  %v1580_v47 = vld [vmem:[#allocation0 + $0x182] ss:$8 sm:$0xf]   ;;  %v1004_v37 = vld [vmem:[#allocation0 + $0x140] ss:$8 sm:$0xf]  }
  0xba   :  { %v1582_v48 = vld [vmem:[#allocation0 + $0x182] ss:$8 sm:$0xf0]   ;;  %v1006_v42 = vld [vmem:[#allocation0 + $0x140] ss:$8 sm:$0xf0]  }
  0xbb   :  { %1541 = vrot.lane.b32.xlu1 %v1540_v39, %s2440_s0  ;;  %v1591_v49 = vld [vmem:[#allocation0 + $0x282] ss:$8 sm:$0xf]   ;;  %v1584_v52 = vsel %vm963_vm0, %v1582_v48, %v1580_v47  ;;  %v1701_v43 = vld [vmem:[#allocation0 + $0x1] ss:$8 sm:$0xf]   ;;  %v1246_v58 = vpop.permute.xlu0 %1245  }
  0xbc   :  { %v1593_v50 = vld [vmem:[#allocation0 + $0x282] ss:$8 sm:$0xf0]   ;;  %v1703_v44 = vld [vmem:[#allocation0 + $0x1] ss:$8 sm:$0xf0]  }
  0xbd   :  { %1574 = vrot.lane.b32.xlu0 %v1573_v46, %s2440_s0  ;;  %v1595_v53 = vsel %vm963_vm0, %v1593_v50, %v1591_v49  ;;  %v1602_v54 = vld [vmem:[#allocation0 + $0x382] ss:$8 sm:$0xf]   ;;  %2344 = vst.msk [vmem:[%s3581_s1 + $0x8] sm:$0xff] %vm965_vm1, %v972_v41   ;;  %v1235_v46 = vpop.permute.xlu1 %1234  }
  0xbe   :  { %v1604_v55 = vld [vmem:[#allocation0 + $0x382] ss:$8 sm:$0xf0]   ;;  %v1040_v47 = vld [vmem:[#allocation0 + $0x240] ss:$8 sm:$0xf]  }
  0xbf   :  { %1563 = vrot.lane.b32.xlu1 %v1562_v45, %s2440_s0  ;;  %v1613_v56 = vld [vmem:[#allocation0 + $0x482] ss:$8 sm:$0xf]   ;;  %v1606_v63 = vsel %vm963_vm0, %v1604_v55, %v1602_v54  ;;  %v1008_v45 = vsel %vm963_vm0, %v1006_v42, %v1004_v37  ;;  %v1711_v48 = vld [vmem:[#allocation0 + $0x101] ss:$8 sm:$0xf]   ;;  %v1268_v21 = vpop.permute.xlu0 %1267  }
  0xc0   :  { %v1615_v57 = vld [vmem:[#allocation0 + $0x482] ss:$8 sm:$0xf0]   ;;  %2348 = vst.msk [vmem:[%s3581_s1 + $0x28] sm:$0xff] %vm965_vm1, %v1008_v45  }
  0xc1   :  { %1596 = vrot.lane.b32.xlu0 %v1595_v53, %s2440_s0  ;;  %v1624_v60 = vld [vmem:[#allocation0 + $0x582] ss:$8 sm:$0xf]   ;;  %v1617_v0 = vsel %vm963_vm0, %v1615_v57, %v1613_v56  ;;  %2371 = vst.msk [vmem:[%s3581_s1 + $0xa0] sm:$0xff] %vm1182_vm2, %v1235_v46   ;;  %2372 = vst.msk [vmem:[%s3581_s1 + $0x8] sm:$0xff] %vm1182_vm2, %v1246_v58   ;;  %v1257_v7 = vpop.permute.xlu1 %1256  }
  0xc2   :  { %v1626_v1 = vld [vmem:[#allocation0 + $0x582] ss:$8 sm:$0xf0]   ;;  %v1042_v49 = vld [vmem:[#allocation0 + $0x240] ss:$8 sm:$0xf0]  }
  0xc3   :  { %1585 = vrot.lane.b32.xlu1 %v1584_v52, %s2440_s0  ;;  %v1635_v4 = vld [vmem:[#allocation0 + $0xc2] ss:$8 sm:$0xf]   ;;  %v1628_v12 = vsel %vm963_vm0, %v1626_v1, %v1624_v60  ;;  %v1076_v50 = vld [vmem:[#allocation0 + $0x340] ss:$8 sm:$0xf]   ;;  %v1705_v52 = vsel %vm963_vm0, %v1703_v44, %v1701_v43  ;;  %v1044_v54 = vsel %vm963_vm0, %v1042_v49, %v1040_v47 }
  0xc4   :  { %v1637_v5 = vld [vmem:[#allocation0 + $0xc2] ss:$8 sm:$0xf0]   ;;  %v1713_v53 = vld [vmem:[#allocation0 + $0x101] ss:$8 sm:$0xf0]  }
  0xc5   :  { %1618 = vrot.lane.b32.xlu0 %v1617_v0, %s2440_s0  ;;  %v1646_v9 = vld [vmem:[#allocation0 + $0x1c2] ss:$8 sm:$0xf]   ;;  %v1639_v13 = vsel %vm963_vm0, %v1637_v5, %v1635_v4  ;;  %v1078_v55 = vld [vmem:[#allocation0 + $0x340] ss:$8 sm:$0xf0]   ;;  %v1715_v0 = vsel %vm963_vm0, %v1713_v53, %v1711_v48  ;;  %v1279_v37 = vpop.permute.xlu1 %1278   ;;  %v1290_v53 = vpop.permute.xlu0 %1289  }
  0xc6   :  { %v1648_v14 = vld [vmem:[#allocation0 + $0x1c2] ss:$8 sm:$0xf0]   ;;  %v1722_v56 = vld [vmem:[#allocation0 + $0x201] ss:$8 sm:$0xf]   ;;  %v1080_v59 = vsel %vm963_vm0, %v1078_v55, %v1076_v50 }
  0xc7   :  { %1607 = vrot.lane.b32.xlu1 %v1606_v63, %s2440_s0  ;;  %v1657_v17 = vld [vmem:[#allocation0 + $0x2c2] ss:$8 sm:$0xf]   ;;  %v1650_v25 = vsel %vm963_vm0, %v1648_v14, %v1646_v9  ;;  %v1724_v57 = vld [vmem:[#allocation0 + $0x201] ss:$8 sm:$0xf0]  }
  0xc8   :  { %v1659_v18 = vld [vmem:[#allocation0 + $0x2c2] ss:$8 sm:$0xf0]   ;;  %2352 = vst.msk [vmem:[%s3581_s1 + $0x48] sm:$0xff] %vm965_vm1, %v1044_v54   ;;  %2356 = vst.msk [vmem:[%s3581_s1 + $0x68] sm:$0xff] %vm965_vm1, %v1080_v59   ;;  %v1726_v1 = vsel %vm963_vm0, %v1724_v57, %v1722_v56 }
  0xc9   :  { %1640 = vrot.lane.b32.xlu0 %v1639_v13, %s2440_s0  ;;  %v1668_v22 = vld [vmem:[#allocation0 + $0x3c2] ss:$8 sm:$0xf]   ;;  %v1661_v26 = vsel %vm963_vm0, %v1659_v18, %v1657_v17  ;;  %v1112_v60 = vld [vmem:[#allocation0 + $0x440] ss:$8 sm:$0xf]  }
  0xca   :  { %v1670_v27 = vld [vmem:[#allocation0 + $0x3c2] ss:$8 sm:$0xf0]   ;;  %v1733_v61 = vld [vmem:[#allocation0 + $0x301] ss:$8 sm:$0xf]  }
  0xcb   :  { %1629 = vrot.lane.b32.xlu1 %v1628_v12, %s2440_s0  ;;  %v1679_v30 = vld [vmem:[#allocation0 + $0x4c2] ss:$8 sm:$0xf]   ;;  %v1672_v38 = vsel %vm963_vm0, %v1670_v27, %v1668_v22  ;;  %v1114_v62 = vld [vmem:[#allocation0 + $0x440] ss:$8 sm:$0xf0]  }
  0xcc   :  { %v1681_v31 = vld [vmem:[#allocation0 + $0x4c2] ss:$8 sm:$0xf0]   ;;  %v1148_v63 = vld [vmem:[#allocation0 + $0x540] ss:$8 sm:$0xf]   ;;  %v1116_v3 = vsel %vm963_vm0, %v1114_v62, %v1112_v60 }
  0xcd   :  { %1662 = vrot.lane.b32.xlu0 %v1661_v26, %s2440_s0  ;;  %v1690_v35 = vld [vmem:[#allocation0 + $0x5c2] ss:$8 sm:$0xf]   ;;  %v1683_v39 = vsel %vm963_vm0, %v1681_v31, %v1679_v30  ;;  %v1735_v2 = vld [vmem:[#allocation0 + $0x301] ss:$8 sm:$0xf0]  }
  0xce   :  { %v1692_v40 = vld [vmem:[#allocation0 + $0x5c2] ss:$8 sm:$0xf0]   ;;  %v1150_v4 = vld [vmem:[#allocation0 + $0x540] ss:$8 sm:$0xf0]   ;;  %v1737_v13 = vsel %vm963_vm0, %v1735_v2, %v1733_v61 }
  0xcf   :  { %1651 = vrot.lane.b32.xlu1 %v1650_v25, %s2440_s0  ;;  %v1694_v51 = vsel %vm963_vm0, %v1692_v40, %v1690_v35  ;;  %v1744_v5 = vld [vmem:[#allocation0 + $0x401] ss:$8 sm:$0xf]   ;;  %2360 = vst.msk [vmem:[%s3581_s1 + $0x88] sm:$0xff] %vm965_vm1, %v1116_v3   ;;  %v1152_v8 = vsel %vm963_vm0, %v1150_v4, %v1148_v63 }
  0xd0   :  { %v1746_v6 = vld [vmem:[#allocation0 + $0x401] ss:$8 sm:$0xf0]   ;;  %2373 = vst.msk [vmem:[%s3581_s1 + $0x28] sm:$0xff] %vm1182_vm2, %v1257_v7   ;;  %2374 = vst.msk [vmem:[%s3581_s1 + $0x48] sm:$0xff] %vm1182_vm2, %v1268_v21   ;;  %v1301_v7 = vpop.permute.xlu1 %1300  }
  0xd1   :  { %1684 = vrot.lane.b32.xlu0 %v1683_v39, %s2440_s0  ;;  %2364 = vst.msk [vmem:[%s3581_s1 + $0xa8] sm:$0xff] %vm965_vm1, %v1152_v8   ;;  %v977_v9 = vld [vmem:[#allocation0 + $0x80] ss:$8 sm:$0xf]   ;;  %v1748_v14 = vsel %vm963_vm0, %v1746_v6, %v1744_v5 }
  0xd2   :  { %v1755_v10 = vld [vmem:[#allocation0 + $0x501] ss:$8 sm:$0xf]   ;;  %v979_v11 = vld [vmem:[#allocation0 + $0x80] ss:$8 sm:$0xf0]  }
  0xd3   :  { %1673 = vrot.lane.b32.xlu1 %v1672_v38, %s2440_s0  ;;  %v1013_v12 = vld [vmem:[#allocation0 + $0x180] ss:$8 sm:$0xf]   ;;  %v1757_v15 = vld [vmem:[#allocation0 + $0x501] ss:$8 sm:$0xf0]   ;;  %v981_v16 = vsel %vm963_vm0, %v979_v11, %v977_v9 }
  0xd4   :  { %v1015_v17 = vld [vmem:[#allocation0 + $0x180] ss:$8 sm:$0xf0]   ;;  %v1766_v18 = vld [vmem:[#allocation0 + $0x41] ss:$8 sm:$0xf]   ;;  %v1759_v29 = vsel %vm963_vm0, %v1757_v15, %v1755_v10 }
  0xd5   :  { %v1768_v19 = vld [vmem:[#allocation0 + $0x41] ss:$8 sm:$0xf0]   ;;  %2345 = vst.msk [vmem:[%s3581_s1 + $0x10] sm:$0xff] %vm965_vm1, %v981_v16   ;;  %v1017_v20 = vsel %vm963_vm0, %v1015_v17, %v1013_v12  ;;  %v1312_v15 = vpop.permute.xlu0 %1311  }
  0xd6   :  { %2349 = vst.msk [vmem:[%s3581_s1 + $0x30] sm:$0xff] %vm965_vm1, %v1017_v20   ;;  %v1049_v22 = vld [vmem:[#allocation0 + $0x280] ss:$8 sm:$0xf]   ;;  %v1770_v30 = vsel %vm963_vm0, %v1768_v19, %v1766_v18 }
  0xd7   :  { %1695 = vrot.lane.b32.xlu1 %v1694_v51, %s2440_s0  ;;  %s2441_s0 = smov 32   ;;  %v1777_v23 = vld [vmem:[#allocation0 + $0x141] ss:$8 sm:$0xf]   ;;  %2375 = vst.msk [vmem:[%s3581_s1 + $0x68] sm:$0xff] %vm1182_vm2, %v1279_v37   ;;  %2376 = vst.msk [vmem:[%s3581_s1 + $0x88] sm:$0xff] %vm1182_vm2, %v1290_v53  }
  0xd8   :  { %1706 = vrot.lane.b32.xlu0 %v1705_v52, %s2441_s0  ;;  %v1779_v24 = vld [vmem:[#allocation0 + $0x141] ss:$8 sm:$0xf0]   ;;  %v1051_v27 = vld [vmem:[#allocation0 + $0x280] ss:$8 sm:$0xf0]  }
  0xd9   :  { %v1788_v25 = vld [vmem:[#allocation0 + $0x241] ss:$8 sm:$0xf]   ;;  %v1085_v28 = vld [vmem:[#allocation0 + $0x380] ss:$8 sm:$0xf]   ;;  %v1053_v31 = vsel %vm963_vm0, %v1051_v27, %v1049_v22  ;;  %v1781_v48 = vsel %vm963_vm0, %v1779_v24, %v1777_v23 }
  0xda   :  { %v1790_v26 = vld [vmem:[#allocation0 + $0x241] ss:$8 sm:$0xf0]   ;;  %v1087_v32 = vld [vmem:[#allocation0 + $0x380] ss:$8 sm:$0xf0]  }
  0xdb   :  { %1716 = vrot.lane.b32.xlu1 %v1715_v0, %s2441_s0  ;;  %v1121_v33 = vld [vmem:[#allocation0 + $0x480] ss:$8 sm:$0xf]   ;;  %2353 = vst.msk [vmem:[%s3581_s1 + $0x50] sm:$0xff] %vm965_vm1, %v1053_v31   ;;  %v1089_v34 = vsel %vm963_vm0, %v1087_v32, %v1085_v28  ;;  %v1792_v49 = vsel %vm963_vm0, %v1790_v26, %v1788_v25 }
  0xdc   :  { %1727 = vrot.lane.b32.xlu0 %v1726_v1, %s2441_s0  ;;  %v1123_v35 = vld [vmem:[#allocation0 + $0x480] ss:$8 sm:$0xf0]   ;;  %2357 = vst.msk [vmem:[%s3581_s1 + $0x70] sm:$0xff] %vm965_vm1, %v1089_v34   ;;  %v1323_v22 = vpop.permute.xlu1 %1322  }
  0xdd   :  { %v1157_v36 = vld [vmem:[#allocation0 + $0x580] ss:$8 sm:$0xf]   ;;  %v1125_v38 = vsel %vm963_vm0, %v1123_v35, %v1121_v33  ;;  %v1799_v41 = vld [vmem:[#allocation0 + $0x341] ss:$8 sm:$0xf]  }
  0xde   :  { %v1159_v39 = vld [vmem:[#allocation0 + $0x580] ss:$8 sm:$0xf0]   ;;  %v1801_v42 = vld [vmem:[#allocation0 + $0x341] ss:$8 sm:$0xf0]  }
  0xdf   :  { %1738 = vrot.lane.b32.xlu1 %v1737_v13, %s2441_s0  ;;  %v986_v40 = vld [vmem:[#allocation0 + $0xc0] ss:$8 sm:$0xf]   ;;  %v1810_v43 = vld [vmem:[#allocation0 + $0x441] ss:$8 sm:$0xf]   ;;  %v1161_v45 = vsel %vm963_vm0, %v1159_v39, %v1157_v36  ;;  %v1803_v0 = vsel %vm963_vm0, %v1801_v42, %v1799_v41 }
  0xe0   :  { %1749 = vrot.lane.b32.xlu0 %v1748_v14, %s2441_s0  ;;  %v1812_v44 = vld [vmem:[#allocation0 + $0x441] ss:$8 sm:$0xf0]   ;;  %2361 = vst.msk [vmem:[%s3581_s1 + $0x90] sm:$0xff] %vm965_vm1, %v1125_v38   ;;  %2365 = vst.msk [vmem:[%s3581_s1 + $0xb0] sm:$0xff] %vm965_vm1, %v1161_v45  }
  0xe1   :  { %v988_v46 = vld [vmem:[#allocation0 + $0xc0] ss:$8 sm:$0xf0]   ;;  %v1821_v60 = vld [vmem:[#allocation0 + $0x541] ss:$8 sm:$0xf]   ;;  %v1814_v1 = vsel %vm963_vm0, %v1812_v44, %v1810_v43 }
  0xe2   :  { %v1022_v47 = vld [vmem:[#allocation0 + $0x1c0] ss:$8 sm:$0xf]   ;;  %v990_v50 = vsel %vm963_vm0, %v988_v46, %v986_v40  ;;  %v1823_v2 = vld [vmem:[#allocation0 + $0x541] ss:$8 sm:$0xf0]  }
  0xe3   :  { %1760 = vrot.lane.b32.xlu1 %v1759_v29, %s2441_s0  ;;  %v1024_v51 = vld [vmem:[#allocation0 + $0x1c0] ss:$8 sm:$0xf0]   ;;  %2346 = vst.msk [vmem:[%s3581_s1 + $0x18] sm:$0xff] %vm965_vm1, %v990_v50   ;;  %v1825_v9 = vsel %vm963_vm0, %v1823_v2, %v1821_v60  ;;  %v1334_v29 = vpop.permute.xlu0 %1333  }
  0xe4   :  { %1771 = vrot.lane.b32.xlu0 %v1770_v30, %s2441_s0  ;;  %v1058_v52 = vld [vmem:[#allocation0 + $0x2c0] ss:$8 sm:$0xf]   ;;  %v1026_v54 = vsel %vm963_vm0, %v1024_v51, %v1022_v47  ;;  %v1832_v5 = vld [vmem:[#allocation0 + $0x81] ss:$8 sm:$0xf]  }
  0xe5   :  { %v1060_v55 = vld [vmem:[#allocation0 + $0x2c0] ss:$8 sm:$0xf0]   ;;  %2350 = vst.msk [vmem:[%s3581_s1 + $0x38] sm:$0xff] %vm965_vm1, %v1026_v54  }
  0xe6   :  { %v1094_v56 = vld [vmem:[#allocation0 + $0x3c0] ss:$8 sm:$0xf]   ;;  %v1062_v57 = vsel %vm963_vm0, %v1060_v55, %v1058_v52  ;;  %v1834_v6 = vld [vmem:[#allocation0 + $0x81] ss:$8 sm:$0xf0]  }
  0xe7   :  { %v1096_v58 = vld [vmem:[#allocation0 + $0x3c0] ss:$8 sm:$0xf0]   ;;  %1782 = vrot.lane.b32.xlu1 %v1781_v48, %s2441_s0  ;;  %2354 = vst.msk [vmem:[%s3581_s1 + $0x58] sm:$0xff] %vm965_vm1, %v1062_v57   ;;  %v1836_v10 = vsel %vm963_vm0, %v1834_v6, %v1832_v5  ;;  %v1345_v36 = vpop.permute.xlu1 %1344  }
  0xe8   :  { %v1130_v59 = vld [vmem:[#allocation0 + $0x4c0] ss:$8 sm:$0xf]   ;;  %1793 = vrot.lane.b32.xlu0 %v1792_v49, %s2441_s0  ;;  %v1098_v61 = vsel %vm963_vm0, %v1096_v58, %v1094_v56  ;;  %2377 = vst.msk [vmem:[%s3581_s1 + $0xa8] sm:$0xff] %vm1182_vm2, %v1301_v7   ;;  %2378 = vst.msk [vmem:[%s3581_s1 + $0x10] sm:$0xff] %vm1182_vm2, %v1312_v15  }
  0xe9   :  { %v1132_v62 = vld [vmem:[#allocation0 + $0x4c0] ss:$8 sm:$0xf0]   ;;  %2358 = vst.msk [vmem:[%s3581_s1 + $0x78] sm:$0xff] %vm965_vm1, %v1098_v61  }
  0xea   :  { %v1166_v63 = vld [vmem:[#allocation0 + $0x5c0] ss:$8 sm:$0xf]   ;;  %v1134_v3 = vsel %vm963_vm0, %v1132_v62, %v1130_v59  ;;  %v1843_v11 = vld [vmem:[#allocation0 + $0x181] ss:$8 sm:$0xf]  }
  0xeb   :  { %v1168_v4 = vld [vmem:[#allocation0 + $0x5c0] ss:$8 sm:$0xf0]   ;;  %2362 = vst.msk [vmem:[%s3581_s1 + $0x98] sm:$0xff] %vm965_vm1, %v1134_v3   ;;  %1804 = vrot.lane.b32.xlu1 %v1803_v0, %s2441_s0 }
  0xec   :  { %v1170_v8 = vsel %vm963_vm0, %v1168_v4, %v1166_v63  ;;  %1815 = vrot.lane.b32.xlu0 %v1814_v1, %s2441_s0  ;;  %v1845_v12 = vld [vmem:[#allocation0 + $0x181] ss:$8 sm:$0xf0]   ;;  %2379 = vst.msk [vmem:[%s3581_s1 + $0x30] sm:$0xff] %vm1182_vm2, %v1323_v22   ;;  %2380 = vst.msk [vmem:[%s3581_s1 + $0x50] sm:$0xff] %vm1182_vm2, %v1334_v29  }
  0xed   :  { %2366 = vst.msk [vmem:[%s3581_s1 + $0xb8] sm:$0xff] %vm965_vm1, %v1170_v8   ;;  %v1854_v13 = vld [vmem:[#allocation0 + $0x281] ss:$8 sm:$0xf]   ;;  %v1847_v16 = vsel %vm963_vm0, %v1845_v12, %v1843_v11 }
  0xee   :  { %v1856_v14 = vld [vmem:[#allocation0 + $0x281] ss:$8 sm:$0xf0]   ;;  %2381 = vst.msk [vmem:[%s3581_s1 + $0x70] sm:$0xff] %vm1182_vm2, %v1345_v36  }
  0xef   :  { %1826 = vrot.lane.b32.xlu1 %v1825_v9, %s2441_s0  ;;  %v1858_v17 = vsel %vm963_vm0, %v1856_v14, %v1854_v13  ;;  %v1865_v18 = vld [vmem:[#allocation0 + $0x381] ss:$8 sm:$0xf]  }
  0xf0   :  { %1837 = vrot.lane.b32.xlu0 %v1836_v10, %s2441_s0  ;;  %v1867_v19 = vld [vmem:[#allocation0 + $0x381] ss:$8 sm:$0xf0]   ;;  %v1356_v43 = vpop.permute.xlu0 %1355  }
  0xf1   :  { %v1876_v20 = vld [vmem:[#allocation0 + $0x481] ss:$8 sm:$0xf]   ;;  %v1869_v23 = vsel %vm963_vm0, %v1867_v19, %v1865_v18  ;;  %2382 = vst.msk [vmem:[%s3581_s1 + $0x90] sm:$0xff] %vm1182_vm2, %v1356_v43  }
  0xf2   :  { %v1878_v21 = vld [vmem:[#allocation0 + $0x481] ss:$8 sm:$0xf0]  }
  0xf3   :  { %1848 = vrot.lane.b32.xlu1 %v1847_v16, %s2441_s0  ;;  %v1880_v24 = vsel %vm963_vm0, %v1878_v21, %v1876_v20  ;;  %v1887_v25 = vld [vmem:[#allocation0 + $0x581] ss:$8 sm:$0xf]  }
  0xf4   :  { %1859 = vrot.lane.b32.xlu0 %v1858_v17, %s2441_s0  ;;  %v1889_v26 = vld [vmem:[#allocation0 + $0x581] ss:$8 sm:$0xf0]  }
  0xf5   :  { %v1898_v27 = vld [vmem:[#allocation0 + $0xc1] ss:$8 sm:$0xf]   ;;  %v1891_v30 = vsel %vm963_vm0, %v1889_v26, %v1887_v25 }
  0xf6   :  { %v1900_v28 = vld [vmem:[#allocation0 + $0xc1] ss:$8 sm:$0xf0]   ;;  %v1367_v48 = vpop.permute.xlu1 %1366  }
  0xf7   :  { %1870 = vrot.lane.b32.xlu1 %v1869_v23, %s2441_s0  ;;  %v1902_v31 = vsel %vm963_vm0, %v1900_v28, %v1898_v27  ;;  %v1909_v32 = vld [vmem:[#allocation0 + $0x1c1] ss:$8 sm:$0xf]   ;;  %2383 = vst.msk [vmem:[%s3581_s1 + $0xb0] sm:$0xff] %vm1182_vm2, %v1367_v48  }
  0xf8   :  { %1881 = vrot.lane.b32.xlu0 %v1880_v24, %s2441_s0  ;;  %v1911_v33 = vld [vmem:[#allocation0 + $0x1c1] ss:$8 sm:$0xf0]  }
  0xf9   :  { %v1920_v34 = vld [vmem:[#allocation0 + $0x2c1] ss:$8 sm:$0xf]   ;;  %v1913_v37 = vsel %vm963_vm0, %v1911_v33, %v1909_v32 }
  0xfa   :  { %v1922_v35 = vld [vmem:[#allocation0 + $0x2c1] ss:$8 sm:$0xf0]  }
  0xfb   :  { %1892 = vrot.lane.b32.xlu1 %v1891_v30, %s2441_s0  ;;  %v1924_v38 = vsel %vm963_vm0, %v1922_v35, %v1920_v34  ;;  %v1931_v39 = vld [vmem:[#allocation0 + $0x3c1] ss:$8 sm:$0xf]   ;;  %v1378_v50 = vpop.permute.xlu0 %1377  }
  0xfc   :  { %1903 = vrot.lane.b32.xlu0 %v1902_v31, %s2441_s0  ;;  %v1933_v40 = vld [vmem:[#allocation0 + $0x3c1] ss:$8 sm:$0xf0]   ;;  %2384 = vst.msk [vmem:[%s3581_s1 + $0x18] sm:$0xff] %vm1182_vm2, %v1378_v50  }
  0xfd   :  { %v1942_v41 = vld [vmem:[#allocation0 + $0x4c1] ss:$8 sm:$0xf]   ;;  %v1935_v44 = vsel %vm963_vm0, %v1933_v40, %v1931_v39 }
  0xfe   :  { %v1944_v42 = vld [vmem:[#allocation0 + $0x4c1] ss:$8 sm:$0xf0]  }
  0xff   :  { %1914 = vrot.lane.b32.xlu1 %v1913_v37, %s2441_s0  ;;  %v1946_v45 = vsel %vm963_vm0, %v1944_v42, %v1942_v41  ;;  %v1953_v46 = vld [vmem:[#allocation0 + $0x5c1] ss:$8 sm:$0xf]  }
 0x100   :  { %1925 = vrot.lane.b32.xlu0 %v1924_v38, %s2441_s0  ;;  %v1955_v47 = vld [vmem:[#allocation0 + $0x5c1] ss:$8 sm:$0xf0]  }
 0x101   :  { %v1957_v49 = vsel %vm963_vm0, %v1955_v47, %v1953_v46  ;;  %v1389_v51 = vpop.permute.xlu1 %1388  }
 0x102   :  { %2385 = vst.msk [vmem:[%s3581_s1 + $0x38] sm:$0xff] %vm1182_vm2, %v1389_v51  }
 0x103   :  { %1936 = vrot.lane.b32.xlu1 %v1935_v44, %s2441_s0 }
 0x104   :  { %1947 = vrot.lane.b32.xlu0 %v1946_v45, %s2441_s0 }
 0x107   :  { %1958 = vrot.lane.b32.xlu1 %v1957_v49, %s2441_s0 }
 0x10a   :  { %v1400_v52 = vpop.permute.xlu0 %1399  }
 0x10b   :  { %2386 = vst.msk [vmem:[%s3581_s1 + $0x58] sm:$0xff] %vm1182_vm2, %v1400_v52  }
 0x111   :  { %v1411_v53 = vpop.permute.xlu1 %1410  }
 0x112   :  { %2387 = vst.msk [vmem:[%s3581_s1 + $0x78] sm:$0xff] %vm1182_vm2, %v1411_v53  }
 0x113   :  { %v1422_v54 = vpop.permute.xlu0 %1421  }
 0x114   :  { %2388 = vst.msk [vmem:[%s3581_s1 + $0x98] sm:$0xff] %vm1182_vm2, %v1422_v54  }
 0x117   :  { %v1444_v56 = vpop.permute.xlu0 %1443  }
 0x118   :  { %1446 = vst.msk [vmem:[%s3581_s1] sm:$0xff] %vm1445_vm3, %v1444_v56  }
 0x119   :  { %v1433_v55 = vpop.permute.xlu1 %1432  }
 0x11a   :  { %2389 = vst.msk [vmem:[%s3581_s1 + $0xb8] sm:$0xff] %vm1182_vm2, %v1433_v55  }
 0x11b   :  { %v1465_v58 = vpop.permute.xlu0 %1464  }
 0x11c   :  { %2391 = vst.msk [vmem:[%s3581_s1 + $0x40] sm:$0xff] %vm1445_vm3, %v1465_v58  }
 0x11d   :  { %v1454_v57 = vpop.permute.xlu1 %1453  }
 0x11e   :  { %2390 = vst.msk [vmem:[%s3581_s1 + $0x20] sm:$0xff] %vm1445_vm3, %v1454_v57  }
 0x11f   :  { %v1487_v60 = vpop.permute.xlu0 %1486  }
 0x120   :  { %2393 = vst.msk [vmem:[%s3581_s1 + $0x80] sm:$0xff] %vm1445_vm3, %v1487_v60  }
 0x121   :  { %v1476_v59 = vpop.permute.xlu1 %1475  }
 0x122   :  { %2392 = vst.msk [vmem:[%s3581_s1 + $0x60] sm:$0xff] %vm1445_vm3, %v1476_v59  }
 0x123   :  { %v1509_v62 = vpop.permute.xlu0 %1508  }
 0x124   :  { %2395 = vst.msk [vmem:[%s3581_s1 + $0x8] sm:$0xff] %vm1445_vm3, %v1509_v62  }
 0x125   :  { %v1498_v61 = vpop.permute.xlu1 %1497  }
 0x126   :  { %2394 = vst.msk [vmem:[%s3581_s1 + $0xa0] sm:$0xff] %vm1445_vm3, %v1498_v61  }
 0x127   :  { %v1531_v0 = vpop.permute.xlu0 %1530  }
 0x128   :  { %2397 = vst.msk [vmem:[%s3581_s1 + $0x48] sm:$0xff] %vm1445_vm3, %v1531_v0  }
 0x129   :  { %v1520_v63 = vpop.permute.xlu1 %1519  }
 0x12a   :  { %2396 = vst.msk [vmem:[%s3581_s1 + $0x28] sm:$0xff] %vm1445_vm3, %v1520_v63  }
 0x12b   :  { %v1553_v2 = vpop.permute.xlu0 %1552  }
 0x12c   :  { %2399 = vst.msk [vmem:[%s3581_s1 + $0x88] sm:$0xff] %vm1445_vm3, %v1553_v2  }
 0x12d   :  { %v1542_v1 = vpop.permute.xlu1 %1541  }
 0x12e   :  { %2398 = vst.msk [vmem:[%s3581_s1 + $0x68] sm:$0xff] %vm1445_vm3, %v1542_v1  }
 0x12f   :  { %v1575_v4 = vpop.permute.xlu0 %1574  }
 0x130   :  { %2401 = vst.msk [vmem:[%s3581_s1 + $0x10] sm:$0xff] %vm1445_vm3, %v1575_v4  }
 0x131   :  { %v1564_v3 = vpop.permute.xlu1 %1563  }
 0x132   :  { %2400 = vst.msk [vmem:[%s3581_s1 + $0xa8] sm:$0xff] %vm1445_vm3, %v1564_v3  }
 0x133   :  { %v1597_v6 = vpop.permute.xlu0 %1596  }
 0x134   :  { %2403 = vst.msk [vmem:[%s3581_s1 + $0x50] sm:$0xff] %vm1445_vm3, %v1597_v6  }
 0x135   :  { %v1586_v5 = vpop.permute.xlu1 %1585  }
 0x136   :  { %2402 = vst.msk [vmem:[%s3581_s1 + $0x30] sm:$0xff] %vm1445_vm3, %v1586_v5  }
 0x137   :  { %v1619_v8 = vpop.permute.xlu0 %1618  }
 0x138   :  { %2405 = vst.msk [vmem:[%s3581_s1 + $0x90] sm:$0xff] %vm1445_vm3, %v1619_v8  }
 0x139   :  { %v1608_v7 = vpop.permute.xlu1 %1607  }
 0x13a   :  { %2404 = vst.msk [vmem:[%s3581_s1 + $0x70] sm:$0xff] %vm1445_vm3, %v1608_v7  }
 0x13b   :  { %v1641_v10 = vpop.permute.xlu0 %1640  }
 0x13c   :  { %2407 = vst.msk [vmem:[%s3581_s1 + $0x18] sm:$0xff] %vm1445_vm3, %v1641_v10  }
 0x13d   :  { %v1630_v9 = vpop.permute.xlu1 %1629  }
 0x13e   :  { %2406 = vst.msk [vmem:[%s3581_s1 + $0xb0] sm:$0xff] %vm1445_vm3, %v1630_v9  }
 0x13f   :  { %v1663_v12 = vpop.permute.xlu0 %1662  }
 0x140   :  { %2409 = vst.msk [vmem:[%s3581_s1 + $0x58] sm:$0xff] %vm1445_vm3, %v1663_v12  }
 0x141   :  { %v1652_v11 = vpop.permute.xlu1 %1651  }
 0x142   :  { %2408 = vst.msk [vmem:[%s3581_s1 + $0x38] sm:$0xff] %vm1445_vm3, %v1652_v11  }
 0x143   :  { %v1685_v14 = vpop.permute.xlu0 %1684  }
 0x144   :  { %2411 = vst.msk [vmem:[%s3581_s1 + $0x98] sm:$0xff] %vm1445_vm3, %v1685_v14  }
 0x145   :  { %v1674_v13 = vpop.permute.xlu1 %1673  }
 0x146   :  { %2410 = vst.msk [vmem:[%s3581_s1 + $0x78] sm:$0xff] %vm1445_vm3, %v1674_v13  }
 0x149   :  { %v1696_v15 = vpop.permute.xlu1 %1695  }
 0x14a   :  { %v1707_v16 = vpop.permute.xlu0 %1706   ;;  %2412 = vst.msk [vmem:[%s3581_s1 + $0xb8] sm:$0xff] %vm1445_vm3, %v1696_v15  }
 0x14b   :  { %1709 = vst.msk [vmem:[%s3581_s1] sm:$0xff] %vm1708_vm4, %v1707_v16  }
 0x14d   :  { %v1717_v17 = vpop.permute.xlu1 %1716  }
 0x14e   :  { %v1728_v18 = vpop.permute.xlu0 %1727   ;;  %2413 = vst.msk [vmem:[%s3581_s1 + $0x20] sm:$0xff] %vm1708_vm4, %v1717_v17  }
 0x14f   :  { %2414 = vst.msk [vmem:[%s3581_s1 + $0x40] sm:$0xff] %vm1708_vm4, %v1728_v18  }
 0x151   :  { %v1739_v19 = vpop.permute.xlu1 %1738  }
 0x152   :  { %v1750_v20 = vpop.permute.xlu0 %1749   ;;  %2415 = vst.msk [vmem:[%s3581_s1 + $0x60] sm:$0xff] %vm1708_vm4, %v1739_v19  }
 0x153   :  { %2416 = vst.msk [vmem:[%s3581_s1 + $0x80] sm:$0xff] %vm1708_vm4, %v1750_v20  }
 0x155   :  { %v1761_v21 = vpop.permute.xlu1 %1760  }
 0x156   :  { %v1772_v22 = vpop.permute.xlu0 %1771   ;;  %2417 = vst.msk [vmem:[%s3581_s1 + $0xa0] sm:$0xff] %vm1708_vm4, %v1761_v21  }
 0x157   :  { %2418 = vst.msk [vmem:[%s3581_s1 + $0x8] sm:$0xff] %vm1708_vm4, %v1772_v22  }
 0x159   :  { %v1783_v23 = vpop.permute.xlu1 %1782  }
 0x15a   :  { %v1794_v24 = vpop.permute.xlu0 %1793   ;;  %2419 = vst.msk [vmem:[%s3581_s1 + $0x28] sm:$0xff] %vm1708_vm4, %v1783_v23  }
 0x15b   :  { %2420 = vst.msk [vmem:[%s3581_s1 + $0x48] sm:$0xff] %vm1708_vm4, %v1794_v24  }
 0x15d   :  { %v1805_v25 = vpop.permute.xlu1 %1804  }
 0x15e   :  { %v1816_v26 = vpop.permute.xlu0 %1815   ;;  %2421 = vst.msk [vmem:[%s3581_s1 + $0x68] sm:$0xff] %vm1708_vm4, %v1805_v25  }
 0x15f   :  { %2422 = vst.msk [vmem:[%s3581_s1 + $0x88] sm:$0xff] %vm1708_vm4, %v1816_v26  }
 0x161   :  { %v1827_v27 = vpop.permute.xlu1 %1826  }
 0x162   :  { %v1838_v28 = vpop.permute.xlu0 %1837   ;;  %2423 = vst.msk [vmem:[%s3581_s1 + $0xa8] sm:$0xff] %vm1708_vm4, %v1827_v27  }
 0x163   :  { %2424 = vst.msk [vmem:[%s3581_s1 + $0x10] sm:$0xff] %vm1708_vm4, %v1838_v28  }
 0x165   :  { %v1849_v29 = vpop.permute.xlu1 %1848  }
 0x166   :  { %v1860_v30 = vpop.permute.xlu0 %1859   ;;  %2425 = vst.msk [vmem:[%s3581_s1 + $0x30] sm:$0xff] %vm1708_vm4, %v1849_v29  }
 0x167   :  { %2426 = vst.msk [vmem:[%s3581_s1 + $0x50] sm:$0xff] %vm1708_vm4, %v1860_v30  }
 0x169   :  { %v1871_v31 = vpop.permute.xlu1 %1870  }
 0x16a   :  { %v1882_v32 = vpop.permute.xlu0 %1881   ;;  %2427 = vst.msk [vmem:[%s3581_s1 + $0x70] sm:$0xff] %vm1708_vm4, %v1871_v31  }
 0x16b   :  { %2428 = vst.msk [vmem:[%s3581_s1 + $0x90] sm:$0xff] %vm1708_vm4, %v1882_v32  }
 0x16d   :  { %v1893_v33 = vpop.permute.xlu1 %1892  }
 0x16e   :  { %v1904_v34 = vpop.permute.xlu0 %1903   ;;  %2429 = vst.msk [vmem:[%s3581_s1 + $0xb0] sm:$0xff] %vm1708_vm4, %v1893_v33  }
 0x16f   :  { %2430 = vst.msk [vmem:[%s3581_s1 + $0x18] sm:$0xff] %vm1708_vm4, %v1904_v34  }
 0x171   :  { %v1915_v35 = vpop.permute.xlu1 %1914  }
 0x172   :  { %v1926_v36 = vpop.permute.xlu0 %1925   ;;  %2431 = vst.msk [vmem:[%s3581_s1 + $0x38] sm:$0xff] %vm1708_vm4, %v1915_v35  }
 0x173   :  { %2432 = vst.msk [vmem:[%s3581_s1 + $0x58] sm:$0xff] %vm1708_vm4, %v1926_v36  }
 0x175   :  { %v1937_v37 = vpop.permute.xlu1 %1936  }
 0x176   :  { %v1948_v38 = vpop.permute.xlu0 %1947   ;;  %2433 = vst.msk [vmem:[%s3581_s1 + $0x78] sm:$0xff] %vm1708_vm4, %v1937_v37  }
 0x177   :  { %2434 = vst.msk [vmem:[%s3581_s1 + $0x98] sm:$0xff] %vm1708_vm4, %v1948_v38  }
 0x179   :  { %v1959_v39 = vpop.permute.xlu1 %1958  }
 0x17a   :  { %2435 = vst.msk [vmem:[%s3581_s1 + $0xb8] sm:$0xff] %vm1708_vm4, %v1959_v39  }

// kernel: transformer_decoder_layer.1
= control target key start
LH: loop header
LB: loop body
LE: loop exit
PB: predicated region body
PF: predicated region fallthrough
CT: control target
= control target key end

     0   :  { %vm94_vm0 = vcmask 261120   ;;  %v2160_v44 = vmov 0.0   ;;  %vm1131_vm1 = vcmask 523264   ;;  %vm1114_vm2 = vcmask 1041408   ;;  %s3401_s1 = inlined_call_operand.vmem [shape: f32[32,32], index: 1, kind: input, shape index: {}]   ;;  %s3402_s0 = inlined_call_operand.vmem [shape: f32[320,32], index: 0, kind: input, shape index: {}]   ;;  %s3403_s2 = inlined_call_operand.vmem [shape: f32[1,32], index: 2, kind: input, shape index: {}]   ;;  %s3404_s7 = inlined_call_operand.vmem [shape: f32[192,384], index: 7, kind: input, shape index: {}]   ;;  %s3405_s5 = inlined_call_operand.vmem [shape: f32[128,256], index: 5, kind: input, shape index: {}]   ;;  %s3406_s4 = inlined_call_operand.vmem [shape: f32[128,192], index: 4, kind: input, shape index: {}]   ;;  %s3407_s3 = inlined_call_operand.vmem [shape: f32[192,128], index: 3, kind: input, shape index: {}]   ;;  %s3408_s9 = inlined_call_operand.vmem [shape: f32[4,256], index: 9, kind: input, shape index: {}]   ;;  %s3409_s10 = inlined_call_operand.vmem [shape: f32[6,384], index: 10, kind: input, shape index: {}]   ;;  %s3410_s11 = inlined_call_operand.<no memory space> [shape: f32[1,1], index: 11, kind: input, shape index: {}]   ;;  %s3411_s6 = inlined_call_operand.vmem [shape: f32[1,256], index: 6, kind: input, shape index: {}]   ;;  %s3412_s8 = inlined_call_operand.vmem [shape: f32[1,384], index: 8, kind: input, shape index: {}]   ;;  %s3413_s12 = inlined_call_operand.vmem [shape: f32[6,4], index: 12, kind: output, shape index: {}]  }
   0x1   :  { %v86_v0 = vld [vmem:[%s3401_s1 + $0x18] sm:$0xff]  ;;  %v85_v1 = vld [vmem:[%s3401_s1 + $0x10] sm:$0xff]  ;;  %v43_v2 = vld [vmem:[%s3402_s0] sm:$0xff]  ;;  %vm1112_vm3 = vcmask 1040384   ;;  %vm1116_vm4 = vcmask 1042432   ;;  %vm1118_vm5 = vcmask 1043456  }
   0x2   :  { %2014 = vmatprep.subr.mxu0 %v86_v0  ;;  %v84_v3 = vld [vmem:[%s3401_s1 + $0x8] sm:$0xff]  ;;  %2022 = vmatprep.mubr.msk.f32.mxu0 %vm94_vm0, %v43_v2  ;;  %v83_v4 = vld [vmem:[%s3401_s1] sm:$0xff]  ;;  %v45_v6 = vld [vmem:[%s3402_s0 + $0x10] sm:$0xff]  ;;  %vm1120_vm6 = vcmask 1044480   ;;  %vm2162_vm7 = vmmov 0   ;;  %vm1798_vm8 = vcmask 29696  }
   0x3   :  { %2015 = vmatpush3.msra.mxu0 %v86_v0  ;;  %v44_v5 = vld [vmem:[%s3402_s0 + $0x8] sm:$0xff]  ;;  %v46_v7 = vld [vmem:[%s3402_s0 + $0x18] sm:$0xff]  ;;  %v47_v8 = vld [vmem:[%s3402_s0 + $0x20] sm:$0xff] }
   0x4   :  { %2016 = vmatprep.subr.mxu0 %v85_v1  ;;  %v48_v9 = vld [vmem:[%s3402_s0 + $0x28] sm:$0xff]  ;;  %v49_v10 = vld [vmem:[%s3402_s0 + $0x30] sm:$0xff]  ;;  %v50_v11 = vld [vmem:[%s3402_s0 + $0x38] sm:$0xff] }
   0x5   :  { %2017 = vmatpush3.msra.mxu0 %v85_v1  ;;  %v51_v12 = vld [vmem:[%s3402_s0 + $0x40] sm:$0xff]  ;;  %v52_v13 = vld [vmem:[%s3402_s0 + $0x48] sm:$0xff]  ;;  %v53_v14 = vld [vmem:[%s3402_s0 + $0x50] sm:$0xff] }
   0x6   :  { %2018 = vmatprep.subr.mxu0 %v84_v3  ;;  %v54_v15 = vld [vmem:[%s3402_s0 + $0x58] sm:$0xff]  ;;  %v55_v16 = vld [vmem:[%s3402_s0 + $0x60] sm:$0xff]  ;;  %v56_v17 = vld [vmem:[%s3402_s0 + $0x68] sm:$0xff] }
   0x7   :  { %2019 = vmatpush3.msra.mxu0 %v84_v3  ;;  %v57_v18 = vld [vmem:[%s3402_s0 + $0x70] sm:$0xff]  ;;  %v58_v19 = vld [vmem:[%s3402_s0 + $0x78] sm:$0xff]  ;;  %v59_v20 = vld [vmem:[%s3402_s0 + $0x80] sm:$0xff] }
   0x8   :  { %2020 = vmatprep.subr.mxu0 %v83_v4  ;;  %v60_v21 = vld [vmem:[%s3402_s0 + $0x88] sm:$0xff]  ;;  %v61_v22 = vld [vmem:[%s3402_s0 + $0x90] sm:$0xff]  ;;  %v62_v23 = vld [vmem:[%s3402_s0 + $0x98] sm:$0xff] }
   0x9   :  { %2021 = vmatpush3.msra.mxu0 %v83_v4  ;;  %v63_v24 = vld [vmem:[%s3402_s0 + $0xa0] sm:$0xff]  ;;  %v64_v25 = vld [vmem:[%s3402_s0 + $0xa8] sm:$0xff]  ;;  %v65_v26 = vld [vmem:[%s3402_s0 + $0xb0] sm:$0xff] }
   0xa   :  { %2023 = vmatmul.mubr.msk.f32.vlgmr.msra.gmra.mxu0 %vm94_vm0, %v44_v5  ;;  %v66_v27 = vld [vmem:[%s3402_s0 + $0xb8] sm:$0xff]  ;;  %v67_v28 = vld [vmem:[%s3402_s0 + $0xc0] sm:$0xff]  ;;  %v68_v29 = vld [vmem:[%s3402_s0 + $0xc8] sm:$0xff]  ;;  %833 = vmatprep.subr.mxu0 %v2160_v44 }
   0xb   :  { %2025 = vmatprep.mubr.msk.f32.mxu0 %vm94_vm0, %v45_v6  ;;  %v69_v30 = vld [vmem:[%s3402_s0 + $0xd0] sm:$0xff]  ;;  %v70_v31 = vld [vmem:[%s3402_s0 + $0xd8] sm:$0xff]  ;;  %v71_v32 = vld [vmem:[%s3402_s0 + $0xe0] sm:$0xff] }
   0xc   :  { %v72_v33 = vld [vmem:[%s3402_s0 + $0xe8] sm:$0xff]  ;;  %v73_v34 = vld [vmem:[%s3402_s0 + $0xf0] sm:$0xff]  ;;  %v74_v35 = vld [vmem:[%s3402_s0 + $0xf8] sm:$0xff] }
   0xd   :  { %v75_v36 = vld [vmem:[%s3402_s0 + $0x100] sm:$0xff]  ;;  %v76_v37 = vld [vmem:[%s3402_s0 + $0x108] sm:$0xff]  ;;  %v77_v38 = vld [vmem:[%s3402_s0 + $0x110] sm:$0xff] }
   0xe   :  { %2026 = vmatmul.mubr.msk.f32.gmra.mxu0 %vm94_vm0, %v46_v7  ;;  %v78_v39 = vld [vmem:[%s3402_s0 + $0x118] sm:$0xff]  ;;  %v79_v40 = vld [vmem:[%s3402_s0 + $0x120] sm:$0xff]  ;;  %v80_v41 = vld [vmem:[%s3402_s0 + $0x128] sm:$0xff] }
   0xf   :  { %2028 = vmatprep.mubr.msk.f32.mxu0 %vm94_vm0, %v47_v8  ;;  %v81_v42 = vld [vmem:[%s3402_s0 + $0x130] sm:$0xff]  ;;  %v82_v43 = vld [vmem:[%s3402_s0 + $0x138] sm:$0xff]  ;;  %v2407_v46 = vld [vmem:[%s3403_s2] ss:$0 sm:$0xff] }
  0x12   :  { %2029 = vmatmul.mubr.msk.f32.gmra.mxu0 %vm94_vm0, %v48_v9 }
  0x13   :  { %2031 = vmatprep.mubr.msk.f32.mxu0 %vm94_vm0, %v49_v10 }
  0x16   :  { %2032 = vmatmul.mubr.msk.f32.gmra.mxu0 %vm94_vm0, %v50_v11 }
  0x17   :  { %2034 = vmatprep.mubr.msk.f32.mxu0 %vm94_vm0, %v51_v12 }
  0x1a   :  { %2035 = vmatmul.mubr.msk.f32.gmra.mxu0 %vm94_vm0, %v52_v13 }
  0x1b   :  { %2037 = vmatprep.mubr.msk.f32.mxu0 %vm94_vm0, %v53_v14 }
  0x1e   :  { %2038 = vmatmul.mubr.msk.f32.gmra.mxu0 %vm94_vm0, %v54_v15 }
  0x1f   :  { %2040 = vmatprep.mubr.msk.f32.mxu0 %vm94_vm0, %v55_v16 }
  0x22   :  { %2041 = vmatmul.mubr.msk.f32.gmra.mxu0 %vm94_vm0, %v56_v17 }
  0x23   :  { %2043 = vmatprep.mubr.msk.f32.mxu0 %vm94_vm0, %v57_v18 }
  0x26   :  { %2044 = vmatmul.mubr.msk.f32.gmra.mxu0 %vm94_vm0, %v58_v19 }
  0x27   :  { %2046 = vmatprep.mubr.msk.f32.mxu0 %vm94_vm0, %v59_v20 }
  0x2a   :  { %2047 = vmatmul.mubr.msk.f32.gmra.mxu0 %vm94_vm0, %v60_v21 }
  0x2b   :  { %2049 = vmatprep.mubr.msk.f32.mxu0 %vm94_vm0, %v61_v22 }
  0x2e   :  { %2050 = vmatmul.mubr.msk.f32.gmra.mxu0 %vm94_vm0, %v62_v23 }
  0x2f   :  { %2052 = vmatprep.mubr.msk.f32.mxu0 %vm94_vm0, %v63_v24 }
  0x32   :  { %2053 = vmatmul.mubr.msk.f32.gmra.mxu0 %vm94_vm0, %v64_v25 }
  0x33   :  { %2055 = vmatprep.mubr.msk.f32.mxu0 %vm94_vm0, %v65_v26 }
  0x36   :  { %2056 = vmatmul.mubr.msk.f32.gmra.mxu0 %vm94_vm0, %v66_v27 }
  0x37   :  { %2058 = vmatprep.mubr.msk.f32.mxu0 %vm94_vm0, %v67_v28 }
  0x3a   :  { %2059 = vmatmul.mubr.msk.f32.gmra.mxu0 %vm94_vm0, %v68_v29 }
  0x3b   :  { %2061 = vmatprep.mubr.msk.f32.mxu0 %vm94_vm0, %v69_v30 }
  0x3e   :  { %2062 = vmatmul.mubr.msk.f32.gmra.mxu0 %vm94_vm0, %v70_v31 }
  0x3f   :  { %2064 = vmatprep.mubr.msk.f32.mxu0 %vm94_vm0, %v71_v32 }
  0x42   :  { %2065 = vmatmul.mubr.msk.f32.gmra.mxu0 %vm94_vm0, %v72_v33 }
  0x43   :  { %2067 = vmatprep.mubr.msk.f32.mxu0 %vm94_vm0, %v73_v34 }
  0x46   :  { %2068 = vmatmul.mubr.msk.f32.gmra.mxu0 %vm94_vm0, %v74_v35 }
  0x47   :  { %2070 = vmatprep.mubr.msk.f32.mxu0 %vm94_vm0, %v75_v36 }
  0x4a   :  { %2071 = vmatmul.mubr.msk.f32.gmra.mxu0 %vm94_vm0, %v76_v37 }
  0x4b   :  { %2073 = vmatprep.mubr.msk.f32.mxu0 %vm94_vm0, %v77_v38 }
  0x4e   :  { %2074 = vmatmul.mubr.msk.f32.gmra.mxu0 %vm94_vm0, %v78_v39 }
  0x4f   :  { %2076 = vmatprep.mubr.msk.f32.mxu0 %vm94_vm0, %v79_v40 }
  0x52   :  { %2077 = vmatmul.mubr.msk.f32.gmra.mxu0 %vm94_vm0, %v80_v41 }
  0x53   :  { %2079 = vmatprep.mubr.msk.f32.mxu0 %vm94_vm0, %v81_v42 }
  0x56   :  { %2080 = vmatmul.mubr.msk.f32.gmra.mxu0 %vm94_vm0, %v82_v43 }
  0x57   :  { %897 = vmatprep.mubr.f32.mxu0 %v2160_v44 }
  0xca   :  { %v2402_v45 = vpop.f32.mrf.mxu0 }
  0xcb   :  { %v2558_v40 = vadd.f32 %v2402_v45, %v2407_v46 }
  0xcc   :  { %v281_v47 = vpop.f32.mrf.mxu0 }
  0xcd   :  { %v2410_v48 = vadd.f32 %v2407_v46, %v281_v47 }
  0xce   :  { %v2412_v49 = vpop.f32.mrf.mxu0 }
  0xcf   :  { %2114 = vmatprep.mubr.msk.f32.mxu1 %vm94_vm0, %v2410_v48  ;;  %v2527_v34 = vadd.f32 %v2412_v49, %v2407_v46 }
  0xd0   :  { %v2416_v50 = vpop.f32.mrf.mxu0 }
  0xd1   :  { %v2544_v38 = vadd.f32 %v2407_v46, %v2416_v50 }
  0xd2   :  { %v2030_v51 = vpop.f32.mrf.mxu0 }
  0xd3   :  { %v2513_v28 = vadd.f32 %v2030_v51, %v2407_v46 }
  0xd4   :  { %v2418_v52 = vpop.f32.mrf.mxu0 }
  0xd5   :  { %v2520_v31 = vadd.f32 %v2407_v46, %v2418_v52 }
  0xd6   :  { %v2033_v53 = vpop.f32.mrf.mxu0 }
  0xd7   :  { %v2499_v22 = vadd.f32 %v2033_v53, %v2407_v46 }
  0xd8   :  { %v311_v54 = vpop.f32.mrf.mxu0 }
  0xd9   :  { %v2507_v25 = vadd.f32 %v2407_v46, %v311_v54 }
  0xda   :  { %v2036_v55 = vpop.f32.mrf.mxu0 }
  0xdb   :  { %v2479_v16 = vadd.f32 %v2036_v55, %v2407_v46 }
  0xdc   :  { %v321_v56 = vpop.f32.mrf.mxu0 }
  0xdd   :  { %v2489_v19 = vadd.f32 %v2407_v46, %v321_v56 }
  0xde   :  { %v2039_v57 = vpop.f32.mrf.mxu0 }
  0xdf   :  { %v2459_v10 = vadd.f32 %v2039_v57, %v2407_v46 }
  0xe0   :  { %v331_v58 = vpop.f32.mrf.mxu0 }
  0xe1   :  { %v2469_v13 = vadd.f32 %v2407_v46, %v331_v58 }
  0xe2   :  { %v2042_v59 = vpop.f32.mrf.mxu0 }
  0xe3   :  { %v2439_v4 = vadd.f32 %v2042_v59, %v2407_v46 }
  0xe4   :  { %v341_v60 = vpop.f32.mrf.mxu0 }
  0xe5   :  { %v2449_v7 = vadd.f32 %v2407_v46, %v341_v60 }
  0xe6   :  { %v2045_v61 = vpop.f32.mrf.mxu0 }
  0xe7   :  { %v2421_v62 = vadd.f32 %v2045_v61, %v2407_v46 }
  0xe8   :  { %v351_v63 = vpop.f32.mrf.mxu0 }
  0xe9   :  { %1885 = vmatpush1.xpose.msk.msra.mxu0 %vm94_vm0, %v2421_v62  ;;  %v2429_v1 = vadd.f32 %v2407_v46, %v351_v63 }
  0xea   :  { %v2425_v0 = vpop.f32.mrf.mxu0  ;;  %835 = vmatprep.subr.mxu0 %v2160_v44 }
  0xeb   :  { %v2659_v57 = vadd.f32 %v2425_v0, %v2407_v46 }
  0xec   :  { %v2431_v2 = vpop.f32.mrf.mxu0 }
  0xed   :  { %1886 = vmatpush1.xpose.msk.msra.mxu0 %vm94_vm0, %v2429_v1  ;;  %v362_v59 = vadd.f32 %v2407_v46, %v2431_v2  ;;  %v1372_v2 = vld [vmem:[%s3404_s7 + $0x130] sm:$0xff] }
  0xee   :  { %v2435_v3 = vpop.f32.mrf.mxu0  ;;  %837 = vmatprep.subr.mxu0 %v2160_v44 }
  0xef   :  { %v2637_v53 = vadd.f32 %v2435_v3, %v2407_v46  ;;  %v1369_v3 = vld [vmem:[%s3404_s7 + $0x118] sm:$0xff] }
  0xf0   :  { %v2441_v5 = vpop.f32.mrf.mxu0 }
  0xf1   :  { %1887 = vmatpush1.xpose.msk.msra.mxu0 %vm94_vm0, %v2439_v4  ;;  %v2648_v55 = vadd.f32 %v2407_v46, %v2441_v5  ;;  %v1248_v5 = vld [vmem:[%s3405_s5 + $0xf8] sm:$0xff] }
  0xf2   :  { %v2445_v6 = vpop.f32.mrf.mxu0  ;;  %839 = vmatprep.subr.mxu0 %v2160_v44 }
  0xf3   :  { %v2610_v49 = vadd.f32 %v2445_v6, %v2407_v46  ;;  %v1247_v6 = vld [vmem:[%s3405_s5 + $0xf0] sm:$0xff] }
  0xf4   :  { %v2451_v8 = vpop.f32.mrf.mxu0 }
  0xf5   :  { %1888 = vmatpush1.xpose.msk.msra.mxu0 %vm94_vm0, %v2449_v7  ;;  %v2624_v51 = vadd.f32 %v2407_v46, %v2451_v8  ;;  %v1363_v8 = vld [vmem:[%s3404_s7 + $0xe8] sm:$0xff] }
  0xf6   :  { %v2455_v9 = vpop.f32.mrf.mxu0  ;;  %841 = vmatprep.subr.mxu0 %v2160_v44 }
  0xf7   :  { %v2582_v43 = vadd.f32 %v2455_v9, %v2407_v46  ;;  %v1360_v9 = vld [vmem:[%s3404_s7 + $0xd0] sm:$0xff] }
  0xf8   :  { %v2461_v11 = vpop.f32.mrf.mxu0 }
  0xf9   :  { %1889 = vmatpush1.xpose.msk.msra.mxu0 %vm94_vm0, %v2459_v10  ;;  %v2596_v47 = vadd.f32 %v2407_v46, %v2461_v11  ;;  %v1357_v11 = vld [vmem:[%s3404_s7 + $0xb8] sm:$0xff] }
  0xfa   :  { %v2465_v12 = vpop.f32.mrf.mxu0  ;;  %843 = vmatprep.subr.mxu0 %v2160_v44 }
  0xfb   :  { %v407_v0 = vadd.f32 %v2465_v12, %v2407_v46  ;;  %v1244_v12 = vld [vmem:[%s3405_s5 + $0xd8] sm:$0xff] }
  0xfc   :  { %v2471_v14 = vpop.f32.mrf.mxu0 }
  0xfd   :  { %1890 = vmatpush1.xpose.msk.msra.mxu0 %vm94_vm0, %v2469_v13  ;;  %v402_v61 = vadd.f32 %v2407_v46, %v2471_v14  ;;  %v1354_v14 = vld [vmem:[%s3404_s7 + $0xa0] sm:$0xff] }
  0xfe   :  { %v2475_v15 = vpop.f32.mrf.mxu0  ;;  %845 = vmatprep.subr.mxu0 %v2160_v44 }
  0xff   :  { %v417_v60 = vadd.f32 %v2475_v15, %v2407_v46  ;;  %v1242_v15 = vld [vmem:[%s3405_s5 + $0xc8] sm:$0xff] }
 0x100   :  { %v2481_v17 = vpop.f32.mrf.mxu0 }
 0x101   :  { %1891 = vmatpush1.xpose.msk.msra.mxu0 %vm94_vm0, %v2479_v16  ;;  %v412_v63 = vadd.f32 %v2407_v46, %v2481_v17  ;;  %v1351_v17 = vld [vmem:[%s3404_s7 + $0x88] sm:$0xff] }
 0x102   :  { %v2485_v18 = vpop.f32.mrf.mxu0  ;;  %847 = vmatprep.subr.mxu0 %v2160_v44 }
 0x103   :  { %v427_v56 = vadd.f32 %v2485_v18, %v2407_v46  ;;  %v1240_v18 = vld [vmem:[%s3405_s5 + $0xb8] sm:$0xff] }
 0x104   :  { %v2491_v20 = vpop.f32.mrf.mxu0 }
 0x105   :  { %1892 = vmatpush1.xpose.msk.msra.mxu0 %vm94_vm0, %v2489_v19  ;;  %v422_v58 = vadd.f32 %v2407_v46, %v2491_v20  ;;  %v1348_v20 = vld [vmem:[%s3404_s7 + $0x70] sm:$0xff] }
 0x106   :  { %v2495_v21 = vpop.f32.mrf.mxu0  ;;  %849 = vmatprep.subr.mxu0 %v2160_v44 }
 0x107   :  { %v437_v52 = vadd.f32 %v2495_v21, %v2407_v46  ;;  %v1238_v21 = vld [vmem:[%s3405_s5 + $0xa8] sm:$0xff] }
 0x108   :  { %v2501_v23 = vpop.f32.mrf.mxu0 }
 0x109   :  { %1893 = vmatpush1.xpose.msk.msra.mxu0 %vm94_vm0, %v2499_v22  ;;  %v432_v54 = vadd.f32 %v2407_v46, %v2501_v23  ;;  %v1345_v23 = vld [vmem:[%s3404_s7 + $0x58] sm:$0xff] }
 0x10a   :  { %v2072_v24 = vpop.f32.mrf.mxu0  ;;  %851 = vmatprep.subr.mxu0 %v2160_v44 }
 0x10c   :  { %v441_v26 = vpop.f32.mrf.mxu0 }
 0x10d   :  { %1894 = vmatpush1.xpose.msk.msra.mxu0 %vm94_vm0, %v2507_v25  ;;  %v2615_v50 = vadd.f32 %v2407_v46, %v441_v26  ;;  %v1342_v26 = vld [vmem:[%s3404_s7 + $0x40] sm:$0xff] }
 0x10e   :  { %v2075_v27 = vpop.f32.mrf.mxu0  ;;  %853 = vmatprep.subr.mxu0 %v2160_v44 }
 0x10f   :  { %v2573_v42 = vadd.f32 %v2075_v27, %v2407_v46  ;;  %v1234_v27 = vld [vmem:[%s3405_s5 + $0x88] sm:$0xff] }
 0x110   :  { %v451_v29 = vpop.f32.mrf.mxu0 }
 0x111   :  { %1895 = vmatpush1.xpose.msk.msra.mxu0 %vm94_vm0, %v2513_v28  ;;  %v2587_v45 = vadd.f32 %v2407_v46, %v451_v29  ;;  %v1339_v29 = vld [vmem:[%s3404_s7 + $0x28] sm:$0xff] }
 0x112   :  { %v2078_v30 = vpop.f32.mrf.mxu0  ;;  %855 = vmatprep.subr.mxu0 %v2160_v44 }
 0x113   :  { %v2549_v39 = vadd.f32 %v2078_v30, %v2407_v46  ;;  %v1232_v30 = vld [vmem:[%s3405_s5 + $0x78] sm:$0xff] }
 0x114   :  { %v461_v32 = vpop.f32.mrf.mxu0 }
 0x115   :  { %1896 = vmatpush1.xpose.msk.msra.mxu0 %vm94_vm0, %v2520_v31  ;;  %v2563_v41 = vadd.f32 %v2407_v46, %v461_v32  ;;  %v1336_v32 = vld [vmem:[%s3404_s7 + $0x10] sm:$0xff] }
 0x116   :  { %v2081_v33 = vpop.f32.mrf.mxu0  ;;  %857 = vmatprep.subr.mxu0 %v2160_v44 }
 0x117   :  { %v2530_v35 = vadd.f32 %v2081_v33, %v2407_v46  ;;  %v1230_v33 = vld [vmem:[%s3405_s5 + $0x68] sm:$0xff] }
 0x118   :  { %v471_v36 = vpop.f32.mrf.mxu0 }
 0x119   :  { %v2533_v37 = vadd.f32 %v2407_v46, %v471_v36  ;;  %2082 = vmatprep.subr.msk.mxu1 %vm94_vm0, %v2530_v35  ;;  %1897 = vmatpush1.xpose.msk.msra.mxu0 %vm94_vm0, %v2527_v34  ;;  %v1228_v36 = vld [vmem:[%s3405_s5 + $0x58] sm:$0xff] }
 0x11a   :  { %2083 = vmatpush3.xpose.msk.msra.mxu1 %vm94_vm0, %v2530_v35  ;;  %859 = vmatprep.subr.mxu0 %v2160_v44 }
 0x11b   :  { %2084 = vmatprep.subr.msk.mxu1 %vm94_vm0, %v2533_v37 }
 0x11d   :  { %1898 = vmatpush1.xpose.msk.msra.mxu0 %vm94_vm0, %v2544_v38 }
 0x11e   :  { %2085 = vmatpush3.xpose.msk.msra.mxu1 %vm94_vm0, %v2533_v37  ;;  %861 = vmatprep.subr.mxu0 %v2160_v44 }
 0x11f   :  { %2086 = vmatprep.subr.msk.mxu1 %vm94_vm0, %v2549_v39 }
 0x121   :  { %1899 = vmatpush1.xpose.msk.msra.mxu0 %vm94_vm0, %v2558_v40 }
 0x122   :  { %2087 = vmatpush3.xpose.msk.msra.mxu1 %vm94_vm0, %v2549_v39  ;;  %863 = vmatprep.subr.mxu0 %v2160_v44 }
 0x123   :  { %2088 = vmatprep.subr.msk.mxu1 %vm94_vm0, %v2563_v41 }
 0x125   :  { %1900 = vmatpush1.xpose.msk.msra.mxu0 %vm94_vm0, %v2410_v48  ;;  %v2601_v48 = vadd.f32 %v2072_v24, %v2407_v46  ;;  %v1381_v46 = vld [vmem:[%s3404_s7 + $0x178] sm:$0xff] }
 0x126   :  { %2089 = vmatpush3.xpose.msk.msra.mxu1 %vm94_vm0, %v2563_v41  ;;  %881 = vmatprep.subr.mxu0 %v2160_v44  ;;  %v1236_v24 = vld [vmem:[%s3405_s5 + $0x98] sm:$0xff] }
 0x127   :  { %2090 = vmatprep.subr.msk.mxu1 %vm94_vm0, %v2573_v42 }
 0x129   :  { %1901 = vmatpush2.xpose.msk.msra.mxu0 %vm94_vm0, %v2582_v43 }
 0x12a   :  { %2091 = vmatpush3.xpose.msk.msra.mxu1 %vm94_vm0, %v2573_v42  ;;  %883 = vmatprep.subr.mxu0 %v2160_v44 }
 0x12b   :  { %2092 = vmatprep.subr.msk.mxu1 %vm94_vm0, %v2587_v45 }
 0x12d   :  { %1902 = vmatpush2.xpose.msk.msra.mxu0 %vm94_vm0, %v2596_v47 }
 0x12e   :  { %2093 = vmatpush3.xpose.msk.msra.mxu1 %vm94_vm0, %v2587_v45  ;;  %885 = vmatprep.subr.mxu0 %v2160_v44 }
 0x12f   :  { %2094 = vmatprep.subr.msk.mxu1 %vm94_vm0, %v2601_v48 }
 0x131   :  { %1903 = vmatpush2.xpose.msk.msra.mxu0 %vm94_vm0, %v2610_v49 }
 0x132   :  { %2095 = vmatpush3.xpose.msk.msra.mxu1 %vm94_vm0, %v2601_v48  ;;  %887 = vmatprep.subr.mxu0 %v2160_v44 }
 0x133   :  { %2096 = vmatprep.subr.msk.mxu1 %vm94_vm0, %v2615_v50 }
 0x135   :  { %1904 = vmatpush2.xpose.msk.msra.mxu0 %vm94_vm0, %v2624_v51 }
 0x136   :  { %2097 = vmatpush3.xpose.msk.msra.mxu1 %vm94_vm0, %v2615_v50  ;;  %889 = vmatprep.subr.mxu0 %v2160_v44 }
 0x137   :  { %2098 = vmatprep.subr.msk.mxu1 %vm94_vm0, %v437_v52 }
 0x139   :  { %1905 = vmatpush2.xpose.msk.msra.mxu0 %vm94_vm0, %v2637_v53 }
 0x13a   :  { %2099 = vmatpush3.xpose.msk.msra.mxu1 %vm94_vm0, %v437_v52  ;;  %891 = vmatprep.subr.mxu0 %v2160_v44 }
 0x13b   :  { %2100 = vmatprep.subr.msk.mxu1 %vm94_vm0, %v432_v54 }
 0x13d   :  { %1906 = vmatpush2.xpose.msk.msra.mxu0 %vm94_vm0, %v2648_v55 }
 0x13e   :  { %2101 = vmatpush3.xpose.msk.msra.mxu1 %vm94_vm0, %v432_v54  ;;  %893 = vmatprep.subr.mxu0 %v2160_v44 }
 0x13f   :  { %2102 = vmatprep.subr.msk.mxu1 %vm94_vm0, %v427_v56 }
 0x141   :  { %1907 = vmatpush2.xpose.msk.msra.mxu0 %vm94_vm0, %v2659_v57 }
 0x142   :  { %2103 = vmatpush3.xpose.msk.msra.mxu1 %vm94_vm0, %v427_v56  ;;  %895 = vmatprep.subr.mxu0 %v2160_v44 }
 0x143   :  { %2104 = vmatprep.subr.msk.mxu1 %vm94_vm0, %v422_v58 }
 0x145   :  { %1908 = vmatpush2.xpose.msk.msra.mxu0 %vm94_vm0, %v362_v59 }
 0x146   :  { %2105 = vmatpush3.xpose.msk.msra.mxu1 %vm94_vm0, %v422_v58  ;;  %1497 = vmatprep.subr.mxu0 %v2160_v44 }
 0x147   :  { %2106 = vmatprep.subr.msk.mxu1 %vm94_vm0, %v417_v60 }
 0x148   :  { %1909 = vmatmul.mubr.msk.f32.vlgmr.msra.gmra.mxu0 %vm94_vm0, %v402_v61 }
 0x149   :  { %903 = vmatprep.mubr.f32.mxu0 %v2160_v44  ;;  %1498 = vmatpush1.msra.mxu0 %v1381_v46 }
 0x14a   :  { %2107 = vmatpush3.xpose.msk.msra.mxu1 %vm94_vm0, %v417_v60  ;;  %1499 = vmatprep.subr.mxu0 %v2160_v44 }
 0x14b   :  { %2108 = vmatprep.subr.msk.mxu1 %vm94_vm0, %v412_v63 }
 0x14c   :  { %1910 = vmatmul.mubr.msk.f32.gmra.mxu0 %vm94_vm0, %v407_v0 }
 0x14d   :  { %909 = vmatprep.mubr.f32.mxu0 %v2160_v44 }
 0x14e   :  { %2109 = vmatpush3.xpose.msk.msra.mxu1 %vm94_vm0, %v412_v63 }
 0x14f   :  { %2110 = vmatprep.subr.msk.mxu1 %vm94_vm0, %v407_v0 }
 0x150   :  { %1911 = vmatmul.mubr.msk.f32.gmra.mxu0 %vm94_vm0, %v412_v63 }
 0x151   :  { %915 = vmatprep.mubr.f32.mxu0 %v2160_v44 }
 0x152   :  { %2111 = vmatpush3.xpose.msk.msra.mxu1 %vm94_vm0, %v407_v0 }
 0x153   :  { %2112 = vmatprep.subr.msk.mxu1 %vm94_vm0, %v402_v61 }
 0x154   :  { %1912 = vmatmul.mubr.msk.f32.gmra.mxu0 %vm94_vm0, %v417_v60 }
 0x155   :  { %921 = vmatprep.mubr.f32.mxu0 %v2160_v44 }
 0x156   :  { %2113 = vmatpush3.xpose.msk.msra.mxu1 %vm94_vm0, %v402_v61 }
 0x157   :  { %1261 = vmatprep.subr.mxu1 %v1248_v5 }
 0x158   :  { %1913 = vmatmul.mubr.msk.f32.gmra.mxu0 %vm94_vm0, %v422_v58 }
 0x159   :  { %2115 = vmatmul.mubr.msk.f32.vlgmr.msra.gmra.mxu1 %vm94_vm0, %v2558_v40  ;;  %927 = vmatprep.mubr.f32.mxu0 %v2160_v44  ;;  %v1225_v40 = vld [vmem:[%s3405_s5 + $0x40] sm:$0xff] }
 0x15a   :  { %2117 = vmatprep.mubr.msk.f32.mxu1 %vm94_vm0, %v2544_v38  ;;  %1262 = vmatpush1.msra.mxu1 %v1247_v6  ;;  %v1402_v38 = vld [vmem:[%s3404_s7 + $0x220] sm:$0xff] }
 0x15c   :  { %1914 = vmatmul.mubr.msk.f32.gmra.mxu0 %vm94_vm0, %v427_v56  ;;  %v1380_v56 = vld [vmem:[%s3404_s7 + $0x170] sm:$0xff] }
 0x15d   :  { %2118 = vmatmul.mubr.msk.f32.gmra.mxu1 %vm94_vm0, %v2527_v34  ;;  %933 = vmatprep.mubr.f32.mxu0 %v2160_v44  ;;  %v1229_v34 = vld [vmem:[%s3405_s5 + $0x60] sm:$0xff] }
 0x15e   :  { %2120 = vmatprep.mubr.msk.f32.mxu1 %vm94_vm0, %v2520_v31  ;;  %v1231_v31 = vld [vmem:[%s3405_s5 + $0x70] sm:$0xff] }
 0x160   :  { %1915 = vmatmul.mubr.msk.f32.gmra.mxu0 %vm94_vm0, %v432_v54  ;;  %v1217_v54 = vld [vmem:[%s3405_s5] sm:$0xff] }
 0x161   :  { %2121 = vmatmul.mubr.msk.f32.gmra.mxu1 %vm94_vm0, %v2513_v28  ;;  %939 = vmatprep.mubr.f32.mxu0 %v2160_v44  ;;  %v1233_v28 = vld [vmem:[%s3405_s5 + $0x80] sm:$0xff] }
 0x162   :  { %2123 = vmatprep.mubr.msk.f32.mxu1 %vm94_vm0, %v2507_v25  ;;  %v1235_v25 = vld [vmem:[%s3405_s5 + $0x90] sm:$0xff] }
 0x164   :  { %1916 = vmatmul.mubr.msk.f32.gmra.mxu0 %vm94_vm0, %v437_v52  ;;  %v1390_v52 = vld [vmem:[%s3404_s7 + $0x1c0] sm:$0xff] }
 0x165   :  { %2124 = vmatmul.mubr.msk.f32.gmra.mxu1 %vm94_vm0, %v2499_v22  ;;  %945 = vmatprep.mubr.f32.mxu0 %v2160_v44  ;;  %v1237_v22 = vld [vmem:[%s3405_s5 + $0xa0] sm:$0xff] }
 0x166   :  { %2126 = vmatprep.mubr.msk.f32.mxu1 %vm94_vm0, %v2489_v19  ;;  %v1239_v19 = vld [vmem:[%s3405_s5 + $0xb0] sm:$0xff] }
 0x168   :  { %1917 = vmatmul.mubr.msk.f32.gmra.mxu0 %vm94_vm0, %v2615_v50  ;;  %v1220_v50 = vld [vmem:[%s3405_s5 + $0x18] sm:$0xff] }
 0x169   :  { %2127 = vmatmul.mubr.msk.f32.gmra.mxu1 %vm94_vm0, %v2479_v16  ;;  %951 = vmatprep.mubr.f32.mxu0 %v2160_v44  ;;  %v1241_v16 = vld [vmem:[%s3405_s5 + $0xc0] sm:$0xff] }
 0x16a   :  { %2129 = vmatprep.mubr.msk.f32.mxu1 %vm94_vm0, %v2469_v13  ;;  %v1243_v13 = vld [vmem:[%s3405_s5 + $0xd0] sm:$0xff] }
 0x16c   :  { %1918 = vmatmul.mubr.msk.f32.gmra.mxu0 %vm94_vm0, %v2601_v48  ;;  %v1221_v48 = vld [vmem:[%s3405_s5 + $0x20] sm:$0xff] }
 0x16d   :  { %2130 = vmatmul.mubr.msk.f32.gmra.mxu1 %vm94_vm0, %v2459_v10  ;;  %957 = vmatprep.mubr.f32.mxu0 %v2160_v44  ;;  %v1245_v10 = vld [vmem:[%s3405_s5 + $0xe0] sm:$0xff] }
 0x16e   :  { %2132 = vmatprep.mubr.msk.f32.mxu1 %vm94_vm0, %v2449_v7  ;;  %v1246_v7 = vld [vmem:[%s3405_s5 + $0xe8] sm:$0xff] }
 0x16f   :  { %1263 = vmatprep.subr.mxu1 %v1246_v7  ;;  %v996_v7 = vld [vmem:[%s3406_s4 + $0x10] sm:$0xff] }
 0x170   :  { %1919 = vmatmul.mubr.msk.f32.gmra.mxu0 %vm94_vm0, %v2587_v45  ;;  %1264 = vmatpush1.msra.mxu1 %v1245_v10  ;;  %v1396_v45 = vld [vmem:[%s3404_s7 + $0x1f0] sm:$0xff] }
 0x171   :  { %2133 = vmatmul.mubr.msk.f32.gmra.mxu1 %vm94_vm0, %v2439_v4  ;;  %963 = vmatprep.mubr.f32.mxu0 %v2160_v44  ;;  %v1366_v4 = vld [vmem:[%s3404_s7 + $0x100] sm:$0xff] }
 0x172   :  { %2135 = vmatprep.mubr.msk.f32.mxu1 %vm94_vm0, %v2429_v1  ;;  %v1375_v1 = vld [vmem:[%s3404_s7 + $0x148] sm:$0xff]  ;;  %1265 = vmatprep.subr.mxu1 %v1244_v12  ;;  %v994_v12 = vld [vmem:[%s3406_s4] sm:$0xff] }
 0x173   :  { %1266 = vmatpush1.msra.mxu1 %v1243_v13  ;;  %v1001_v13 = vld [vmem:[%s3406_s4 + $0x38] sm:$0xff] }
 0x174   :  { %1920 = vmatmul.mubr.msk.f32.gmra.mxu0 %vm94_vm0, %v2573_v42  ;;  %1267 = vmatprep.subr.mxu1 %v1242_v15  ;;  %v1224_v42 = vld [vmem:[%s3405_s5 + $0x38] sm:$0xff] }
 0x175   :  { %2136 = vmatmul.mubr.msk.f32.gmra.mxu1 %vm94_vm0, %v2421_v62  ;;  %969 = vmatprep.mubr.f32.mxu0 %v2160_v44  ;;  %v1378_v62 = vld [vmem:[%s3404_s7 + $0x160] sm:$0xff] }
 0x176   :  { %2138 = vmatprep.mubr.msk.f32.mxu1 %vm94_vm0, %v362_v59  ;;  %1500 = vmatpush1.msra.mxu0 %v1378_v62 }
 0x177   :  { %1501 = vmatprep.subr.mxu0 %v2160_v44  ;;  %1268 = vmatpush1.msra.mxu1 %v1241_v16 }
 0x178   :  { %1921 = vmatmul.mubr.msk.f32.gmra.mxu0 %vm94_vm0, %v2563_v41  ;;  %1269 = vmatprep.subr.mxu1 %v1240_v18  ;;  %v1399_v41 = vld [vmem:[%s3404_s7 + $0x208] sm:$0xff]  ;;  %v997_v18 = vld [vmem:[%s3406_s4 + $0x18] sm:$0xff] }
 0x179   :  { %2139 = vmatmul.mubr.msk.f32.gmra.mxu1 %vm94_vm0, %v2659_v57  ;;  %975 = vmatprep.mubr.f32.mxu0 %v2160_v44  ;;  %v1384_v57 = vld [vmem:[%s3404_s7 + $0x190] sm:$0xff] }
 0x17a   :  { %2141 = vmatprep.mubr.msk.f32.mxu1 %vm94_vm0, %v2648_v55  ;;  %1502 = vmatpush1.msra.mxu0 %v1375_v1  ;;  %v1387_v55 = vld [vmem:[%s3404_s7 + $0x1a8] sm:$0xff] }
 0x17b   :  { %1503 = vmatprep.subr.mxu0 %v2160_v44  ;;  %1270 = vmatpush1.msra.mxu1 %v1239_v19  ;;  %v999_v19 = vld [vmem:[%s3406_s4 + $0x28] sm:$0xff] }
 0x17c   :  { %1922 = vmatmul.mubr.msk.f32.gmra.mxu0 %vm94_vm0, %v2549_v39  ;;  %1271 = vmatprep.subr.mxu1 %v1238_v21  ;;  %v1226_v39 = vld [vmem:[%s3405_s5 + $0x48] sm:$0xff] }
 0x17d   :  { %2142 = vmatmul.mubr.msk.f32.gmra.mxu1 %vm94_vm0, %v2637_v53  ;;  %981 = vmatprep.mubr.f32.mxu0 %v2160_v44  ;;  %v1218_v53 = vld [vmem:[%s3405_s5 + $0x8] sm:$0xff] }
 0x17e   :  { %2144 = vmatprep.mubr.msk.f32.mxu1 %vm94_vm0, %v2624_v51  ;;  %1504 = vmatpush1.msra.mxu0 %v1372_v2  ;;  %v1219_v51 = vld [vmem:[%s3405_s5 + $0x10] sm:$0xff] }
 0x17f   :  { %1505 = vmatprep.subr.mxu0 %v2160_v44  ;;  %1272 = vmatpush1.msra.mxu1 %v1237_v22 }
 0x180   :  { %1923 = vmatmul.mubr.msk.f32.gmra.mxu0 %vm94_vm0, %v2533_v37  ;;  %1273 = vmatprep.subr.mxu1 %v1236_v24  ;;  %v1227_v37 = vld [vmem:[%s3405_s5 + $0x50] sm:$0xff] }
 0x181   :  { %2145 = vmatmul.mubr.msk.f32.gmra.mxu1 %vm94_vm0, %v2610_v49  ;;  %987 = vmatprep.mubr.f32.mxu0 %v2160_v44  ;;  %v1393_v49 = vld [vmem:[%s3404_s7 + $0x1d8] sm:$0xff] }
 0x182   :  { %2147 = vmatprep.mubr.msk.f32.mxu1 %vm94_vm0, %v2596_v47  ;;  %1506 = vmatpush1.msra.mxu0 %v1369_v3  ;;  %v1222_v47 = vld [vmem:[%s3405_s5 + $0x28] sm:$0xff] }
 0x183   :  { %1507 = vmatprep.subr.mxu0 %v2160_v44  ;;  %1274 = vmatpush1.msra.mxu1 %v1235_v25 }
 0x184   :  { %1924 = vmatmul.mubr.msk.f32.gmra.mxu0 %vm94_vm0, %v2530_v35  ;;  %1275 = vmatprep.subr.mxu1 %v1234_v27  ;;  %v1405_v35 = vld [vmem:[%s3404_s7 + $0x238] sm:$0xff]  ;;  %v785_v27 = vld [vmem:[%s3407_s3] sm:$0xff] }
 0x185   :  { %2148 = vmatmul.mubr.msk.f32.gmra.mxu1 %vm94_vm0, %v2582_v43  ;;  %1508 = vmatpush1.msra.mxu0 %v1366_v4  ;;  %v1223_v43 = vld [vmem:[%s3405_s5 + $0x30] sm:$0xff] }
 0x186   :  { %1325 = vmatprep.mubr.f32.mxu1 %v2160_v44  ;;  %1509 = vmatprep.subr.mxu0 %v2160_v44  ;;  %v1000_v4 = vld [vmem:[%s3406_s4 + $0x30] sm:$0xff] }
 0x187   :  { %1510 = vmatpush1.msra.mxu0 %v1363_v8  ;;  %1276 = vmatpush1.msra.mxu1 %v1233_v28  ;;  %v998_v8 = vld [vmem:[%s3406_s4 + $0x20] sm:$0xff]  ;;  %v788_v28 = vld [vmem:[%s3407_s3 + $0x18] sm:$0xff] }
 0x188   :  { %1511 = vmatprep.subr.mxu0 %v2160_v44  ;;  %1277 = vmatprep.subr.mxu1 %v1232_v30 }
 0x189   :  { %1512 = vmatpush1.msra.mxu0 %v1360_v9  ;;  %1278 = vmatpush1.msra.mxu1 %v1231_v31 }
 0x18a   :  { %1513 = vmatprep.subr.mxu0 %v2160_v44  ;;  %1279 = vmatprep.subr.mxu1 %v1230_v33 }
 0x18b   :  { %1514 = vmatpush1.msra.mxu0 %v1357_v11  ;;  %1280 = vmatpush1.msra.mxu1 %v1229_v34 }
 0x18c   :  { %1515 = vmatprep.subr.mxu0 %v2160_v44  ;;  %1281 = vmatprep.subr.mxu1 %v1228_v36  ;;  %v786_v36 = vld [vmem:[%s3407_s3 + $0x8] sm:$0xff] }
 0x18d   :  { %1516 = vmatpush1.msra.mxu0 %v1354_v14  ;;  %1282 = vmatpush1.msra.mxu1 %v1227_v37 }
 0x18e   :  { %1517 = vmatprep.subr.mxu0 %v2160_v44  ;;  %1283 = vmatprep.subr.mxu1 %v1226_v39 }
 0x18f   :  { %1518 = vmatpush1.msra.mxu0 %v1351_v17  ;;  %1284 = vmatpush1.msra.mxu1 %v1225_v40 }
 0x190   :  { %1519 = vmatprep.subr.mxu0 %v2160_v44  ;;  %1285 = vmatprep.subr.mxu1 %v1224_v42 }
 0x191   :  { %1520 = vmatpush1.msra.mxu0 %v1348_v20  ;;  %1286 = vmatpush1.msra.mxu1 %v1223_v43  ;;  %v787_v20 = vld [vmem:[%s3407_s3 + $0x10] sm:$0xff] }
 0x192   :  { %1521 = vmatprep.subr.mxu0 %v2160_v44  ;;  %1287 = vmatprep.subr.mxu1 %v1222_v47  ;;  %v1008_v43 = vld [vmem:[%s3406_s4 + $0x70] sm:$0xff] }
 0x193   :  { %1522 = vmatpush1.msra.mxu0 %v1345_v23  ;;  %1288 = vmatpush1.msra.mxu1 %v1221_v48  ;;  %v995_v23 = vld [vmem:[%s3406_s4 + $0x8] sm:$0xff] }
 0x194   :  { %1523 = vmatprep.subr.mxu0 %v2160_v44  ;;  %1289 = vmatprep.subr.mxu1 %v1220_v50  ;;  %v1002_v50 = vld [vmem:[%s3406_s4 + $0x40] sm:$0xff] }
 0x195   :  { %1524 = vmatpush1.msra.mxu0 %v1342_v26  ;;  %1290 = vmatpush1.msra.mxu1 %v1219_v51 }
 0x196   :  { %1525 = vmatprep.subr.mxu0 %v2160_v44  ;;  %1291 = vmatprep.subr.mxu1 %v1218_v53 }
 0x197   :  { %1526 = vmatpush1.msra.mxu0 %v1339_v29  ;;  %1292 = vmatpush1.msra.mxu1 %v1217_v54  ;;  %v791_v54 = vld [vmem:[%s3407_s3 + $0x30] sm:$0xff] }
 0x198   :  { %1527 = vmatprep.subr.mxu0 %v2160_v44  ;;  %1426 = vmatprep.subr.mxu1 %v1380_v56 }
 0x199   :  { %1528 = vmatpush1.msra.mxu0 %v1336_v32 }
 0x19a   :  { %1545 = vmatprep.subr.mxu0 %v2160_v44 }
 0x19b   :  { %1546 = vmatpush2.msra.mxu0 %v1405_v35 }
 0x19c   :  { %1547 = vmatprep.subr.mxu0 %v2160_v44 }
 0x19d   :  { %1548 = vmatpush2.msra.mxu0 %v1402_v38 }
 0x19e   :  { %1549 = vmatprep.subr.mxu0 %v2160_v44 }
 0x19f   :  { %1550 = vmatpush2.msra.mxu0 %v1399_v41 }
 0x1a0   :  { %1551 = vmatprep.subr.mxu0 %v2160_v44 }
 0x1a1   :  { %1552 = vmatpush2.msra.mxu0 %v1396_v45  ;;  %v1009_v45 = vld [vmem:[%s3406_s4 + $0x78] sm:$0xff] }
 0x1a2   :  { %1553 = vmatprep.subr.mxu0 %v2160_v44 }
 0x1a3   :  { %1554 = vmatpush2.msra.mxu0 %v1393_v49 }
 0x1a4   :  { %1555 = vmatprep.subr.mxu0 %v2160_v44 }
 0x1a5   :  { %1556 = vmatpush2.msra.mxu0 %v1390_v52  ;;  %v1005_v52 = vld [vmem:[%s3406_s4 + $0x58] sm:$0xff] }
 0x1a6   :  { %1557 = vmatprep.subr.mxu0 %v2160_v44 }
 0x1a7   :  { %1558 = vmatpush2.msra.mxu0 %v1387_v55 }
 0x1a8   :  { %1559 = vmatprep.subr.mxu0 %v2160_v44 }
 0x1a9   :  { %1560 = vmatpush2.msra.mxu0 %v1384_v57 }
 0x208   :  { %v899_v58 = vpop.f32.mrf.mxu0 }
 0x209   :  { %v1026_v22 = vmul.f32 %v994_v12, %v899_v58  ;;  %v1004_v58 = vld [vmem:[%s3406_s4 + $0x50] sm:$0xff] }
 0x20a   :  { %v901_v59 = vpop.f32.mrf.mxu0 }
 0x20b   :  { %v1027_v35 = vmul.f32 %v995_v23, %v901_v59  ;;  %v1006_v59 = vld [vmem:[%s3406_s4 + $0x60] sm:$0xff] }
 0x20c   :  { %v905_v60 = vpop.f32.mrf.mxu0 }
 0x20d   :  { %v1028_v15 = vmul.f32 %v996_v7, %v905_v60  ;;  %v1132_v56 = vsel %vm1131_vm1, %v1027_v35, -inf  ;;  %v1007_v60 = vld [vmem:[%s3406_s4 + $0x68] sm:$0xff] }
 0x20e   :  { %v907_v61 = vpop.f32.mrf.mxu0 }
 0x20f   :  { %v1029_v30 = vmul.f32 %v997_v18, %v907_v61 }
 0x210   :  { %v911_v63 = vpop.f32.mrf.mxu0 }
 0x211   :  { %v1030_v16 = vmul.f32 %v998_v8, %v911_v63  ;;  %v1133_v48 = vsel %vm1131_vm1, %v1029_v30, -inf }
 0x212   :  { %v913_v0 = vpop.f32.mrf.mxu0 }
 0x213   :  { %v1122_v31 = vmax.f32 %v1026_v22, %v1030_v16  ;;  %v1031_v32 = vmul.f32 %v999_v19, %v913_v0  ;;  %v1003_v0 = vld [vmem:[%s3406_s4 + $0x48] sm:$0xff] }
 0x214   :  { %v917_v46 = vpop.f32.mrf.mxu0  ;;  %v790_v16 = vld [vmem:[%s3407_s3 + $0x28] sm:$0xff] }
 0x215   :  { %v1032_v10 = vmul.f32 %v1000_v4, %v917_v46  ;;  %v1134_v49 = vsel %vm1131_vm1, %v1031_v32, -inf  ;;  %v792_v4 = vld [vmem:[%s3407_s3 + $0x38] sm:$0xff] }
 0x216   :  { %v919_v62 = vpop.f32.mrf.mxu0  ;;  %v1135_v8 = vmax.f32 %v1132_v56, %v1134_v49 }
 0x217   :  { %v1123_v24 = vmax.f32 %v1028_v15, %v1032_v10  ;;  %v1033_v25 = vmul.f32 %v1001_v13, %v919_v62  ;;  %v789_v62 = vld [vmem:[%s3407_s3 + $0x20] sm:$0xff] }
 0x218   :  { %v2969_v1 = vpop.f32.mrf.mxu0 }
 0x219   :  { %v2116_v2 = vpop.f32.mrf.mxu1  ;;  %v1124_v38 = vmax.f32 %v1122_v31, %v1123_v24  ;;  %v1136_v39 = vsel %vm1131_vm1, %v1033_v25, -inf }
 0x21a   :  { %v2971_v3 = vpop.f32.mrf.mxu0  ;;  %v810_v51 = vmul.f32 %v2116_v2, %v786_v36  ;;  %v1137_v57 = vmax.f32 %v1133_v48, %v1136_v39  ;;  %v794_v36 = vld [vmem:[%s3407_s3 + $0x48] sm:$0xff] }
 0x21b   :  { %v666_v5 = vpop.f32.mrf.mxu1  ;;  %v1125_v63 = vrot.slane %v1124_v38, 4  ;;  %v1035_v22 = vmul.f32 %v1003_v0, %v2971_v3  ;;  %v796_v3 = vld [vmem:[%s3407_s3 + $0x58] sm:$0xff] }
 0x21c   :  { %v2976_v6 = vpop.f32.mrf.mxu0  ;;  %v809_v40 = vmul.f32 %v785_v27, %v666_v5 }
 0x21d   :  { %v2119_v9 = vpop.f32.mrf.mxu1  ;;  %v1036_v13 = vmul.f32 %v1004_v58, %v2976_v6  ;;  %v3061_v6 = vmax.f32 %v1124_v38, %v1125_v63  ;;  %v1014_v63 = vld [vmem:[%s3406_s4 + $0xa0] sm:$0xff] }
 0x21e   :  { %v931_v11 = vpop.f32.mrf.mxu0  ;;  %v812_v41 = vmul.f32 %v2119_v9, %v788_v28  ;;  %v1058_v46 = vmax.f32 %v809_v40, %v810_v51 }
 0x21f   :  { %v676_v14 = vpop.f32.mrf.mxu1  ;;  %v1037_v9 = vmul.f32 %v1005_v52, %v931_v11  ;;  %v795_v11 = vld [vmem:[%s3407_s3 + $0x50] sm:$0xff]  ;;  %v1127_v48 = vrot.slane %v3061_v6, 2  ;;  %v1013_v52 = vld [vmem:[%s3406_s4 + $0x98] sm:$0xff] }
 0x220   :  { %v935_v17 = vpop.f32.mrf.mxu0  ;;  %v811_v33 = vmul.f32 %v787_v20, %v676_v14  ;;  %v1034_v20 = vmul.f32 %v1002_v50, %v2969_v1  ;;  %v793_v1 = vld [vmem:[%s3407_s3 + $0x40] sm:$0xff]  ;;  %v1154_v50 = vsel %vm1131_vm1, %v1035_v22, -inf }
 0x221   :  { %v2999_v21 = vpop.f32.mrf.mxu1  ;;  %v1038_v15 = vmul.f32 %v1006_v59, %v935_v17  ;;  %v3063_v17 = vmax.f32 %v1135_v8, %v1137_v57  ;;  %v1012_v59 = vld [vmem:[%s3406_s4 + $0x90] sm:$0xff] }
 0x222   :  { %v937_v26 = vpop.f32.mrf.mxu0  ;;  %v1059_v53 = vmax.f32 %v811_v33, %v812_v41  ;;  %v814_v30 = vmul.f32 %v2999_v21, %v790_v16  ;;  %v1010_v41 = vld [vmem:[%s3406_s4 + $0x80] sm:$0xff]  ;;  %v1011_v21 = vld [vmem:[%s3406_s4 + $0x88] sm:$0xff] }
 0x223   :  { %v686_v29 = vpop.f32.mrf.mxu1  ;;  %v1039_v18 = vmul.f32 %v1007_v60, %v937_v26  ;;  %v1139_v49 = vrot.slane %v3063_v17, 4 }
 0x224   :  { %v941_v34 = vpop.f32.mrf.mxu0  ;;  %v1060_v14 = vmax.f32 %v1058_v46, %v1059_v53  ;;  %v813_v23 = vmul.f32 %v789_v62, %v686_v29  ;;  %v1155_v29 = vsel %vm1131_vm1, %v1037_v9, -inf  ;;  %v797_v46 = vld [vmem:[%s3407_s3 + $0x60] sm:$0xff]  ;;  %v1017_v9 = vld [vmem:[%s3406_s4 + $0xb8] sm:$0xff] }
 0x225   :  { %v2125_v37 = vpop.f32.mrf.mxu1  ;;  %v1040_v2 = vmul.f32 %v1008_v43, %v941_v34  ;;  %v1145_v34 = vmax.f32 %v1034_v20, %v1038_v15  ;;  %v1156_v35 = vsel %vm1131_vm1, %v1039_v18, -inf }
 0x226   :  { %v943_v42 = vpop.f32.mrf.mxu0  ;;  %v816_v24 = vmul.f32 %v2125_v37, %v792_v4  ;;  %v1061_v33 = vrot.slane %v1060_v14, 4  ;;  %v1067_v39 = vmax.f32 %v813_v23, %v814_v30  ;;  %v1157_v56 = vmax.f32 %v1154_v50, %v1156_v35 }
 0x227   :  { %v696_v47 = vpop.f32.mrf.mxu1  ;;  %v1041_v5 = vmul.f32 %v1009_v45, %v943_v42  ;;  %v1146_v27 = vmax.f32 %v1036_v13, %v1040_v2 }
 0x228   :  { %v3031_v55 = vpop.f32.mrf.mxu0  ;;  %v815_v10 = vmul.f32 %v791_v54, %v696_v47  ;;  %v1015_v47 = vld [vmem:[%s3406_s4 + $0xa8] sm:$0xff]  ;;  %v1016_v54 = vld [vmem:[%s3406_s4 + $0xb0] sm:$0xff]  ;;  %v3105_v62 = vmax.f32 %v1060_v14, %v1061_v33 }
 0x229   :  { %v2128_v61 = vpop.f32.mrf.mxu1  ;;  %v1158_v28 = vsel %vm1131_vm1, %v1041_v5, -inf  ;;  %v1147_v51 = vmax.f32 %v1145_v34, %v1146_v27  ;;  %v1042_v2 = vmul.f32 %v1010_v41, %v3031_v55  ;;  %v800_v55 = vld [vmem:[%s3407_s3 + $0x78] sm:$0xff] }
 0x22a   :  { %v949_v7 = vpop.f32.mrf.mxu0  ;;  %v1068_v31 = vmax.f32 %v815_v10, %v816_v24  ;;  %v1159_v40 = vmax.f32 %v1155_v29, %v1158_v28  ;;  %v818_v58 = vmul.f32 %v2128_v61, %v794_v36  ;;  %v798_v61 = vld [vmem:[%s3407_s3 + $0x68] sm:$0xff] }
 0x22b   :  { %v706_v12 = vpop.f32.mrf.mxu1  ;;  %v1043_v4 = vmul.f32 %v1011_v21, %v949_v7  ;;  %v799_v7 = vld [vmem:[%s3407_s3 + $0x70] sm:$0xff]  ;;  %v1148_v14 = vrot.slane %v1147_v51, 4 }
 0x22c   :  { %v953_v19 = vpop.f32.mrf.mxu0  ;;  %v817_v42 = vmul.f32 %v793_v1, %v706_v12  ;;  %v1069_v57 = vmax.f32 %v1067_v39, %v1068_v31  ;;  %v1160_v10 = vmax.f32 %v1157_v56, %v1159_v40  ;;  %v3127_v40 = vmax.f32 %v3063_v17, %v1139_v49  ;;  %v802_v17 = vld [vmem:[%s3407_s3 + $0x88] sm:$0xff] }
 0x22d   :  { %v2131_v25 = vpop.f32.mrf.mxu1  ;;  %v1044_v18 = vmul.f32 %v1012_v59, %v953_v19  ;;  %v3147_v59 = vmax.f32 %v3061_v6, %v1127_v48 }
 0x22e   :  { %v955_v26 = vpop.f32.mrf.mxu0  ;;  %v820_v43 = vmul.f32 %v2131_v25, %v796_v3  ;;  %v1076_v12 = vmax.f32 %v817_v42, %v818_v58  ;;  %v1070_v24 = vrot.slane %v1069_v57, 4  ;;  %v1161_v31 = vrot.slane %v1160_v10, 4  ;;  %v803_v58 = vld [vmem:[%s3407_s3 + $0x90] sm:$0xff] }
 0x22f   :  { %v716_v32 = vpop.f32.mrf.mxu1  ;;  %v1045_v13 = vmul.f32 %v1013_v52, %v955_v26 }
 0x230   :  { %v819_v37 = vmul.f32 %v795_v11, %v716_v32  ;;  %v959_v38 = vpop.f32.mrf.mxu0  ;;  %v1176_v32 = vsel %vm1131_vm1, %v1043_v4, -inf  ;;  %v1071_v41 = vmax.f32 %v1069_v57, %v1070_v24  ;;  %v804_v57 = vld [vmem:[%s3407_s3 + $0x98] sm:$0xff]  ;;  %v1020_v24 = vld [vmem:[%s3406_s4 + $0xd0] sm:$0xff] }
 0x231   :  { %v2134_v45 = vpop.f32.mrf.mxu1  ;;  %v1046_v20 = vmul.f32 %v1014_v63, %v959_v38  ;;  %v1177_v19 = vsel %vm1131_vm1, %v1045_v13, -inf  ;;  %v1022_v13 = vld [vmem:[%s3406_s4 + $0xe0] sm:$0xff] }
 0x232   :  { %v961_v53 = vpop.f32.mrf.mxu0  ;;  %v1077_v60 = vmax.f32 %v819_v37, %v820_v43  ;;  %v822_v11 = vmul.f32 %v2134_v45, %v798_v61  ;;  %v801_v45 = vld [vmem:[%s3407_s3 + $0x80] sm:$0xff] }
 0x233   :  { %v726_v0 = vpop.f32.mrf.mxu1  ;;  %v1047_v5 = vmul.f32 %v1015_v47, %v961_v53  ;;  %v1167_v35 = vmax.f32 %v1042_v2, %v1046_v20  ;;  %v1063_v53 = vrot.slane %v3105_v62, 2  ;;  %v1072_v2 = vrot.slane %v1071_v41, 2 }
 0x234   :  { %v965_v8 = vpop.f32.mrf.mxu0  ;;  %v821_v22 = vmul.f32 %v797_v46, %v726_v0  ;;  %v1078_v25 = vmax.f32 %v1076_v12, %v1077_v60  ;;  %v1019_v60 = vld [vmem:[%s3406_s4 + $0xc8] sm:$0xff]  ;;  %v1141_v46 = vrot.slane %v3127_v40, 2 }
 0x235   :  { %v1048_v15 = vmul.f32 %v1016_v54, %v965_v8  ;;  %v2137_v16 = vpop.f32.mrf.mxu1  ;;  %v1178_v1 = vsel %vm1131_vm1, %v1047_v5, -inf  ;;  %v3133_v54 = vmax.f32 %v1147_v51, %v1148_v14  ;;  %v3149_v51 = vmax.f32 %v1160_v10, %v1161_v31  ;;  %v1021_v5 = vld [vmem:[%s3406_s4 + $0xd8] sm:$0xff]  ;;  %v1018_v14 = vld [vmem:[%s3406_s4 + $0xc0] sm:$0xff] }
 0x236   :  { %v967_v23 = vpop.f32.mrf.mxu0  ;;  %v824_v26 = vmul.f32 %v2137_v16, %v800_v55  ;;  %v1085_v36 = vmax.f32 %v821_v22, %v822_v11  ;;  %v1079_v21 = vrot.slane %v1078_v25, 4  ;;  %v1179_v42 = vmax.f32 %v1176_v32, %v1178_v1  ;;  %v805_v31 = vld [vmem:[%s3407_s3 + $0xa0] sm:$0xff] }
 0x237   :  { %v1049_v27 = vmul.f32 %v1017_v9, %v967_v23  ;;  %v736_v28 = vpop.f32.mrf.mxu1  ;;  %v1168_v3 = vmax.f32 %v1044_v18, %v1048_v15  ;;  %v1023_v15 = vld [vmem:[%s3406_s4 + $0xe8] sm:$0xff]  ;;  %v3167_v16 = vmax.f32 %v3105_v62, %v1063_v53  ;;  %v1150_v55 = vrot.slane %v3133_v54, 2 }
 0x238   :  { %v823_v29 = vmul.f32 %v799_v7, %v736_v28  ;;  %v3121_v30 = vpop.f32.mrf.mxu0  ;;  %v3155_v4 = vmax.f32 %v1078_v25, %v1079_v21  ;;  %v1163_v22 = vrot.slane %v3149_v51, 2  ;;  %v3180_v28 = vmax.f32 %v1071_v41, %v1072_v2  ;;  %v806_v41 = vld [vmem:[%s3407_s3 + $0xa8] sm:$0xff] }
 0x239   :  { %v1180_v33 = vsel %vm1131_vm1, %v1049_v27, -inf  ;;  %v2140_v34 = vpop.f32.mrf.mxu1  ;;  %v1169_v47 = vmax.f32 %v1167_v35, %v1168_v3  ;;  %v1024_v27 = vld [vmem:[%s3406_s4 + $0xf0] sm:$0xff] }
 0x23a   :  { %v1181_v37 = vmax.f32 %v1177_v19, %v1180_v33  ;;  %v1086_v38 = vmax.f32 %v823_v29, %v824_v26  ;;  %v973_v39 = vpop.f32.mrf.mxu0  ;;  %v826_v8 = vmul.f32 %v2140_v34, %v802_v17  ;;  %v1081_v32 = vrot.slane %v3155_v4, 2 }
 0x23b   :  { %v746_v43 = vpop.f32.mrf.mxu1  ;;  %v1170_v48 = vrot.slane %v1169_v47, 4  ;;  %v1051_v18 = vmul.f32 %v1019_v60, %v973_v39  ;;  %v1050_v33 = vmul.f32 %v1018_v14, %v3121_v30  ;;  %v808_v30 = vld [vmem:[%s3407_s3 + $0xb8] sm:$0xff] }
 0x23c   :  { %v1087_v50 = vmax.f32 %v1085_v36, %v1086_v38  ;;  %v977_v52 = vpop.f32.mrf.mxu0  ;;  %v1182_v56 = vmax.f32 %v1179_v42, %v1181_v37  ;;  %v825_v63 = vmul.f32 %v801_v45, %v746_v43  ;;  %v1025_v36 = vld [vmem:[%s3406_s4 + $0xf8] sm:$0xff]  ;;  %v807_v43 = vld [vmem:[%s3407_s3 + $0xb0] sm:$0xff] }
 0x23d   :  { %v2143_v49 = vpop.f32.mrf.mxu1  ;;  %v1171_v19 = vmax.f32 %v1169_v47, %v1170_v48  ;;  %v1198_v38 = vsel %vm1131_vm1, %v1051_v18, -inf  ;;  %v1052_v39 = vmul.f32 %v1020_v24, %v977_v52  ;;  %v1142_v18 = vmax.f32 %v3127_v40, %v1141_v46 }
 0x23e   :  { %v979_v0 = vpop.f32.mrf.mxu0  ;;  %v1088_v61 = vrot.slane %v1087_v50, 4  ;;  %v828_v9 = vmul.f32 %v2143_v49, %v804_v57  ;;  %v1183_v7 = vrot.slane %v1182_v56, 4  ;;  %v1094_v23 = vmax.f32 %v825_v63, %v826_v8 }
 0x23f   :  { %v756_v6 = vpop.f32.mrf.mxu1  ;;  %v1053_v25 = vmul.f32 %v1021_v5, %v979_v0 }
 0x240   :  { %v827_v10 = vmul.f32 %v803_v58, %v756_v6  ;;  %v983_v12 = vpop.f32.mrf.mxu0  ;;  %v1089_v1 = vmax.f32 %v1087_v50, %v1088_v61  ;;  %v1184_v37 = vmax.f32 %v1182_v56, %v1183_v7  ;;  %v1172_v7 = vrot.slane %v1171_v19, 2 }
 0x241   :  { %v2146_v20 = vpop.f32.mrf.mxu1  ;;  %v1054_v3 = vmul.f32 %v1022_v13, %v983_v12  ;;  %v1199_v45 = vsel %vm1131_vm1, %v1053_v25, -inf  ;;  %v1164_v13 = vmax.f32 %v3149_v51, %v1163_v22  ;;  %v1065_v25 = vrot.slane %v3167_v16, 1 }
 0x242   :  { %v1095_v11 = vmax.f32 %v827_v10, %v828_v9  ;;  %v985_v62 = vpop.f32.mrf.mxu0  ;;  %v1090_v56 = vrot.slane %v1089_v1, 2  ;;  %v830_v63 = vmul.f32 %v2146_v20, %v806_v41  ;;  %v1185_v61 = vrot.slane %v1184_v37, 2 }
 0x243   :  { %v1055_v26 = vmul.f32 %v1023_v15, %v985_v62  ;;  %v766_v29 = vpop.f32.mrf.mxu1  ;;  %v1189_v17 = vmax.f32 %v1050_v33, %v1054_v3  ;;  %v1082_v15 = vmax.f32 %v3155_v4, %v1081_v32  ;;  %v1151_v51 = vmax.f32 %v3133_v54, %v1150_v55 }
 0x244   :  { %v1096_v34 = vmax.f32 %v1094_v23, %v1095_v11  ;;  %v989_v35 = vpop.f32.mrf.mxu0  ;;  %v829_v52 = vmul.f32 %v805_v31, %v766_v29  ;;  %v1091_v20 = vmax.f32 %v1089_v1, %v1090_v56  ;;  %v1186_v11 = vmax.f32 %v1184_v37, %v1185_v61 }
 0x245   :  { %v1056_v21 = vmul.f32 %v1024_v27, %v989_v35  ;;  %v2149_v42 = vpop.f32.mrf.mxu1  ;;  %v1200_v50 = vsel %vm1131_vm1, %v1055_v26, -inf  ;;  %v1074_v4 = vrot.slane %v3180_v28, 1  ;;  %v1165_v40 = vrot.slane %v1164_v13, 1 }
 0x246   :  { %v1097_v47 = vrot.slane %v1096_v34, 4  ;;  %v991_v53 = vpop.f32.mrf.mxu0  ;;  %v832_v0 = vmul.f32 %v2149_v42, %v808_v30  ;;  %v1201_v5 = vmax.f32 %v1198_v38, %v1200_v50  ;;  %v1103_v9 = vmax.f32 %v829_v52, %v830_v63 }
 0x247   :  { %v1190_v49 = vmax.f32 %v1052_v39, %v1056_v21  ;;  %v1057_v57 = vmul.f32 %v1025_v36, %v991_v53  ;;  %v776_v58 = vpop.f32.mrf.mxu1  ;;  %v1083_v46 = vrot.slane %v1082_v15, 1  ;;  %v1173_v1 = vmax.f32 %v1171_v19, %v1172_v7  ;;  %v1374_v7 = vld [vmem:[%s3404_s7 + $0x140] sm:$0xff] }
 0x248   :  { %v1098_v60 = vmax.f32 %v1096_v34, %v1097_v47  ;;  %v831_v2 = vmul.f32 %v807_v43, %v776_v58  ;;  %v1129_v29 = vrot.slane %v3147_v59, 1  ;;  %v1092_v31 = vrot.slane %v1091_v20, 1 }
 0x249   :  { %v1191_v6 = vmax.f32 %v1189_v17, %v1190_v49  ;;  %v1202_v48 = vsel %vm1131_vm1, %v1057_v57, -inf  ;;  %v1143_v34 = vrot.slane %v1142_v18, 1  ;;  %v1187_v35 = vrot.slane %v1186_v11, 1 }
 0x24a   :  { %v1099_v8 = vrot.slane %v1098_v60, 2  ;;  %v1203_v10 = vmax.f32 %v1199_v45, %v1202_v48  ;;  %v1104_v12 = vmax.f32 %v831_v2, %v832_v0  ;;  %v1152_v38 = vrot.slane %v1151_v51, 1 }
 0x24b   :  { %v1192_v14 = vrot.slane %v1191_v6, 4  ;;  %v1075_v54 = vmax.f32 %v3180_v28, %v1074_v4  ;;  %v1066_v41 = vmax.f32 %v3167_v16, %v1065_v25  ;;  %v1166_v21 = vmax.f32 %v1164_v13, %v1165_v40  ;;  %v1376_v13 = vld [vmem:[%s3404_s7 + $0x150] sm:$0xff]  ;;  %v1365_v25 = vld [vmem:[%s3404_s7 + $0xf8] sm:$0xff]  ;;  %v1358_v4 = vld [vmem:[%s3404_s7 + $0xc0] sm:$0xff] }
 0x24c   :  { %v1204_v23 = vmax.f32 %v1201_v5, %v1203_v10  ;;  %v1105_v24 = vmax.f32 %v1103_v9, %v1104_v12  ;;  %v1100_v62 = vmax.f32 %v1098_v60, %v1099_v8  ;;  %v1084_v42 = vmax.f32 %v1082_v15, %v1083_v46  ;;  %v1377_v9 = vld [vmem:[%s3404_s7 + $0x158] sm:$0xff]  ;;  %v1352_v46 = vld [vmem:[%s3404_s7 + $0x90] sm:$0xff] }
 0x24d   :  { %v1193_v27 = vmax.f32 %v1191_v6, %v1192_v14  ;;  %v1174_v19 = vrot.slane %v1173_v1, 1  ;;  %v1093_v30 = vmax.f32 %v1091_v20, %v1092_v31  ;;  %v1144_v50 = vmax.f32 %v1142_v18, %v1143_v34  ;;  %v1379_v6 = vld [vmem:[%s3404_s7 + $0x168] sm:$0xff]  ;;  %v1373_v14 = vld [vmem:[%s3404_s7 + $0x138] sm:$0xff]  ;;  %v1370_v20 = vld [vmem:[%s3404_s7 + $0x120] sm:$0xff] }
 0x24e   :  { %v1205_v22 = vrot.slane %v1204_v23, 4  ;;  %v1106_v3 = vrot.slane %v1105_v24, 4  ;;  %v1101_v36 = vrot.slane %v1100_v62, 1  ;;  %v1188_v53 = vmax.f32 %v1186_v11, %v1187_v35  ;;  %v1371_v18 = vld [vmem:[%s3404_s7 + $0x128] sm:$0xff]  ;;  %v1364_v11 = vld [vmem:[%s3404_s7 + $0xf0] sm:$0xff]  ;;  %v1353_v40 = vld [vmem:[%s3404_s7 + $0x98] sm:$0xff] }
 0x24f   :  { %v1194_v26 = vrot.slane %v1193_v27, 2  ;;  %v1153_v56 = vmax.f32 %v1151_v51, %v1152_v38  ;;  %v1113_v49 = vsel %vm1112_vm3, %v1066_v41, %v1075_v54  ;;  %v1130_v57 = vmax.f32 %v3147_v59, %v1129_v29  ;;  %v1359_v51 = vld [vmem:[%s3404_s7 + $0xc8] sm:$0xff]  ;;  %v1346_v31 = vld [vmem:[%s3404_s7 + $0x60] sm:$0xff]  ;;  %v1341_v34 = vld [vmem:[%s3404_s7 + $0x38] sm:$0xff] }
 0x250   :  { %v1206_v32 = vmax.f32 %v1204_v23, %v1205_v22  ;;  %v1107_v33 = vmax.f32 %v1105_v24, %v1106_v3  ;;  %v1102_v52 = vmax.f32 %v1100_v62, %v1101_v36  ;;  %v1175_v58 = vmax.f32 %v1173_v1, %v1174_v19  ;;  %v1368_v23 = vld [vmem:[%s3404_s7 + $0x110] sm:$0xff]  ;;  %v1367_v24 = vld [vmem:[%s3404_s7 + $0x108] sm:$0xff]  ;;  %v1362_v62 = vld [vmem:[%s3404_s7 + $0xe0] sm:$0xff] }
 0x251   :  { %v1195_v37 = vmax.f32 %v1193_v27, %v1194_v26  ;;  %v1115_v16 = vsel %vm1114_vm2, %v1113_v49, %v1084_v42  ;;  %v1212_v60 = vsel %vm1112_vm3, %v1144_v50, %v1166_v21  ;;  %v1211_v10 = vsel %vm1112_vm3, %v1130_v57, %v1153_v56  ;;  %v1361_v27 = vld [vmem:[%s3404_s7 + $0xd8] sm:$0xff]  ;;  %v1356_v22 = vld [vmem:[%s3404_s7 + $0xb0] sm:$0xff]  ;;  %v1355_v3 = vld [vmem:[%s3404_s7 + $0xa8] sm:$0xff] }
 0x252   :  { %v1207_v55 = vrot.slane %v1206_v32, 2  ;;  %v1108_v39 = vrot.slane %v1107_v33, 2  ;;  %v1117_v0 = vsel %vm1116_vm4, %v1115_v16, %v1093_v30  ;;  %v1214_v48 = vsel %vm1114_vm2, %v1212_v60, %v1188_v53  ;;  %v1350_v1 = vld [vmem:[%s3404_s7 + $0x80] sm:$0xff]  ;;  %v1349_v26 = vld [vmem:[%s3404_s7 + $0x78] sm:$0xff]  ;;  %v1347_v29 = vld [vmem:[%s3404_s7 + $0x68] sm:$0xff] }
 0x253   :  { %v1196_v43 = vrot.slane %v1195_v37, 1  ;;  %v1119_v5 = vsel %vm1118_vm5, %v1117_v0, %v1102_v52  ;;  %v1213_v12 = vsel %vm1114_vm2, %v1211_v10, %v1175_v58  ;;  %v1340_v35 = vld [vmem:[%s3404_s7 + $0x30] sm:$0xff]  ;;  %v1338_v36 = vld [vmem:[%s3404_s7 + $0x20] sm:$0xff]  ;;  %v1335_v38 = vld [vmem:[%s3404_s7 + $0x8] sm:$0xff]  ;;  %v2161_v16 = vmov 0  }
 0x254   :  { %v1208_v45 = vmax.f32 %v1206_v32, %v1207_v55  ;;  %v1109_v47 = vmax.f32 %v1107_v33, %v1108_v39  ;;  %v1344_v32 = vld [vmem:[%s3404_s7 + $0x50] sm:$0xff]  ;;  %v1343_v33 = vld [vmem:[%s3404_s7 + $0x48] sm:$0xff]  ;;  %v1334_v54 = vld [vmem:[%s3404_s7] sm:$0xff]  ;;  %2158 = vset.pattern.permute.xlu0 %v2161_v16  ;;  %v17_v60 = vstv %s3410_s11  ;;  %v1251_v0 = vlaneseq }
 0x255   :  { %v1197_v61 = vmax.f32 %v1195_v37, %v1196_v43  ;;  %v1337_v37 = vld [vmem:[%s3404_s7 + $0x18] sm:$0xff]  ;;  %v1404_v55 = vld [vmem:[%s3404_s7 + $0x230] sm:$0xff]  ;;  %v1403_v39 = vld [vmem:[%s3404_s7 + $0x228] sm:$0xff]  ;;  %18 = vst [vmem:[#allocation2] sm:$0x1] %v17_v60 }
 0x256   :  { %v1110_v17 = vrot.slane %v1109_v47, 1  ;;  %v1209_v28 = vrot.slane %v1208_v45, 1  ;;  %v1401_v41 = vld [vmem:[%s3404_s7 + $0x218] sm:$0xff]  ;;  %v1400_v21 = vld [vmem:[%s3404_s7 + $0x210] sm:$0xff]  ;;  %v1398_v42 = vld [vmem:[%s3404_s7 + $0x200] sm:$0xff] }
 0x257   :  { %v3239_v15 = vsel %vm1116_vm4, %v1213_v12, %v1197_v61  ;;  %v1397_v19 = vld [vmem:[%s3404_s7 + $0x1f8] sm:$0xff]  ;;  %v1395_v30 = vld [vmem:[%s3404_s7 + $0x1e8] sm:$0xff]  ;;  %v1394_v43 = vld [vmem:[%s3404_s7 + $0x1e0] sm:$0xff] }
 0x258   :  { %v1111_v63 = vmax.f32 %v1109_v47, %v1110_v17  ;;  %v1210_v2 = vmax.f32 %v1208_v45, %v1209_v28  ;;  %v1392_v45 = vld [vmem:[%s3404_s7 + $0x1d0] sm:$0xff]  ;;  %v1391_v47 = vld [vmem:[%s3404_s7 + $0x1c8] sm:$0xff]  ;;  %v1389_v50 = vld [vmem:[%s3404_s7 + $0x1b8] sm:$0xff] }
 0x259   :  { %v1388_v52 = vld [vmem:[%s3404_s7 + $0x1b0] sm:$0xff]  ;;  %v1386_v53 = vld [vmem:[%s3404_s7 + $0x1a0] sm:$0xff]  ;;  %v1385_v56 = vld [vmem:[%s3404_s7 + $0x198] sm:$0xff] }
 0x25a   :  { %v1121_v59 = vsel %vm1120_vm6, %v1119_v5, %v1111_v63  ;;  %v1216_v8 = vsel %vm1116_vm4, %v1214_v48, %v1210_v2  ;;  %v1383_v17 = vld [vmem:[%s3404_s7 + $0x188] sm:$0xff]  ;;  %v1382_v49 = vld [vmem:[%s3404_s7 + $0x180] sm:$0xff]  ;;  %v1252_v2 = vshrl.u32 %v1251_v0, 7 }
 0x25b   :  { %1326 = vmatmul.mubr.f32.vlgmr.msra.gmra.mxu1 %v1121_v59  ;;  %1926 = vmatprep.mubr.msk.f32.mxu0 %vm1131_vm1, %v1216_v8  ;;  %v1570_v28 = vld [vmem:[%s3408_s9] sm:$0xff]  ;;  %v1572_v58 = vld [vmem:[%s3409_s10 + $0x8] sm:$0x3f] }
 0x25c   :  { %1427 = vmatpush1.msra.mxu1 %v1379_v6  ;;  %1925 = vmatprep.mubr.msk.f32.mxu1 %vm1131_vm1, %v1216_v8  ;;  %v1715_v57 = vcombine.high %v1570_v28, %v1570_v28  ;;  %v1927_v63 = vld [vmem:[#allocation2] ss:$0 sm:$0xff]  ;;  %v1253_v61 = vsub.s32 0, %v1252_v2  ;;  %v1257_v6 = vsub.s32 1, %v1252_v2 }
 0x25d   :  { %1428 = vmatprep.subr.mxu1 %v1377_v9  ;;  %1562 = vmatmul.mubr.f32.vlgmr.msra.gmra.mxu0 %v3239_v15  ;;  %v1249_v5 = vld [vmem:[%s3411_s6] sm:$0x3] }
 0x25e   :  { %1429 = vmatpush1.msra.mxu1 %v1376_v13  ;;  %1747 = vmatprep.subr.mxu0 %v1715_v57  ;;  %v1254_v48 = vrot.slane %v1249_v5, %v1253_v61  ;;  %v1258_v59 = vrot.slane %v1249_v5, %v1257_v6 }
 0x25f   :  { %1430 = vmatprep.subr.mxu1 %v1374_v7  ;;  %1748 = vmatpush1.xpose.msra.mxu0 %v1570_v28 }
 0x260   :  { %1431 = vmatpush1.msra.mxu1 %v1373_v14  ;;  %1794 = vperm.xlu0 %2158, %v1927_v63  }
 0x261   :  { %1432 = vmatprep.subr.mxu1 %v1371_v18  ;;  %v1406_v18 = vld [vmem:[%s3412_s8] sm:$0x7] }
 0x262   :  { %1433 = vmatpush1.msra.mxu1 %v1370_v20  ;;  %v1418_v20 = vsub.s32 2, %v1252_v2 }
 0x263   :  { %1434 = vmatprep.subr.mxu1 %v1368_v23  ;;  %v1411_v23 = vrot.slane %v1406_v18, %v1253_v61 }
 0x264   :  { %1435 = vmatpush1.msra.mxu1 %v1367_v24  ;;  %v1415_v24 = vrot.slane %v1406_v18, %v1257_v6 }
 0x265   :  { %1436 = vmatprep.subr.mxu1 %v1365_v25 }
 0x266   :  { %1437 = vmatpush1.msra.mxu1 %v1364_v11  ;;  %v1419_v11 = vrot.slane %v1406_v18, %v1418_v20 }
 0x267   :  { %1438 = vmatprep.subr.mxu1 %v1362_v62 }
 0x268   :  { %1439 = vmatpush1.msra.mxu1 %v1361_v27 }
 0x269   :  { %1440 = vmatprep.subr.mxu1 %v1359_v51 }
 0x26a   :  { %1441 = vmatpush1.msra.mxu1 %v1358_v4 }
 0x26b   :  { %1442 = vmatprep.subr.mxu1 %v1356_v22 }
 0x26c   :  { %1443 = vmatpush1.msra.mxu1 %v1355_v3 }
 0x26d   :  { %1444 = vmatprep.subr.mxu1 %v1353_v40  ;;  %v1571_v40 = vld [vmem:[%s3409_s10] sm:$0x3f] }
 0x26e   :  { %1445 = vmatpush1.msra.mxu1 %v1352_v46 }
 0x26f   :  { %1446 = vmatprep.subr.mxu1 %v1350_v1  ;;  %v1573_v1 = vld [vmem:[%s3409_s10 + $0x10] sm:$0x3f] }
 0x270   :  { %1447 = vmatpush1.msra.mxu1 %v1349_v26 }
 0x271   :  { %1448 = vmatprep.subr.mxu1 %v1347_v29 }
 0x272   :  { %1449 = vmatpush1.msra.mxu1 %v1346_v31 }
 0x273   :  { %1450 = vmatprep.subr.mxu1 %v1344_v32 }
 0x274   :  { %1451 = vmatpush1.msra.mxu1 %v1343_v33 }
 0x275   :  { %1452 = vmatprep.subr.mxu1 %v1341_v34 }
 0x276   :  { %1453 = vmatpush1.msra.mxu1 %v1340_v35 }
 0x277   :  { %1454 = vmatprep.subr.mxu1 %v1338_v36 }
 0x278   :  { %1455 = vmatpush1.msra.mxu1 %v1337_v37 }
 0x279   :  { %1456 = vmatprep.subr.mxu1 %v1335_v38 }
 0x27a   :  { %1457 = vmatpush1.msra.mxu1 %v1334_v54 }
 0x27b   :  { %1474 = vmatprep.subr.mxu1 %v1404_v55 }
 0x27c   :  { %1475 = vmatpush2.msra.mxu1 %v1403_v39 }
 0x27d   :  { %1476 = vmatprep.subr.mxu1 %v1401_v41 }
 0x27e   :  { %1477 = vmatpush2.msra.mxu1 %v1400_v21 }
 0x27f   :  { %1478 = vmatprep.subr.mxu1 %v1398_v42 }
 0x280   :  { %1479 = vmatpush2.msra.mxu1 %v1397_v19 }
 0x281   :  { %1480 = vmatprep.subr.mxu1 %v1395_v30 }
 0x282   :  { %1481 = vmatpush2.msra.mxu1 %v1394_v43 }
 0x283   :  { %1482 = vmatprep.subr.mxu1 %v1392_v45 }
 0x284   :  { %1483 = vmatpush2.msra.mxu1 %v1391_v47 }
 0x285   :  { %1484 = vmatprep.subr.mxu1 %v1389_v50 }
 0x286   :  { %1485 = vmatpush2.msra.mxu1 %v1388_v52 }
 0x287   :  { %1486 = vmatprep.subr.mxu1 %v1386_v53 }
 0x288   :  { %1487 = vmatpush2.msra.mxu1 %v1385_v56 }
 0x289   :  { %1488 = vmatprep.subr.mxu1 %v1383_v17 }
 0x28a   :  { %1489 = vmatpush2.msra.mxu1 %v1382_v49 }
 0x28b   :  { %1491 = vmatmul.mubr.f32.vlgmr.msra.gmra.mxu1 %v3239_v15 }
 0x28c   :  { %1638 = vmatprep.mubr.f32.mxu1 %v1572_v58 }
 0x2db   :  { %v1795_v36 = vpop.permute.xlu0 %1794 }
 0x31b   :  { %v1327_v8 = vpop.f32.mrf.mxu1 }
 0x31c   :  { %v1328_v9 = vadd.f32 %v1327_v8, %v1254_v48 }
 0x31d   :  { %v1563_v10 = vpop.f32.mrf.mxu0  ;;  %v1329_v12 = vpop.f32.mrf.mxu1 }
 0x31e   :  { %v1330_v13 = vadd.f32 %v1329_v12, %v1258_v59  ;;  %v1332_v14 = vmax.f32 %v1328_v9, 0.0  ;;  %v1564_v22 = vadd.f32 %v1563_v10, %v1419_v11 }
 0x31f   :  { %v1565_v15 = vpop.f32.mrf.mxu0 }
 0x320   :  { %v1333_v7 = vmax.f32 %v1330_v13, 0.0  ;;  %v1569_v46 = vmax.f32 %v1564_v22, 0.0 }
 0x322   :  { %1781 = vmatprep.mubr.f32.mxu0 %v1333_v7 }
 0x323   :  { %1782 = vmatmul.mubr.f32.vlgmr.msra.gmra.mxu0 %v1332_v14 }
 0x34b   :  { %v1492_v25 = vpop.f32.mrf.mxu1 }
 0x34c   :  { %v1493_v62 = vadd.f32 %v1492_v25, %v1411_v23 }
 0x34d   :  { %v1494_v27 = vpop.f32.mrf.mxu1 }
 0x34e   :  { %v1495_v51 = vadd.f32 %v1494_v27, %v1415_v24  ;;  %v1567_v3 = vmax.f32 %v1493_v62, 0.0 }
 0x350   :  { %v1568_v4 = vmax.f32 %v1495_v51, 0.0 }
 0x352   :  { %1604 = vmatprep.subr.mxu1 %v1568_v4 }
 0x353   :  { %1605 = vmatpush1.xpose.msra.mxu1 %v1567_v3 }
 0x354   :  { %2150 = vmatprep.subr.mxu1 %v2160_v44 }
 0x356   :  { %1639 = vmatmul.mubr.f32.vlgmr.msra.gmra.mxu1 %v1571_v40 }
 0x357   :  { %2151 = vmatpush3.xpose.msra.mxu1 %v1569_v46  ;;  %2152 = vmatprep.mubr.msk.f32.mxu1 %vm2162_vm7, %v2160_v44 }
 0x35a   :  { %2153 = vmatmul.mubr.f32.vlgmr.msra.gmra.mxu1 %v1573_v1 }
 0x3e3   :  { %v1783_v26 = vpop.f32.mrf.mxu0 }
 0x3e5   :  { %v1785_v29 = vpop.f32.mrf.mxu0 }
 0x416   :  { %v1640_v31 = vpop.f32.mrf.mxu1 }
 0x418   :  { %v1642_v32 = vpop.f32.mrf.mxu1 }
 0x41a   :  { %v1710_v33 = vpop.f32.mrf.mxu1 }
 0x41b   :  { %v1711_v34 = vadd.f32 %v1710_v33, %v1640_v31 }
 0x41c   :  { %v2154_v35 = vpop.f32.mrf.mxu1 }
 0x41d   :  { %v1784_v37 = vadd.f32 %v1783_v26, %v1711_v34 }
 0x41f   :  { %v1797_v38 = vadd.f32 %v1795_v36, %v1784_v37 }
 0x421   :  { %1799 = vst.msk [vmem:[%s3413_s12] sm:$0x3f] %vm1798_vm8, %v1797_v38 }

</bundles_post_ra>
